<compile_context>
chip_gen: v5e
topology: v5e:2x2
jax: 0.10.0
libtpu: 0.0.40
codegen_flags: <defaults>
</compile_context>

<pallas_src>
import numpy as np
import jax
import jax.numpy as jnp
from jax.experimental import pallas as pl
from jax.experimental.pallas import tpu as pltpu

VMEM = pltpu.MemorySpace.VMEM
EPS = 1e-5
FC_LANES = 128          # pad fc output to a full 128-lane store
NUM_CLASSES = 2


# ----------------------------- Pallas kernel --------------------------------

def _mxu(a, b):
    """bf16 x bf16 MXU matmul with f32 accumulation (epilogue stays f32 on the VPU)."""
    return jnp.dot(a.astype(jnp.bfloat16), b.astype(jnp.bfloat16),
                   preferred_element_type=jnp.float32)


def _gather_conv(y, gather, wmat, shift, n_taps):
    """Convolution on a VMEM-resident activation matrix.

    y      : (M_in, Cin) f32 activations, rows = (b, h, w) row-major, channels in lanes.
    gather : (n_taps*M_out, M_in) bf16 one-hot matrix; row t*M_out+m selects the input
             row feeding tap t of output position m (all-zero row at zero-padding
             boundaries), so stride / padding are baked into the constant.
    wmat   : (n_taps*Cin, Cout) bf16 BN-scale-folded weights (im2col row layout).
    shift  : (1, Cout) f32 folded BN shift (conv bias absorbed).
    """
    m_out = gather.shape[0] // n_taps
    c_in = y.shape[1]
    taps = _mxu(gather, y)                       # (n_taps*M_out, Cin), f32 accum
    out = None
    for t in range(n_taps):                      # 9 small per-tap dots, f32 accumulate
        part = _mxu(taps[t * m_out:(t + 1) * m_out, :],
                    wmat[t * c_in:(t + 1) * c_in, :])
        out = part if out is None else out + part
    return out + shift                           # f32 epilogue


def audio_classifier_kernel(
        # data-dependent inputs (prepared from x in the wrapper)
        col1_ref, xs1_ref,
        # layer1 constants
        w1c1_ref, b1c1_ref, w1sk_ref, b1sk_ref, g1c2_ref, w1c2_ref, b1c2_ref,
        # layer2 constants
        g2c1_ref, w2c1_ref, b2c1_ref, g2sk_ref, w2sk_ref, b2sk_ref,
        g2c2_ref, w2c2_ref, b2c2_ref,
        # layer3 constants
        g3c1_ref, w3c1_ref, b3c1_ref, g3sk_ref, w3sk_ref, b3sk_ref,
        g3c2_ref, w3c2_ref, b3c2_ref,
        # head
        pool_ref, wfc_ref, bfc_ref,
        # output
        out_ref):
    # ---- layer1: (B,16,16,1) -> (B,8,8,16).  conv1 uses the wrapper-built 128x9 im2col.
    y = jnp.maximum(_mxu(col1_ref[...], w1c1_ref[...]) + b1c1_ref[...], 0.0)
    # 1x1 stride-2 skip on the 1-channel input: a cheap f32 VPU broadcast multiply.
    sk = xs1_ref[...] * w1sk_ref[...] + b1sk_ref[...]
    c2 = _gather_conv(y, g1c2_ref[...], w1c2_ref[...], b1c2_ref[...], n_taps=9)
    x1 = jnp.maximum(c2 + sk, 0.0)                               # (B*64, 16)

    # ---- layer2: (B,8,8,16) -> (B,4,4,32)
    y = jnp.maximum(_gather_conv(x1, g2c1_ref[...], w2c1_ref[...], b2c1_ref[...],
                                 n_taps=9), 0.0)
    sk = _gather_conv(x1, g2sk_ref[...], w2sk_ref[...], b2sk_ref[...], n_taps=1)
    c2 = _gather_conv(y, g2c2_ref[...], w2c2_ref[...], b2c2_ref[...], n_taps=9)
    x2 = jnp.maximum(c2 + sk, 0.0)                               # (B*16, 32)

    # ---- layer3: (B,4,4,32) -> (B,2,2,64)
    y = jnp.maximum(_gather_conv(x2, g3c1_ref[...], w3c1_ref[...], b3c1_ref[...],
                                 n_taps=9), 0.0)
    sk = _gather_conv(x2, g3sk_ref[...], w3sk_ref[...], b3sk_ref[...], n_taps=1)
    c2 = _gather_conv(y, g3c2_ref[...], w3c2_ref[...], b3c2_ref[...], n_taps=9)
    x3 = jnp.maximum(c2 + sk, 0.0)                               # (B*4, 64)

    # ---- global average pool + fc (f32, tiny), padded head -> one full (8,128) vreg ----
    pooled = jnp.dot(pool_ref[...], x3, preferred_element_type=jnp.float32)       # (Bpad, 64)
    out_ref[...] = (jnp.dot(pooled, wfc_ref[...], preferred_element_type=jnp.float32)
                    + bfc_ref[...])                              # single unmasked HBM store


# ------------------------------ JAX glue -------------------------------------

def _pad_batch(b):
    return max(8, ((b + 7) // 8) * 8)


def im2col(x, kh, kw, stride, pad):
    """x: NHWC -> (B*OH*OW, kh*kw*C).  Only used for the raw 1-channel network input."""
    B, H, W, C = x.shape
    if pad:
        x = jnp.pad(x, ((0, 0), (pad, pad), (pad, pad), (0, 0)))
    OH = (H + 2 * pad - kh) // stride + 1
    OW = (W + 2 * pad - kw) // stride + 1
    cols = []
    for i in range(kh):
        for j in range(kw):
            cols.append(x[:, i:i + stride * (OH - 1) + 1:stride,
                          j:j + stride * (OW - 1) + 1:stride, :])
    col = jnp.concatenate(cols, axis=-1)
    return col.reshape(B * OH * OW, kh * kw * C), OH, OW


def _fold_bn(w, b, gamma, beta, mean, var):
    """Fold eval-mode BatchNorm (and the conv bias) into the im2col weight matrix."""
    cout, cin, kh, kw = w.shape
    scale = gamma / jnp.sqrt(var + EPS)                                   # (Cout,)
    wmat = jnp.transpose(w, (2, 3, 1, 0)).reshape(kh * kw * cin, cout) * scale[None, :]
    shift = (beta + scale * (b - mean)).reshape(1, cout)
    return wmat, shift.astype(jnp.float32)


def _gather_matrix(B, Hin, Win, k, stride, pad):
    """One-hot gather constant: row t*M_out+m selects the input row feeding tap t of
    output position m (zero row where the tap lands in the zero padding)."""
    Hout = (Hin + 2 * pad - k) // stride + 1
    Wout = (Win + 2 * pad - k) // stride + 1
    M_in, M_out = B * Hin * Win, B * Hout * Wout
    G = np.zeros((k * k * M_out, M_in), np.float32)
    for bb in range(B):
        for oh in range(Hout):
            for ow in range(Wout):
                m = (bb * Hout + oh) * Wout + ow
                for di in range(k):
                    for dj in range(k):
                        h = oh * stride + di - pad
                        w = ow * stride + dj - pad
                        if 0 <= h < Hin and 0 <= w < Win:
                            G[(di * k + dj) * M_out + m, (bb * Hin + h) * Win + w] = 1.0
    return jnp.asarray(G, dtype=jnp.bfloat16), Hout, Wout


def build_kernel_consts(params, batch, height, width):
    """Fold BN into (bf16) weights and build the constant gather / pool matrices."""
    bf16 = jnp.bfloat16
    consts = []

    # ---- layer1 (1 -> 16 channels) ----
    p = params["layer1"]
    w1, s1 = _fold_bn(p["conv1_w"], p["conv1_b"], p["bn1_g"], p["bn1_b"], p["bn1_m"], p["bn1_v"])
    wsk, ssk = _fold_bn(p["skip_w"], p["skip_b"], p["bns_g"], p["bns_b"], p["bns_m"], p["bns_v"])
    w2, s2 = _fold_bn(p["conv2_w"], p["conv2_b"], p["bn2_g"], p["bn2_b"], p["bn2_m"], p["bn2_v"])
    H1 = (height + 2 - 3) // 2 + 1
    W1 = (width + 2 - 3) // 2 + 1
    g1c2, _, _ = _gather_matrix(batch, H1, W1, k=3, stride=1, pad=1)
    consts += [w1.astype(bf16), s1,
               wsk.astype(jnp.float32), ssk,          # layer1 skip stays on the f32 VPU path
               g1c2, w2.astype(bf16), s2]

    # ---- layer2 (16 -> 32) and layer3 (32 -> 64) ----
    Hin, Win = H1, W1
    for name in ("layer2", "layer3"):
        p = params[name]
        w1, s1 = _fold_bn(p["conv1_w"], p["conv1_b"], p["bn1_g"], p["bn1_b"], p["bn1_m"], p["bn1_v"])
        wsk, ssk = _fold_bn(p["skip_w"], p["skip_b"], p["bns_g"], p["bns_b"], p["bns_m"], p["bns_v"])
        w2, s2 = _fold_bn(p["conv2_w"], p["conv2_b"], p["bn2_g"], p["bn2_b"], p["bn2_m"], p["bn2_v"])
        gc1, Hout, Wout = _gather_matrix(batch, Hin, Win, k=3, stride=2, pad=1)
        gsk, _, _ = _gather_matrix(batch, Hin, Win, k=1, stride=2, pad=0)
        gc2, _, _ = _gather_matrix(batch, Hout, Wout, k=3, stride=1, pad=1)
        consts += [gc1, w1.astype(bf16), s1,
                   gsk, wsk.astype(bf16), ssk,
                   gc2, w2.astype(bf16), s2]
        Hin, Win = Hout, Wout

    # ---- head: global average pool + fc, padded to (8, 128) for a lane-dense store ----
    b_pad = _pad_batch(batch)
    pool = np.zeros((b_pad, batch * Hin * Win), np.float32)
    for bb in range(batch):
        pool[bb, bb * Hin * Win:(bb + 1) * Hin * Win] = 1.0 / (Hin * Win)
    fc_w = jnp.pad(params["fc_w"].astype(jnp.float32),
                   ((0, 0), (0, FC_LANES - NUM_CLASSES)))                 # (64, 128)
    fc_b = jnp.pad(params["fc_b"].astype(jnp.float32),
                   ((0, 0), (0, FC_LANES - NUM_CLASSES)))                 # (1, 128)
    consts += [jnp.asarray(pool), fc_w, fc_b]
    return tuple(consts)


def audio_classifier_forward(x_nchw, consts):
    """NCHW input -> (B, 2) logits; everything past input patching runs in ONE pallas_call."""
    B = x_nchw.shape[0]
    b_pad = _pad_batch(B)
    x = jnp.transpose(x_nchw, (0, 2, 3, 1))                     # NHWC, C = 1
    col1, OH, OW = im2col(x, 3, 3, stride=2, pad=1)             # (B*OH*OW, 9)  ~5 KB
    xs1 = x[:, ::2, ::2, :].reshape(B * OH * OW, 1)             # 1x1 stride-2 skip taps
    out_pad = pl.pallas_call(
        audio_classifier_kernel,
        out_shape=jax.ShapeDtypeStruct((b_pad, FC_LANES), jnp.float32),
        in_specs=[pl.BlockSpec(memory_space=VMEM)] * (2 + len(consts)),
        out_specs=pl.BlockSpec(memory_space=VMEM),
    )(col1.astype(jnp.bfloat16), xs1.astype(jnp.float32), *consts)
    return out_pad[:B, :NUM_CLASSES]                             # (B, 2) real logits


# --------------------------- parameter init ----------------------------------

def init_bn(key, c):
    k1, k2, k3, k4 = jax.random.split(key, 4)
    return dict(
        g=1.0 + 0.1 * jax.random.normal(k1, (c,), jnp.float32),
        b=0.1 * jax.random.normal(k2, (c,), jnp.float32),
        m=0.1 * jax.random.normal(k3, (c,), jnp.float32),
        v=1.0 + 0.1 * jnp.abs(jax.random.normal(k4, (c,), jnp.float32)),
    )


def init_conv(key, cout, cin, kh, kw):
    k1, k2 = jax.random.split(key)
    fan_in = cin * kh * kw
    w = jax.random.normal(k1, (cout, cin, kh, kw), jnp.float32) / jnp.sqrt(float(fan_in))
    b = 0.1 * jax.random.normal(k2, (cout,), jnp.float32)
    return w, b


def init_block(key, cin, cout):
    ks = jax.random.split(key, 6)
    c1w, c1b = init_conv(ks[0], cout, cin, 3, 3)
    c2w, c2b = init_conv(ks[1], cout, cout, 3, 3)
    csw, csb = init_conv(ks[2], cout, cin, 1, 1)
    bn1 = init_bn(ks[3], cout)
    bn2 = init_bn(ks[4], cout)
    bns = init_bn(ks[5], cout)
    return dict(
        conv1_w=c1w, conv1_b=c1b,
        conv2_w=c2w, conv2_b=c2b,
        skip_w=csw, skip_b=csb,
        bn1_g=bn1["g"], bn1_b=bn1["b"], bn1_m=bn1["m"], bn1_v=bn1["v"],
        bn2_g=bn2["g"], bn2_b=bn2["b"], bn2_m=bn2["m"], bn2_v=bn2["v"],
        bns_g=bns["g"], bns_b=bns["b"], bns_m=bns["m"], bns_v=bns["v"],
    )


def init_params(key):
    k1, k2, k3, k4, k5 = jax.random.split(key, 5)
    fc_w = jax.random.normal(k4, (2, 64), jnp.float32) / jnp.sqrt(64.0)   # PyTorch (out,in)
    fc_b = 0.1 * jax.random.normal(k5, (2,), jnp.float32)
    return dict(
        layer1=init_block(k1, 1, 16),
        layer2=init_block(k2, 16, 32),
        layer3=init_block(k3, 32, 64),
        fc_w=jnp.transpose(fc_w),          # (64, 2) for A @ W
        fc_b=fc_b[None, :],                # (1, 2)
    )


# --------------------------------- main ---------------------------------------

if __name__ == "__main__":
    key = jax.random.PRNGKey(0)
    kx, kp = jax.random.split(key)
    x = jax.random.normal(kx, (2, 1, 16, 16), jnp.float32)   # NCHW, like PyTorch
    params = init_params(kp)
    consts = build_kernel_consts(params, batch=2, height=16, width=16)

    fwd = jax.jit(audio_classifier_forward)
    out = fwd(x, consts)
    jax.block_until_ready(out)
    assert out.shape == (2, 2), out.shape
    print("KERNEL_OK")
</pallas_src>

<mosaic_0001>
module attributes {stable_mosaic.version = 11 : i64} {
  func.func @audio_classifier_kernel(%arg0: memref<128x9xbf16, #tpu.memory_space<vmem>>, %arg1: memref<128x1xf32, #tpu.memory_space<vmem>>, %arg2: memref<9x16xbf16, #tpu.memory_space<vmem>>, %arg3: memref<1x16xf32, #tpu.memory_space<vmem>>, %arg4: memref<1x16xf32, #tpu.memory_space<vmem>>, %arg5: memref<1x16xf32, #tpu.memory_space<vmem>>, %arg6: memref<1152x128xbf16, #tpu.memory_space<vmem>>, %arg7: memref<144x16xbf16, #tpu.memory_space<vmem>>, %arg8: memref<1x16xf32, #tpu.memory_space<vmem>>, %arg9: memref<288x128xbf16, #tpu.memory_space<vmem>>, %arg10: memref<144x32xbf16, #tpu.memory_space<vmem>>, %arg11: memref<1x32xf32, #tpu.memory_space<vmem>>, %arg12: memref<32x128xbf16, #tpu.memory_space<vmem>>, %arg13: memref<16x32xbf16, #tpu.memory_space<vmem>>, %arg14: memref<1x32xf32, #tpu.memory_space<vmem>>, %arg15: memref<288x32xbf16, #tpu.memory_space<vmem>>, %arg16: memref<288x32xbf16, #tpu.memory_space<vmem>>, %arg17: memref<1x32xf32, #tpu.memory_space<vmem>>, %arg18: memref<72x32xbf16, #tpu.memory_space<vmem>>, %arg19: memref<288x64xbf16, #tpu.memory_space<vmem>>, %arg20: memref<1x64xf32, #tpu.memory_space<vmem>>, %arg21: memref<8x32xbf16, #tpu.memory_space<vmem>>, %arg22: memref<32x64xbf16, #tpu.memory_space<vmem>>, %arg23: memref<1x64xf32, #tpu.memory_space<vmem>>, %arg24: memref<72x8xbf16, #tpu.memory_space<vmem>>, %arg25: memref<576x64xbf16, #tpu.memory_space<vmem>>, %arg26: memref<1x64xf32, #tpu.memory_space<vmem>>, %arg27: memref<8x8xf32, #tpu.memory_space<vmem>>, %arg28: memref<64x128xf32, #tpu.memory_space<vmem>>, %arg29: memref<1x128xf32, #tpu.memory_space<vmem>>, %arg30: memref<8x128xf32, #tpu.memory_space<vmem>>) attributes {dimension_semantics = [], scalar_prefetch = 0 : i64, scratch_operands = 0 : i64, tpu.core_type = #tpu.core_type<tc>} {
    %c0 = arith.constant 0 : index
    %c0_0 = arith.constant 0 : index
    %0 = vector.load %arg0[%c0, %c0_0] : memref<128x9xbf16, #tpu.memory_space<vmem>>, vector<128x9xbf16>
    %c0_1 = arith.constant 0 : index
    %c0_2 = arith.constant 0 : index
    %1 = vector.load %arg2[%c0_1, %c0_2] : memref<9x16xbf16, #tpu.memory_space<vmem>>, vector<9x16xbf16>
    %cst = arith.constant dense<0.000000e+00> : vector<128x16xf32>
    %2 = tpu.matmul %0, %1, %cst {dimension_numbers = #tpu.dot_dimension_numbers<[1], [0], [0], [1], [0, 0, 1, 1], [], []>} : vector<128x9xbf16>, vector<9x16xbf16>, vector<128x16xf32> -> vector<128x16xf32>
    %c0_3 = arith.constant 0 : index
    %c0_4 = arith.constant 0 : index
    %3 = vector.load %arg3[%c0_3, %c0_4] : memref<1x16xf32, #tpu.memory_space<vmem>>, vector<1x16xf32>
    %4 = vector.broadcast %3 : vector<1x16xf32> to vector<128x16xf32>
    %5 = arith.addf %2, %4 : vector<128x16xf32>
    %cst_5 = arith.constant 0.000000e+00 : f32
    %6 = vector.broadcast %cst_5 : f32 to vector<128x16xf32>
    %7 = arith.maximumf %5, %6 : vector<128x16xf32>
    %c0_6 = arith.constant 0 : index
    %c0_7 = arith.constant 0 : index
    %8 = vector.load %arg1[%c0_6, %c0_7] : memref<128x1xf32, #tpu.memory_space<vmem>>, vector<128x1xf32>
    %c0_8 = arith.constant 0 : index
    %c0_9 = arith.constant 0 : index
    %9 = vector.load %arg4[%c0_8, %c0_9] : memref<1x16xf32, #tpu.memory_space<vmem>>, vector<1x16xf32>
    %10 = vector.broadcast %8 : vector<128x1xf32> to vector<128x16xf32>
    %11 = vector.broadcast %9 : vector<1x16xf32> to vector<128x16xf32>
    %12 = arith.mulf %10, %11 : vector<128x16xf32>
    %c0_10 = arith.constant 0 : index
    %c0_11 = arith.constant 0 : index
    %13 = vector.load %arg5[%c0_10, %c0_11] : memref<1x16xf32, #tpu.memory_space<vmem>>, vector<1x16xf32>
    %14 = vector.broadcast %13 : vector<1x16xf32> to vector<128x16xf32>
    %15 = arith.addf %12, %14 : vector<128x16xf32>
    %c0_12 = arith.constant 0 : index
    %c0_13 = arith.constant 0 : index
    %16 = vector.load %arg6[%c0_12, %c0_13] : memref<1152x128xbf16, #tpu.memory_space<vmem>>, vector<1152x128xbf16>
    %c0_14 = arith.constant 0 : index
    %c0_15 = arith.constant 0 : index
    %17 = vector.load %arg7[%c0_14, %c0_15] : memref<144x16xbf16, #tpu.memory_space<vmem>>, vector<144x16xbf16>
    %c0_16 = arith.constant 0 : index
    %c0_17 = arith.constant 0 : index
    %18 = vector.load %arg8[%c0_16, %c0_17] : memref<1x16xf32, #tpu.memory_space<vmem>>, vector<1x16xf32>
    %19 = arith.truncf %7 : vector<128x16xf32> to vector<128x16xbf16>
    %cst_18 = arith.constant dense<0.000000e+00> : vector<1152x16xf32>
    %20 = tpu.matmul %16, %19, %cst_18 {dimension_numbers = #tpu.dot_dimension_numbers<[1], [0], [0], [1], [0, 0, 1, 1], [], []>} : vector<1152x128xbf16>, vector<128x16xbf16>, vector<1152x16xf32> -> vector<1152x16xf32>
    %21 = vector.extract_strided_slice %20 {offsets = [0, 0], sizes = [128, 16], strides = [1, 1]} : vector<1152x16xf32> to vector<128x16xf32>
    %22 = vector.extract_strided_slice %17 {offsets = [0, 0], sizes = [16, 16], strides = [1, 1]} : vector<144x16xbf16> to vector<16x16xbf16>
    %23 = arith.truncf %21 : vector<128x16xf32> to vector<128x16xbf16>
    %cst_19 = arith.constant dense<0.000000e+00> : vector<128x16xf32>
    %24 = tpu.matmul %23, %22, %cst_19 {dimension_numbers = #tpu.dot_dimension_numbers<[1], [0], [0], [1], [0, 0, 1, 1], [], []>} : vector<128x16xbf16>, vector<16x16xbf16>, vector<128x16xf32> -> vector<128x16xf32>
    %25 = vector.extract_strided_slice %20 {offsets = [128, 0], sizes = [128, 16], strides = [1, 1]} : vector<1152x16xf32> to vector<128x16xf32>
    %26 = vector.extract_strided_slice %17 {offsets = [16, 0], sizes = [16, 16], strides = [1, 1]} : vector<144x16xbf16> to vector<16x16xbf16>
    %27 = arith.truncf %25 : vector<128x16xf32> to vector<128x16xbf16>
    %cst_20 = arith.constant dense<0.000000e+00> : vector<128x16xf32>
    %28 = tpu.matmul %27, %26, %cst_20 {dimension_numbers = #tpu.dot_dimension_numbers<[1], [0], [0], [1], [0, 0, 1, 1], [], []>} : vector<128x16xbf16>, vector<16x16xbf16>, vector<128x16xf32> -> vector<128x16xf32>
    %29 = arith.addf %24, %28 : vector<128x16xf32>
    %30 = vector.extract_strided_slice %20 {offsets = [256, 0], sizes = [128, 16], strides = [1, 1]} : vector<1152x16xf32> to vector<128x16xf32>
    %31 = vector.extract_strided_slice %17 {offsets = [32, 0], sizes = [16, 16], strides = [1, 1]} : vector<144x16xbf16> to vector<16x16xbf16>
    %32 = arith.truncf %30 : vector<128x16xf32> to vector<128x16xbf16>
    %cst_21 = arith.constant dense<0.000000e+00> : vector<128x16xf32>
    %33 = tpu.matmul %32, %31, %cst_21 {dimension_numbers = #tpu.dot_dimension_numbers<[1], [0], [0], [1], [0, 0, 1, 1], [], []>} : vector<128x16xbf16>, vector<16x16xbf16>, vector<128x16xf32> -> vector<128x16xf32>
    %34 = arith.addf %29, %33 : vector<128x16xf32>
    %35 = vector.extract_strided_slice %20 {offsets = [384, 0], sizes = [128, 16], strides = [1, 1]} : vector<1152x16xf32> to vector<128x16xf32>
    %36 = vector.extract_strided_slice %17 {offsets = [48, 0], sizes = [16, 16], strides = [1, 1]} : vector<144x16xbf16> to vector<16x16xbf16>
    %37 = arith.truncf %35 : vector<128x16xf32> to vector<128x16xbf16>
    %cst_22 = arith.constant dense<0.000000e+00> : vector<128x16xf32>
    %38 = tpu.matmul %37, %36, %cst_22 {dimension_numbers = #tpu.dot_dimension_numbers<[1], [0], [0], [1], [0, 0, 1, 1], [], []>} : vector<128x16xbf16>, vector<16x16xbf16>, vector<128x16xf32> -> vector<128x16xf32>
    %39 = arith.addf %34, %38 : vector<128x16xf32>
    %40 = vector.extract_strided_slice %20 {offsets = [512, 0], sizes = [128, 16], strides = [1, 1]} : vector<1152x16xf32> to vector<128x16xf32>
    %41 = vector.extract_strided_slice %17 {offsets = [64, 0], sizes = [16, 16], strides = [1, 1]} : vector<144x16xbf16> to vector<16x16xbf16>
    %42 = arith.truncf %40 : vector<128x16xf32> to vector<128x16xbf16>
    %cst_23 = arith.constant dense<0.000000e+00> : vector<128x16xf32>
    %43 = tpu.matmul %42, %41, %cst_23 {dimension_numbers = #tpu.dot_dimension_numbers<[1], [0], [0], [1], [0, 0, 1, 1], [], []>} : vector<128x16xbf16>, vector<16x16xbf16>, vector<128x16xf32> -> vector<128x16xf32>
    %44 = arith.addf %39, %43 : vector<128x16xf32>
    %45 = vector.extract_strided_slice %20 {offsets = [640, 0], sizes = [128, 16], strides = [1, 1]} : vector<1152x16xf32> to vector<128x16xf32>
    %46 = vector.extract_strided_slice %17 {offsets = [80, 0], sizes = [16, 16], strides = [1, 1]} : vector<144x16xbf16> to vector<16x16xbf16>
    %47 = arith.truncf %45 : vector<128x16xf32> to vector<128x16xbf16>
    %cst_24 = arith.constant dense<0.000000e+00> : vector<128x16xf32>
    %48 = tpu.matmul %47, %46, %cst_24 {dimension_numbers = #tpu.dot_dimension_numbers<[1], [0], [0], [1], [0, 0, 1, 1], [], []>} : vector<128x16xbf16>, vector<16x16xbf16>, vector<128x16xf32> -> vector<128x16xf32>
    %49 = arith.addf %44, %48 : vector<128x16xf32>
    %50 = vector.extract_strided_slice %20 {offsets = [768, 0], sizes = [128, 16], strides = [1, 1]} : vector<1152x16xf32> to vector<128x16xf32>
    %51 = vector.extract_strided_slice %17 {offsets = [96, 0], sizes = [16, 16], strides = [1, 1]} : vector<144x16xbf16> to vector<16x16xbf16>
    %52 = arith.truncf %50 : vector<128x16xf32> to vector<128x16xbf16>
    %cst_25 = arith.constant dense<0.000000e+00> : vector<128x16xf32>
    %53 = tpu.matmul %52, %51, %cst_25 {dimension_numbers = #tpu.dot_dimension_numbers<[1], [0], [0], [1], [0, 0, 1, 1], [], []>} : vector<128x16xbf16>, vector<16x16xbf16>, vector<128x16xf32> -> vector<128x16xf32>
    %54 = arith.addf %49, %53 : vector<128x16xf32>
    %55 = vector.extract_strided_slice %20 {offsets = [896, 0], sizes = [128, 16], strides = [1, 1]} : vector<1152x16xf32> to vector<128x16xf32>
    %56 = vector.extract_strided_slice %17 {offsets = [112, 0], sizes = [16, 16], strides = [1, 1]} : vector<144x16xbf16> to vector<16x16xbf16>
    %57 = arith.truncf %55 : vector<128x16xf32> to vector<128x16xbf16>
    %cst_26 = arith.constant dense<0.000000e+00> : vector<128x16xf32>
    %58 = tpu.matmul %57, %56, %cst_26 {dimension_numbers = #tpu.dot_dimension_numbers<[1], [0], [0], [1], [0, 0, 1, 1], [], []>} : vector<128x16xbf16>, vector<16x16xbf16>, vector<128x16xf32> -> vector<128x16xf32>
    %59 = arith.addf %54, %58 : vector<128x16xf32>
    %60 = vector.extract_strided_slice %20 {offsets = [1024, 0], sizes = [128, 16], strides = [1, 1]} : vector<1152x16xf32> to vector<128x16xf32>
    %61 = vector.extract_strided_slice %17 {offsets = [128, 0], sizes = [16, 16], strides = [1, 1]} : vector<144x16xbf16> to vector<16x16xbf16>
    %62 = arith.truncf %60 : vector<128x16xf32> to vector<128x16xbf16>
    %cst_27 = arith.constant dense<0.000000e+00> : vector<128x16xf32>
    %63 = tpu.matmul %62, %61, %cst_27 {dimension_numbers = #tpu.dot_dimension_numbers<[1], [0], [0], [1], [0, 0, 1, 1], [], []>} : vector<128x16xbf16>, vector<16x16xbf16>, vector<128x16xf32> -> vector<128x16xf32>
    %64 = arith.addf %59, %63 : vector<128x16xf32>
    %65 = vector.broadcast %18 : vector<1x16xf32> to vector<128x16xf32>
    %66 = arith.addf %64, %65 : vector<128x16xf32>
    %67 = arith.addf %66, %15 : vector<128x16xf32>
    %cst_28 = arith.constant 0.000000e+00 : f32
    %68 = vector.broadcast %cst_28 : f32 to vector<128x16xf32>
    %69 = arith.maximumf %67, %68 : vector<128x16xf32>
    %c0_29 = arith.constant 0 : index
    %c0_30 = arith.constant 0 : index
    %70 = vector.load %arg9[%c0_29, %c0_30] : memref<288x128xbf16, #tpu.memory_space<vmem>>, vector<288x128xbf16>
    %c0_31 = arith.constant 0 : index
    %c0_32 = arith.constant 0 : index
    %71 = vector.load %arg10[%c0_31, %c0_32] : memref<144x32xbf16, #tpu.memory_space<vmem>>, vector<144x32xbf16>
    %c0_33 = arith.constant 0 : index
    %c0_34 = arith.constant 0 : index
    %72 = vector.load %arg11[%c0_33, %c0_34] : memref<1x32xf32, #tpu.memory_space<vmem>>, vector<1x32xf32>
    %73 = arith.truncf %69 : vector<128x16xf32> to vector<128x16xbf16>
    %cst_35 = arith.constant dense<0.000000e+00> : vector<288x16xf32>
    %74 = tpu.matmul %70, %73, %cst_35 {dimension_numbers = #tpu.dot_dimension_numbers<[1], [0], [0], [1], [0, 0, 1, 1], [], []>} : vector<288x128xbf16>, vector<128x16xbf16>, vector<288x16xf32> -> vector<288x16xf32>
    %75 = vector.extract_strided_slice %74 {offsets = [0, 0], sizes = [32, 16], strides = [1, 1]} : vector<288x16xf32> to vector<32x16xf32>
    %76 = vector.extract_strided_slice %71 {offsets = [0, 0], sizes = [16, 32], strides = [1, 1]} : vector<144x32xbf16> to vector<16x32xbf16>
    %77 = arith.truncf %75 : vector<32x16xf32> to vector<32x16xbf16>
    %cst_36 = arith.constant dense<0.000000e+00> : vector<32x32xf32>
    %78 = tpu.matmul %77, %76, %cst_36 {dimension_numbers = #tpu.dot_dimension_numbers<[1], [0], [0], [1], [0, 0, 1, 1], [], []>} : vector<32x16xbf16>, vector<16x32xbf16>, vector<32x32xf32> -> vector<32x32xf32>
    %79 = vector.extract_strided_slice %74 {offsets = [32, 0], sizes = [32, 16], strides = [1, 1]} : vector<288x16xf32> to vector<32x16xf32>
    %80 = vector.extract_strided_slice %71 {offsets = [16, 0], sizes = [16, 32], strides = [1, 1]} : vector<144x32xbf16> to vector<16x32xbf16>
    %81 = arith.truncf %79 : vector<32x16xf32> to vector<32x16xbf16>
    %cst_37 = arith.constant dense<0.000000e+00> : vector<32x32xf32>
    %82 = tpu.matmul %81, %80, %cst_37 {dimension_numbers = #tpu.dot_dimension_numbers<[1], [0], [0], [1], [0, 0, 1, 1], [], []>} : vector<32x16xbf16>, vector<16x32xbf16>, vector<32x32xf32> -> vector<32x32xf32>
    %83 = arith.addf %78, %82 : vector<32x32xf32>
    %84 = vector.extract_strided_slice %74 {offsets = [64, 0], sizes = [32, 16], strides = [1, 1]} : vector<288x16xf32> to vector<32x16xf32>
    %85 = vector.extract_strided_slice %71 {offsets = [32, 0], sizes = [16, 32], strides = [1, 1]} : vector<144x32xbf16> to vector<16x32xbf16>
    %86 = arith.truncf %84 : vector<32x16xf32> to vector<32x16xbf16>
    %cst_38 = arith.constant dense<0.000000e+00> : vector<32x32xf32>
    %87 = tpu.matmul %86, %85, %cst_38 {dimension_numbers = #tpu.dot_dimension_numbers<[1], [0], [0], [1], [0, 0, 1, 1], [], []>} : vector<32x16xbf16>, vector<16x32xbf16>, vector<32x32xf32> -> vector<32x32xf32>
    %88 = arith.addf %83, %87 : vector<32x32xf32>
    %89 = vector.extract_strided_slice %74 {offsets = [96, 0], sizes = [32, 16], strides = [1, 1]} : vector<288x16xf32> to vector<32x16xf32>
    %90 = vector.extract_strided_slice %71 {offsets = [48, 0], sizes = [16, 32], strides = [1, 1]} : vector<144x32xbf16> to vector<16x32xbf16>
    %91 = arith.truncf %89 : vector<32x16xf32> to vector<32x16xbf16>
    %cst_39 = arith.constant dense<0.000000e+00> : vector<32x32xf32>
    %92 = tpu.matmul %91, %90, %cst_39 {dimension_numbers = #tpu.dot_dimension_numbers<[1], [0], [0], [1], [0, 0, 1, 1], [], []>} : vector<32x16xbf16>, vector<16x32xbf16>, vector<32x32xf32> -> vector<32x32xf32>
    %93 = arith.addf %88, %92 : vector<32x32xf32>
    %94 = vector.extract_strided_slice %74 {offsets = [128, 0], sizes = [32, 16], strides = [1, 1]} : vector<288x16xf32> to vector<32x16xf32>
    %95 = vector.extract_strided_slice %71 {offsets = [64, 0], sizes = [16, 32], strides = [1, 1]} : vector<144x32xbf16> to vector<16x32xbf16>
    %96 = arith.truncf %94 : vector<32x16xf32> to vector<32x16xbf16>
    %cst_40 = arith.constant dense<0.000000e+00> : vector<32x32xf32>
    %97 = tpu.matmul %96, %95, %cst_40 {dimension_numbers = #tpu.dot_dimension_numbers<[1], [0], [0], [1], [0, 0, 1, 1], [], []>} : vector<32x16xbf16>, vector<16x32xbf16>, vector<32x32xf32> -> vector<32x32xf32>
    %98 = arith.addf %93, %97 : vector<32x32xf32>
    %99 = vector.extract_strided_slice %74 {offsets = [160, 0], sizes = [32, 16], strides = [1, 1]} : vector<288x16xf32> to vector<32x16xf32>
    %100 = vector.extract_strided_slice %71 {offsets = [80, 0], sizes = [16, 32], strides = [1, 1]} : vector<144x32xbf16> to vector<16x32xbf16>
    %101 = arith.truncf %99 : vector<32x16xf32> to vector<32x16xbf16>
    %cst_41 = arith.constant dense<0.000000e+00> : vector<32x32xf32>
    %102 = tpu.matmul %101, %100, %cst_41 {dimension_numbers = #tpu.dot_dimension_numbers<[1], [0], [0], [1], [0, 0, 1, 1], [], []>} : vector<32x16xbf16>, vector<16x32xbf16>, vector<32x32xf32> -> vector<32x32xf32>
    %103 = arith.addf %98, %102 : vector<32x32xf32>
    %104 = vector.extract_strided_slice %74 {offsets = [192, 0], sizes = [32, 16], strides = [1, 1]} : vector<288x16xf32> to vector<32x16xf32>
    %105 = vector.extract_strided_slice %71 {offsets = [96, 0], sizes = [16, 32], strides = [1, 1]} : vector<144x32xbf16> to vector<16x32xbf16>
    %106 = arith.truncf %104 : vector<32x16xf32> to vector<32x16xbf16>
    %cst_42 = arith.constant dense<0.000000e+00> : vector<32x32xf32>
    %107 = tpu.matmul %106, %105, %cst_42 {dimension_numbers = #tpu.dot_dimension_numbers<[1], [0], [0], [1], [0, 0, 1, 1], [], []>} : vector<32x16xbf16>, vector<16x32xbf16>, vector<32x32xf32> -> vector<32x32xf32>
    %108 = arith.addf %103, %107 : vector<32x32xf32>
    %109 = vector.extract_strided_slice %74 {offsets = [224, 0], sizes = [32, 16], strides = [1, 1]} : vector<288x16xf32> to vector<32x16xf32>
    %110 = vector.extract_strided_slice %71 {offsets = [112, 0], sizes = [16, 32], strides = [1, 1]} : vector<144x32xbf16> to vector<16x32xbf16>
    %111 = arith.truncf %109 : vector<32x16xf32> to vector<32x16xbf16>
    %cst_43 = arith.constant dense<0.000000e+00> : vector<32x32xf32>
    %112 = tpu.matmul %111, %110, %cst_43 {dimension_numbers = #tpu.dot_dimension_numbers<[1], [0], [0], [1], [0, 0, 1, 1], [], []>} : vector<32x16xbf16>, vector<16x32xbf16>, vector<32x32xf32> -> vector<32x32xf32>
    %113 = arith.addf %108, %112 : vector<32x32xf32>
    %114 = vector.extract_strided_slice %74 {offsets = [256, 0], sizes = [32, 16], strides = [1, 1]} : vector<288x16xf32> to vector<32x16xf32>
    %115 = vector.extract_strided_slice %71 {offsets = [128, 0], sizes = [16, 32], strides = [1, 1]} : vector<144x32xbf16> to vector<16x32xbf16>
    %116 = arith.truncf %114 : vector<32x16xf32> to vector<32x16xbf16>
    %cst_44 = arith.constant dense<0.000000e+00> : vector<32x32xf32>
    %117 = tpu.matmul %116, %115, %cst_44 {dimension_numbers = #tpu.dot_dimension_numbers<[1], [0], [0], [1], [0, 0, 1, 1], [], []>} : vector<32x16xbf16>, vector<16x32xbf16>, vector<32x32xf32> -> vector<32x32xf32>
    %118 = arith.addf %113, %117 : vector<32x32xf32>
    %119 = vector.broadcast %72 : vector<1x32xf32> to vector<32x32xf32>
    %120 = arith.addf %118, %119 : vector<32x32xf32>
    %cst_45 = arith.constant 0.000000e+00 : f32
    %121 = vector.broadcast %cst_45 : f32 to vector<32x32xf32>
    %122 = arith.maximumf %120, %121 : vector<32x32xf32>
    %c0_46 = arith.constant 0 : index
    %c0_47 = arith.constant 0 : index
    %123 = vector.load %arg12[%c0_46, %c0_47] : memref<32x128xbf16, #tpu.memory_space<vmem>>, vector<32x128xbf16>
    %c0_48 = arith.constant 0 : index
    %c0_49 = arith.constant 0 : index
    %124 = vector.load %arg13[%c0_48, %c0_49] : memref<16x32xbf16, #tpu.memory_space<vmem>>, vector<16x32xbf16>
    %c0_50 = arith.constant 0 : index
    %c0_51 = arith.constant 0 : index
    %125 = vector.load %arg14[%c0_50, %c0_51] : memref<1x32xf32, #tpu.memory_space<vmem>>, vector<1x32xf32>
    %126 = arith.truncf %69 : vector<128x16xf32> to vector<128x16xbf16>
    %cst_52 = arith.constant dense<0.000000e+00> : vector<32x16xf32>
    %127 = tpu.matmul %123, %126, %cst_52 {dimension_numbers = #tpu.dot_dimension_numbers<[1], [0], [0], [1], [0, 0, 1, 1], [], []>} : vector<32x128xbf16>, vector<128x16xbf16>, vector<32x16xf32> -> vector<32x16xf32>
    %128 = arith.truncf %127 : vector<32x16xf32> to vector<32x16xbf16>
    %cst_53 = arith.constant dense<0.000000e+00> : vector<32x32xf32>
    %129 = tpu.matmul %128, %124, %cst_53 {dimension_numbers = #tpu.dot_dimension_numbers<[1], [0], [0], [1], [0, 0, 1, 1], [], []>} : vector<32x16xbf16>, vector<16x32xbf16>, vector<32x32xf32> -> vector<32x32xf32>
    %130 = vector.broadcast %125 : vector<1x32xf32> to vector<32x32xf32>
    %131 = arith.addf %129, %130 : vector<32x32xf32>
    %c0_54 = arith.constant 0 : index
    %c0_55 = arith.constant 0 : index
    %132 = vector.load %arg15[%c0_54, %c0_55] : memref<288x32xbf16, #tpu.memory_space<vmem>>, vector<288x32xbf16>
    %c0_56 = arith.constant 0 : index
    %c0_57 = arith.constant 0 : index
    %133 = vector.load %arg16[%c0_56, %c0_57] : memref<288x32xbf16, #tpu.memory_space<vmem>>, vector<288x32xbf16>
    %c0_58 = arith.constant 0 : index
    %c0_59 = arith.constant 0 : index
    %134 = vector.load %arg17[%c0_58, %c0_59] : memref<1x32xf32, #tpu.memory_space<vmem>>, vector<1x32xf32>
    %135 = arith.truncf %122 : vector<32x32xf32> to vector<32x32xbf16>
    %cst_60 = arith.constant dense<0.000000e+00> : vector<288x32xf32>
    %136 = tpu.matmul %132, %135, %cst_60 {dimension_numbers = #tpu.dot_dimension_numbers<[1], [0], [0], [1], [0, 0, 1, 1], [], []>} : vector<288x32xbf16>, vector<32x32xbf16>, vector<288x32xf32> -> vector<288x32xf32>
    %137 = vector.extract_strided_slice %136 {offsets = [0, 0], sizes = [32, 32], strides = [1, 1]} : vector<288x32xf32> to vector<32x32xf32>
    %138 = vector.extract_strided_slice %133 {offsets = [0, 0], sizes = [32, 32], strides = [1, 1]} : vector<288x32xbf16> to vector<32x32xbf16>
    %139 = arith.truncf %137 : vector<32x32xf32> to vector<32x32xbf16>
    %cst_61 = arith.constant dense<0.000000e+00> : vector<32x32xf32>
    %140 = tpu.matmul %139, %138, %cst_61 {dimension_numbers = #tpu.dot_dimension_numbers<[1], [0], [0], [1], [0, 0, 1, 1], [], []>} : vector<32x32xbf16>, vector<32x32xbf16>, vector<32x32xf32> -> vector<32x32xf32>
    %141 = vector.extract_strided_slice %136 {offsets = [32, 0], sizes = [32, 32], strides = [1, 1]} : vector<288x32xf32> to vector<32x32xf32>
    %142 = vector.extract_strided_slice %133 {offsets = [32, 0], sizes = [32, 32], strides = [1, 1]} : vector<288x32xbf16> to vector<32x32xbf16>
    %143 = arith.truncf %141 : vector<32x32xf32> to vector<32x32xbf16>
    %cst_62 = arith.constant dense<0.000000e+00> : vector<32x32xf32>
    %144 = tpu.matmul %143, %142, %cst_62 {dimension_numbers = #tpu.dot_dimension_numbers<[1], [0], [0], [1], [0, 0, 1, 1], [], []>} : vector<32x32xbf16>, vector<32x32xbf16>, vector<32x32xf32> -> vector<32x32xf32>
    %145 = arith.addf %140, %144 : vector<32x32xf32>
    %146 = vector.extract_strided_slice %136 {offsets = [64, 0], sizes = [32, 32], strides = [1, 1]} : vector<288x32xf32> to vector<32x32xf32>
    %147 = vector.extract_strided_slice %133 {offsets = [64, 0], sizes = [32, 32], strides = [1, 1]} : vector<288x32xbf16> to vector<32x32xbf16>
    %148 = arith.truncf %146 : vector<32x32xf32> to vector<32x32xbf16>
    %cst_63 = arith.constant dense<0.000000e+00> : vector<32x32xf32>
    %149 = tpu.matmul %148, %147, %cst_63 {dimension_numbers = #tpu.dot_dimension_numbers<[1], [0], [0], [1], [0, 0, 1, 1], [], []>} : vector<32x32xbf16>, vector<32x32xbf16>, vector<32x32xf32> -> vector<32x32xf32>
    %150 = arith.addf %145, %149 : vector<32x32xf32>
    %151 = vector.extract_strided_slice %136 {offsets = [96, 0], sizes = [32, 32], strides = [1, 1]} : vector<288x32xf32> to vector<32x32xf32>
    %152 = vector.extract_strided_slice %133 {offsets = [96, 0], sizes = [32, 32], strides = [1, 1]} : vector<288x32xbf16> to vector<32x32xbf16>
    %153 = arith.truncf %151 : vector<32x32xf32> to vector<32x32xbf16>
    %cst_64 = arith.constant dense<0.000000e+00> : vector<32x32xf32>
    %154 = tpu.matmul %153, %152, %cst_64 {dimension_numbers = #tpu.dot_dimension_numbers<[1], [0], [0], [1], [0, 0, 1, 1], [], []>} : vector<32x32xbf16>, vector<32x32xbf16>, vector<32x32xf32> -> vector<32x32xf32>
    %155 = arith.addf %150, %154 : vector<32x32xf32>
    %156 = vector.extract_strided_slice %136 {offsets = [128, 0], sizes = [32, 32], strides = [1, 1]} : vector<288x32xf32> to vector<32x32xf32>
    %157 = vector.extract_strided_slice %133 {offsets = [128, 0], sizes = [32, 32], strides = [1, 1]} : vector<288x32xbf16> to vector<32x32xbf16>
    %158 = arith.truncf %156 : vector<32x32xf32> to vector<32x32xbf16>
    %cst_65 = arith.constant dense<0.000000e+00> : vector<32x32xf32>
    %159 = tpu.matmul %158, %157, %cst_65 {dimension_numbers = #tpu.dot_dimension_numbers<[1], [0], [0], [1], [0, 0, 1, 1], [], []>} : vector<32x32xbf16>, vector<32x32xbf16>, vector<32x32xf32> -> vector<32x32xf32>
    %160 = arith.addf %155, %159 : vector<32x32xf32>
    %161 = vector.extract_strided_slice %136 {offsets = [160, 0], sizes = [32, 32], strides = [1, 1]} : vector<288x32xf32> to vector<32x32xf32>
    %162 = vector.extract_strided_slice %133 {offsets = [160, 0], sizes = [32, 32], strides = [1, 1]} : vector<288x32xbf16> to vector<32x32xbf16>
    %163 = arith.truncf %161 : vector<32x32xf32> to vector<32x32xbf16>
    %cst_66 = arith.constant dense<0.000000e+00> : vector<32x32xf32>
    %164 = tpu.matmul %163, %162, %cst_66 {dimension_numbers = #tpu.dot_dimension_numbers<[1], [0], [0], [1], [0, 0, 1, 1], [], []>} : vector<32x32xbf16>, vector<32x32xbf16>, vector<32x32xf32> -> vector<32x32xf32>
    %165 = arith.addf %160, %164 : vector<32x32xf32>
    %166 = vector.extract_strided_slice %136 {offsets = [192, 0], sizes = [32, 32], strides = [1, 1]} : vector<288x32xf32> to vector<32x32xf32>
    %167 = vector.extract_strided_slice %133 {offsets = [192, 0], sizes = [32, 32], strides = [1, 1]} : vector<288x32xbf16> to vector<32x32xbf16>
    %168 = arith.truncf %166 : vector<32x32xf32> to vector<32x32xbf16>
    %cst_67 = arith.constant dense<0.000000e+00> : vector<32x32xf32>
    %169 = tpu.matmul %168, %167, %cst_67 {dimension_numbers = #tpu.dot_dimension_numbers<[1], [0], [0], [1], [0, 0, 1, 1], [], []>} : vector<32x32xbf16>, vector<32x32xbf16>, vector<32x32xf32> -> vector<32x32xf32>
    %170 = arith.addf %165, %169 : vector<32x32xf32>
    %171 = vector.extract_strided_slice %136 {offsets = [224, 0], sizes = [32, 32], strides = [1, 1]} : vector<288x32xf32> to vector<32x32xf32>
    %172 = vector.extract_strided_slice %133 {offsets = [224, 0], sizes = [32, 32], strides = [1, 1]} : vector<288x32xbf16> to vector<32x32xbf16>
    %173 = arith.truncf %171 : vector<32x32xf32> to vector<32x32xbf16>
    %cst_68 = arith.constant dense<0.000000e+00> : vector<32x32xf32>
    %174 = tpu.matmul %173, %172, %cst_68 {dimension_numbers = #tpu.dot_dimension_numbers<[1], [0], [0], [1], [0, 0, 1, 1], [], []>} : vector<32x32xbf16>, vector<32x32xbf16>, vector<32x32xf32> -> vector<32x32xf32>
    %175 = arith.addf %170, %174 : vector<32x32xf32>
    %176 = vector.extract_strided_slice %136 {offsets = [256, 0], sizes = [32, 32], strides = [1, 1]} : vector<288x32xf32> to vector<32x32xf32>
    %177 = vector.extract_strided_slice %133 {offsets = [256, 0], sizes = [32, 32], strides = [1, 1]} : vector<288x32xbf16> to vector<32x32xbf16>
    %178 = arith.truncf %176 : vector<32x32xf32> to vector<32x32xbf16>
    %cst_69 = arith.constant dense<0.000000e+00> : vector<32x32xf32>
    %179 = tpu.matmul %178, %177, %cst_69 {dimension_numbers = #tpu.dot_dimension_numbers<[1], [0], [0], [1], [0, 0, 1, 1], [], []>} : vector<32x32xbf16>, vector<32x32xbf16>, vector<32x32xf32> -> vector<32x32xf32>
    %180 = arith.addf %175, %179 : vector<32x32xf32>
    %181 = vector.broadcast %134 : vector<1x32xf32> to vector<32x32xf32>
    %182 = arith.addf %180, %181 : vector<32x32xf32>
    %183 = arith.addf %182, %131 : vector<32x32xf32>
    %cst_70 = arith.constant 0.000000e+00 : f32
    %184 = vector.broadcast %cst_70 : f32 to vector<32x32xf32>
    %185 = arith.maximumf %183, %184 : vector<32x32xf32>
    %c0_71 = arith.constant 0 : index
    %c0_72 = arith.constant 0 : index
    %186 = vector.load %arg18[%c0_71, %c0_72] : memref<72x32xbf16, #tpu.memory_space<vmem>>, vector<72x32xbf16>
    %c0_73 = arith.constant 0 : index
    %c0_74 = arith.constant 0 : index
    %187 = vector.load %arg19[%c0_73, %c0_74] : memref<288x64xbf16, #tpu.memory_space<vmem>>, vector<288x64xbf16>
    %c0_75 = arith.constant 0 : index
    %c0_76 = arith.constant 0 : index
    %188 = vector.load %arg20[%c0_75, %c0_76] : memref<1x64xf32, #tpu.memory_space<vmem>>, vector<1x64xf32>
    %189 = arith.truncf %185 : vector<32x32xf32> to vector<32x32xbf16>
    %cst_77 = arith.constant dense<0.000000e+00> : vector<72x32xf32>
    %190 = tpu.matmul %186, %189, %cst_77 {dimension_numbers = #tpu.dot_dimension_numbers<[1], [0], [0], [1], [0, 0, 1, 1], [], []>} : vector<72x32xbf16>, vector<32x32xbf16>, vector<72x32xf32> -> vector<72x32xf32>
    %191 = vector.extract_strided_slice %190 {offsets = [0, 0], sizes = [8, 32], strides = [1, 1]} : vector<72x32xf32> to vector<8x32xf32>
    %192 = vector.extract_strided_slice %187 {offsets = [0, 0], sizes = [32, 64], strides = [1, 1]} : vector<288x64xbf16> to vector<32x64xbf16>
    %193 = arith.truncf %191 : vector<8x32xf32> to vector<8x32xbf16>
    %cst_78 = arith.constant dense<0.000000e+00> : vector<8x64xf32>
    %194 = tpu.matmul %193, %192, %cst_78 {dimension_numbers = #tpu.dot_dimension_numbers<[1], [0], [0], [1], [0, 0, 1, 1], [], []>} : vector<8x32xbf16>, vector<32x64xbf16>, vector<8x64xf32> -> vector<8x64xf32>
    %195 = vector.extract_strided_slice %190 {offsets = [8, 0], sizes = [8, 32], strides = [1, 1]} : vector<72x32xf32> to vector<8x32xf32>
    %196 = vector.extract_strided_slice %187 {offsets = [32, 0], sizes = [32, 64], strides = [1, 1]} : vector<288x64xbf16> to vector<32x64xbf16>
    %197 = arith.truncf %195 : vector<8x32xf32> to vector<8x32xbf16>
    %cst_79 = arith.constant dense<0.000000e+00> : vector<8x64xf32>
    %198 = tpu.matmul %197, %196, %cst_79 {dimension_numbers = #tpu.dot_dimension_numbers<[1], [0], [0], [1], [0, 0, 1, 1], [], []>} : vector<8x32xbf16>, vector<32x64xbf16>, vector<8x64xf32> -> vector<8x64xf32>
    %199 = arith.addf %194, %198 : vector<8x64xf32>
    %200 = vector.extract_strided_slice %190 {offsets = [16, 0], sizes = [8, 32], strides = [1, 1]} : vector<72x32xf32> to vector<8x32xf32>
    %201 = vector.extract_strided_slice %187 {offsets = [64, 0], sizes = [32, 64], strides = [1, 1]} : vector<288x64xbf16> to vector<32x64xbf16>
    %202 = arith.truncf %200 : vector<8x32xf32> to vector<8x32xbf16>
    %cst_80 = arith.constant dense<0.000000e+00> : vector<8x64xf32>
    %203 = tpu.matmul %202, %201, %cst_80 {dimension_numbers = #tpu.dot_dimension_numbers<[1], [0], [0], [1], [0, 0, 1, 1], [], []>} : vector<8x32xbf16>, vector<32x64xbf16>, vector<8x64xf32> -> vector<8x64xf32>
    %204 = arith.addf %199, %203 : vector<8x64xf32>
    %205 = vector.extract_strided_slice %190 {offsets = [24, 0], sizes = [8, 32], strides = [1, 1]} : vector<72x32xf32> to vector<8x32xf32>
    %206 = vector.extract_strided_slice %187 {offsets = [96, 0], sizes = [32, 64], strides = [1, 1]} : vector<288x64xbf16> to vector<32x64xbf16>
    %207 = arith.truncf %205 : vector<8x32xf32> to vector<8x32xbf16>
    %cst_81 = arith.constant dense<0.000000e+00> : vector<8x64xf32>
    %208 = tpu.matmul %207, %206, %cst_81 {dimension_numbers = #tpu.dot_dimension_numbers<[1], [0], [0], [1], [0, 0, 1, 1], [], []>} : vector<8x32xbf16>, vector<32x64xbf16>, vector<8x64xf32> -> vector<8x64xf32>
    %209 = arith.addf %204, %208 : vector<8x64xf32>
    %210 = vector.extract_strided_slice %190 {offsets = [32, 0], sizes = [8, 32], strides = [1, 1]} : vector<72x32xf32> to vector<8x32xf32>
    %211 = vector.extract_strided_slice %187 {offsets = [128, 0], sizes = [32, 64], strides = [1, 1]} : vector<288x64xbf16> to vector<32x64xbf16>
    %212 = arith.truncf %210 : vector<8x32xf32> to vector<8x32xbf16>
    %cst_82 = arith.constant dense<0.000000e+00> : vector<8x64xf32>
    %213 = tpu.matmul %212, %211, %cst_82 {dimension_numbers = #tpu.dot_dimension_numbers<[1], [0], [0], [1], [0, 0, 1, 1], [], []>} : vector<8x32xbf16>, vector<32x64xbf16>, vector<8x64xf32> -> vector<8x64xf32>
    %214 = arith.addf %209, %213 : vector<8x64xf32>
    %215 = vector.extract_strided_slice %190 {offsets = [40, 0], sizes = [8, 32], strides = [1, 1]} : vector<72x32xf32> to vector<8x32xf32>
    %216 = vector.extract_strided_slice %187 {offsets = [160, 0], sizes = [32, 64], strides = [1, 1]} : vector<288x64xbf16> to vector<32x64xbf16>
    %217 = arith.truncf %215 : vector<8x32xf32> to vector<8x32xbf16>
    %cst_83 = arith.constant dense<0.000000e+00> : vector<8x64xf32>
    %218 = tpu.matmul %217, %216, %cst_83 {dimension_numbers = #tpu.dot_dimension_numbers<[1], [0], [0], [1], [0, 0, 1, 1], [], []>} : vector<8x32xbf16>, vector<32x64xbf16>, vector<8x64xf32> -> vector<8x64xf32>
    %219 = arith.addf %214, %218 : vector<8x64xf32>
    %220 = vector.extract_strided_slice %190 {offsets = [48, 0], sizes = [8, 32], strides = [1, 1]} : vector<72x32xf32> to vector<8x32xf32>
    %221 = vector.extract_strided_slice %187 {offsets = [192, 0], sizes = [32, 64], strides = [1, 1]} : vector<288x64xbf16> to vector<32x64xbf16>
    %222 = arith.truncf %220 : vector<8x32xf32> to vector<8x32xbf16>
    %cst_84 = arith.constant dense<0.000000e+00> : vector<8x64xf32>
    %223 = tpu.matmul %222, %221, %cst_84 {dimension_numbers = #tpu.dot_dimension_numbers<[1], [0], [0], [1], [0, 0, 1, 1], [], []>} : vector<8x32xbf16>, vector<32x64xbf16>, vector<8x64xf32> -> vector<8x64xf32>
    %224 = arith.addf %219, %223 : vector<8x64xf32>
    %225 = vector.extract_strided_slice %190 {offsets = [56, 0], sizes = [8, 32], strides = [1, 1]} : vector<72x32xf32> to vector<8x32xf32>
    %226 = vector.extract_strided_slice %187 {offsets = [224, 0], sizes = [32, 64], strides = [1, 1]} : vector<288x64xbf16> to vector<32x64xbf16>
    %227 = arith.truncf %225 : vector<8x32xf32> to vector<8x32xbf16>
    %cst_85 = arith.constant dense<0.000000e+00> : vector<8x64xf32>
    %228 = tpu.matmul %227, %226, %cst_85 {dimension_numbers = #tpu.dot_dimension_numbers<[1], [0], [0], [1], [0, 0, 1, 1], [], []>} : vector<8x32xbf16>, vector<32x64xbf16>, vector<8x64xf32> -> vector<8x64xf32>
    %229 = arith.addf %224, %228 : vector<8x64xf32>
    %230 = vector.extract_strided_slice %190 {offsets = [64, 0], sizes = [8, 32], strides = [1, 1]} : vector<72x32xf32> to vector<8x32xf32>
    %231 = vector.extract_strided_slice %187 {offsets = [256, 0], sizes = [32, 64], strides = [1, 1]} : vector<288x64xbf16> to vector<32x64xbf16>
    %232 = arith.truncf %230 : vector<8x32xf32> to vector<8x32xbf16>
    %cst_86 = arith.constant dense<0.000000e+00> : vector<8x64xf32>
    %233 = tpu.matmul %232, %231, %cst_86 {dimension_numbers = #tpu.dot_dimension_numbers<[1], [0], [0], [1], [0, 0, 1, 1], [], []>} : vector<8x32xbf16>, vector<32x64xbf16>, vector<8x64xf32> -> vector<8x64xf32>
    %234 = arith.addf %229, %233 : vector<8x64xf32>
    %235 = vector.broadcast %188 : vector<1x64xf32> to vector<8x64xf32>
    %236 = arith.addf %234, %235 : vector<8x64xf32>
    %cst_87 = arith.constant 0.000000e+00 : f32
    %237 = vector.broadcast %cst_87 : f32 to vector<8x64xf32>
    %238 = arith.maximumf %236, %237 : vector<8x64xf32>
    %c0_88 = arith.constant 0 : index
    %c0_89 = arith.constant 0 : index
    %239 = vector.load %arg21[%c0_88, %c0_89] : memref<8x32xbf16, #tpu.memory_space<vmem>>, vector<8x32xbf16>
    %c0_90 = arith.constant 0 : index
    %c0_91 = arith.constant 0 : index
    %240 = vector.load %arg22[%c0_90, %c0_91] : memref<32x64xbf16, #tpu.memory_space<vmem>>, vector<32x64xbf16>
    %c0_92 = arith.constant 0 : index
    %c0_93 = arith.constant 0 : index
    %241 = vector.load %arg23[%c0_92, %c0_93] : memref<1x64xf32, #tpu.memory_space<vmem>>, vector<1x64xf32>
    %242 = arith.truncf %185 : vector<32x32xf32> to vector<32x32xbf16>
    %cst_94 = arith.constant dense<0.000000e+00> : vector<8x32xf32>
    %243 = tpu.matmul %239, %242, %cst_94 {dimension_numbers = #tpu.dot_dimension_numbers<[1], [0], [0], [1], [0, 0, 1, 1], [], []>} : vector<8x32xbf16>, vector<32x32xbf16>, vector<8x32xf32> -> vector<8x32xf32>
    %244 = arith.truncf %243 : vector<8x32xf32> to vector<8x32xbf16>
    %cst_95 = arith.constant dense<0.000000e+00> : vector<8x64xf32>
    %245 = tpu.matmul %244, %240, %cst_95 {dimension_numbers = #tpu.dot_dimension_numbers<[1], [0], [0], [1], [0, 0, 1, 1], [], []>} : vector<8x32xbf16>, vector<32x64xbf16>, vector<8x64xf32> -> vector<8x64xf32>
    %246 = vector.broadcast %241 : vector<1x64xf32> to vector<8x64xf32>
    %247 = arith.addf %245, %246 : vector<8x64xf32>
    %c0_96 = arith.constant 0 : index
    %c0_97 = arith.constant 0 : index
    %248 = vector.load %arg24[%c0_96, %c0_97] : memref<72x8xbf16, #tpu.memory_space<vmem>>, vector<72x8xbf16>
    %c0_98 = arith.constant 0 : index
    %c0_99 = arith.constant 0 : index
    %249 = vector.load %arg25[%c0_98, %c0_99] : memref<576x64xbf16, #tpu.memory_space<vmem>>, vector<576x64xbf16>
    %c0_100 = arith.constant 0 : index
    %c0_101 = arith.constant 0 : index
    %250 = vector.load %arg26[%c0_100, %c0_101] : memref<1x64xf32, #tpu.memory_space<vmem>>, vector<1x64xf32>
    %251 = arith.truncf %238 : vector<8x64xf32> to vector<8x64xbf16>
    %cst_102 = arith.constant dense<0.000000e+00> : vector<72x64xf32>
    %252 = tpu.matmul %248, %251, %cst_102 {dimension_numbers = #tpu.dot_dimension_numbers<[1], [0], [0], [1], [0, 0, 1, 1], [], []>} : vector<72x8xbf16>, vector<8x64xbf16>, vector<72x64xf32> -> vector<72x64xf32>
    %253 = vector.extract_strided_slice %252 {offsets = [0, 0], sizes = [8, 64], strides = [1, 1]} : vector<72x64xf32> to vector<8x64xf32>
    %254 = vector.extract_strided_slice %249 {offsets = [0, 0], sizes = [64, 64], strides = [1, 1]} : vector<576x64xbf16> to vector<64x64xbf16>
    %255 = arith.truncf %253 : vector<8x64xf32> to vector<8x64xbf16>
    %cst_103 = arith.constant dense<0.000000e+00> : vector<8x64xf32>
    %256 = tpu.matmul %255, %254, %cst_103 {dimension_numbers = #tpu.dot_dimension_numbers<[1], [0], [0], [1], [0, 0, 1, 1], [], []>} : vector<8x64xbf16>, vector<64x64xbf16>, vector<8x64xf32> -> vector<8x64xf32>
    %257 = vector.extract_strided_slice %252 {offsets = [8, 0], sizes = [8, 64], strides = [1, 1]} : vector<72x64xf32> to vector<8x64xf32>
    %258 = vector.extract_strided_slice %249 {offsets = [64, 0], sizes = [64, 64], strides = [1, 1]} : vector<576x64xbf16> to vector<64x64xbf16>
    %259 = arith.truncf %257 : vector<8x64xf32> to vector<8x64xbf16>
    %cst_104 = arith.constant dense<0.000000e+00> : vector<8x64xf32>
    %260 = tpu.matmul %259, %258, %cst_104 {dimension_numbers = #tpu.dot_dimension_numbers<[1], [0], [0], [1], [0, 0, 1, 1], [], []>} : vector<8x64xbf16>, vector<64x64xbf16>, vector<8x64xf32> -> vector<8x64xf32>
    %261 = arith.addf %256, %260 : vector<8x64xf32>
    %262 = vector.extract_strided_slice %252 {offsets = [16, 0], sizes = [8, 64], strides = [1, 1]} : vector<72x64xf32> to vector<8x64xf32>
    %263 = vector.extract_strided_slice %249 {offsets = [128, 0], sizes = [64, 64], strides = [1, 1]} : vector<576x64xbf16> to vector<64x64xbf16>
    %264 = arith.truncf %262 : vector<8x64xf32> to vector<8x64xbf16>
    %cst_105 = arith.constant dense<0.000000e+00> : vector<8x64xf32>
    %265 = tpu.matmul %264, %263, %cst_105 {dimension_numbers = #tpu.dot_dimension_numbers<[1], [0], [0], [1], [0, 0, 1, 1], [], []>} : vector<8x64xbf16>, vector<64x64xbf16>, vector<8x64xf32> -> vector<8x64xf32>
    %266 = arith.addf %261, %265 : vector<8x64xf32>
    %267 = vector.extract_strided_slice %252 {offsets = [24, 0], sizes = [8, 64], strides = [1, 1]} : vector<72x64xf32> to vector<8x64xf32>
    %268 = vector.extract_strided_slice %249 {offsets = [192, 0], sizes = [64, 64], strides = [1, 1]} : vector<576x64xbf16> to vector<64x64xbf16>
    %269 = arith.truncf %267 : vector<8x64xf32> to vector<8x64xbf16>
    %cst_106 = arith.constant dense<0.000000e+00> : vector<8x64xf32>
    %270 = tpu.matmul %269, %268, %cst_106 {dimension_numbers = #tpu.dot_dimension_numbers<[1], [0], [0], [1], [0, 0, 1, 1], [], []>} : vector<8x64xbf16>, vector<64x64xbf16>, vector<8x64xf32> -> vector<8x64xf32>
    %271 = arith.addf %266, %270 : vector<8x64xf32>
    %272 = vector.extract_strided_slice %252 {offsets = [32, 0], sizes = [8, 64], strides = [1, 1]} : vector<72x64xf32> to vector<8x64xf32>
    %273 = vector.extract_strided_slice %249 {offsets = [256, 0], sizes = [64, 64], strides = [1, 1]} : vector<576x64xbf16> to vector<64x64xbf16>
    %274 = arith.truncf %272 : vector<8x64xf32> to vector<8x64xbf16>
    %cst_107 = arith.constant dense<0.000000e+00> : vector<8x64xf32>
    %275 = tpu.matmul %274, %273, %cst_107 {dimension_numbers = #tpu.dot_dimension_numbers<[1], [0], [0], [1], [0, 0, 1, 1], [], []>} : vector<8x64xbf16>, vector<64x64xbf16>, vector<8x64xf32> -> vector<8x64xf32>
    %276 = arith.addf %271, %275 : vector<8x64xf32>
    %277 = vector.extract_strided_slice %252 {offsets = [40, 0], sizes = [8, 64], strides = [1, 1]} : vector<72x64xf32> to vector<8x64xf32>
    %278 = vector.extract_strided_slice %249 {offsets = [320, 0], sizes = [64, 64], strides = [1, 1]} : vector<576x64xbf16> to vector<64x64xbf16>
    %279 = arith.truncf %277 : vector<8x64xf32> to vector<8x64xbf16>
    %cst_108 = arith.constant dense<0.000000e+00> : vector<8x64xf32>
    %280 = tpu.matmul %279, %278, %cst_108 {dimension_numbers = #tpu.dot_dimension_numbers<[1], [0], [0], [1], [0, 0, 1, 1], [], []>} : vector<8x64xbf16>, vector<64x64xbf16>, vector<8x64xf32> -> vector<8x64xf32>
    %281 = arith.addf %276, %280 : vector<8x64xf32>
    %282 = vector.extract_strided_slice %252 {offsets = [48, 0], sizes = [8, 64], strides = [1, 1]} : vector<72x64xf32> to vector<8x64xf32>
    %283 = vector.extract_strided_slice %249 {offsets = [384, 0], sizes = [64, 64], strides = [1, 1]} : vector<576x64xbf16> to vector<64x64xbf16>
    %284 = arith.truncf %282 : vector<8x64xf32> to vector<8x64xbf16>
    %cst_109 = arith.constant dense<0.000000e+00> : vector<8x64xf32>
    %285 = tpu.matmul %284, %283, %cst_109 {dimension_numbers = #tpu.dot_dimension_numbers<[1], [0], [0], [1], [0, 0, 1, 1], [], []>} : vector<8x64xbf16>, vector<64x64xbf16>, vector<8x64xf32> -> vector<8x64xf32>
    %286 = arith.addf %281, %285 : vector<8x64xf32>
    %287 = vector.extract_strided_slice %252 {offsets = [56, 0], sizes = [8, 64], strides = [1, 1]} : vector<72x64xf32> to vector<8x64xf32>
    %288 = vector.extract_strided_slice %249 {offsets = [448, 0], sizes = [64, 64], strides = [1, 1]} : vector<576x64xbf16> to vector<64x64xbf16>
    %289 = arith.truncf %287 : vector<8x64xf32> to vector<8x64xbf16>
    %cst_110 = arith.constant dense<0.000000e+00> : vector<8x64xf32>
    %290 = tpu.matmul %289, %288, %cst_110 {dimension_numbers = #tpu.dot_dimension_numbers<[1], [0], [0], [1], [0, 0, 1, 1], [], []>} : vector<8x64xbf16>, vector<64x64xbf16>, vector<8x64xf32> -> vector<8x64xf32>
    %291 = arith.addf %286, %290 : vector<8x64xf32>
    %292 = vector.extract_strided_slice %252 {offsets = [64, 0], sizes = [8, 64], strides = [1, 1]} : vector<72x64xf32> to vector<8x64xf32>
    %293 = vector.extract_strided_slice %249 {offsets = [512, 0], sizes = [64, 64], strides = [1, 1]} : vector<576x64xbf16> to vector<64x64xbf16>
    %294 = arith.truncf %292 : vector<8x64xf32> to vector<8x64xbf16>
    %cst_111 = arith.constant dense<0.000000e+00> : vector<8x64xf32>
    %295 = tpu.matmul %294, %293, %cst_111 {dimension_numbers = #tpu.dot_dimension_numbers<[1], [0], [0], [1], [0, 0, 1, 1], [], []>} : vector<8x64xbf16>, vector<64x64xbf16>, vector<8x64xf32> -> vector<8x64xf32>
    %296 = arith.addf %291, %295 : vector<8x64xf32>
    %297 = vector.broadcast %250 : vector<1x64xf32> to vector<8x64xf32>
    %298 = arith.addf %296, %297 : vector<8x64xf32>
    %299 = arith.addf %298, %247 : vector<8x64xf32>
    %cst_112 = arith.constant 0.000000e+00 : f32
    %300 = vector.broadcast %cst_112 : f32 to vector<8x64xf32>
    %301 = arith.maximumf %299, %300 : vector<8x64xf32>
    %c0_113 = arith.constant 0 : index
    %c0_114 = arith.constant 0 : index
    %302 = vector.load %arg27[%c0_113, %c0_114] : memref<8x8xf32, #tpu.memory_space<vmem>>, vector<8x8xf32>
    %cst_115 = arith.constant dense<0.000000e+00> : vector<8x64xf32>
    %303 = tpu.matmul %302, %301, %cst_115 {dimension_numbers = #tpu.dot_dimension_numbers<[1], [0], [0], [1], [0, 0, 1, 1], [], []>} : vector<8x8xf32>, vector<8x64xf32>, vector<8x64xf32> -> vector<8x64xf32>
    %c0_116 = arith.constant 0 : index
    %c0_117 = arith.constant 0 : index
    %304 = vector.load %arg28[%c0_116, %c0_117] : memref<64x128xf32, #tpu.memory_space<vmem>>, vector<64x128xf32>
    %cst_118 = arith.constant dense<0.000000e+00> : vector<8x128xf32>
    %305 = tpu.matmul %303, %304, %cst_118 {dimension_numbers = #tpu.dot_dimension_numbers<[1], [0], [0], [1], [0, 0, 1, 1], [], []>} : vector<8x64xf32>, vector<64x128xf32>, vector<8x128xf32> -> vector<8x128xf32>
    %c0_119 = arith.constant 0 : index
    %c0_120 = arith.constant 0 : index
    %306 = vector.load %arg29[%c0_119, %c0_120] : memref<1x128xf32, #tpu.memory_space<vmem>>, vector<1x128xf32>
    %307 = vector.broadcast %306 : vector<1x128xf32> to vector<8x128xf32>
    %308 = arith.addf %305, %307 : vector<8x128xf32>
    %c0_121 = arith.constant 0 : index
    %c0_122 = arith.constant 0 : index
    %309 = vector.load %arg30[%c0_121, %c0_122] : memref<8x128xf32, #tpu.memory_space<vmem>>, vector<8x128xf32>
    tpu.vector_store %arg30[%c0_121, %c0_122], %308 {strides = array<i32>} : memref<8x128xf32, #tpu.memory_space<vmem>>, vector<8x128xf32>,
    return
  }
}

</mosaic_0001>

<bundles_post_ra>
// kernel: audio_classifier_forward.1
= control target key start
LH: loop header
LB: loop body
LE: loop exit
PB: predicated region body
PF: predicated region fallthrough
CT: control target
= control target key end

     0   :  { %s6198_s6 = smov 1   ;;  %s6199_s10 = smov 2   ;;  %s7268_s0 = inlined_call_operand.smem [shape: u32[31], index: -1, kind: input, shape index: {}] }
   0x1   :  { %s6241_s5 = sld [smem:[%s7268_s0]]   ;;  %s6200_s14 = smov 3  }
   0x2   :  { %s6246_s9 = sld [smem:[%s7268_s0 + %s6198_s6]]   ;;  %s6201_s18 = smov 4  }
   0x3   :  { %s6251_s13 = sld [smem:[%s7268_s0 + %s6199_s10]]   ;;  %s6202_s22 = smov 5  }
   0x4   :  { %s6256_s17 = sld [smem:[%s7268_s0 + %s6200_s14]]   ;;  %s6203_s26 = smov 6  }
   0x5   :  { %s6261_s21 = sld [smem:[%s7268_s0 + %s6201_s18]]   ;;  %s6204_s30 = smov 7  }
   0x6   :  { %s6266_s25 = sld [smem:[%s7268_s0 + %s6202_s22]]   ;;  %s6205_s4 = smov 8  }
   0x7   :  { %s6271_s29 = sld [smem:[%s7268_s0 + %s6203_s26]]   ;;  %s6206_s10 = smov 9  }
   0x8   :  { %s6276_s3 = sld [smem:[%s7268_s0 + %s6204_s30]]   ;;  %s6207_s15 = smov 10  }
   0x9   :  { %s6281_s8 = sld [smem:[%s7268_s0 + %s6205_s4]]   ;;  %s6208_s20 = smov 11  }
   0xa   :  { %s6286_s14 = sld [smem:[%s7268_s0 + %s6206_s10]]   ;;  %s6209_s26 = smov 12  }
   0xb   :  { %s6291_s19 = sld [smem:[%s7268_s0 + %s6207_s15]]   ;;  %s6210_s1 = smov 13  }
   0xc   :  { %s6296_s24 = sld [smem:[%s7268_s0 + %s6208_s20]]   ;;  %s6211_s7 = smov 14  }
   0xd   :  { %s6301_s30 = sld [smem:[%s7268_s0 + %s6209_s26]]   ;;  %s6212_s15 = smov 15  }
   0xe   :  { %s6306_s6 = sld [smem:[%s7268_s0 + %s6210_s1]]   ;;  %s6213_s22 = smov 16  }
   0xf   :  { %s6311_s12 = sld [smem:[%s7268_s0 + %s6211_s7]]   ;;  %s6214_s28 = smov 17  }
  0x10   :  { %s6316_s20 = sld [smem:[%s7268_s0 + %s6212_s15]]   ;;  %s6215_s7 = smov 18  }
  0x11   :  { %s6321_s27 = sld [smem:[%s7268_s0 + %s6213_s22]]   ;;  %s6216_s15 = smov 19  }
  0x12   :  { %s6326_s4 = sld [smem:[%s7268_s0 + %s6214_s28]]   ;;  %s6217_s22 = smov 20  }
  0x13   :  { %s6218_s28 = smov 21  }
  0x14   :  { %7275 = sst [smem:[#allocation5_spill]] %s6306_s6 }
  0x15   :  { %7276 = sst [smem:[#allocation6_spill]] %s6311_s12 }
  0x16   :  { %s6331_s12 = sld [smem:[%s7268_s0 + %s6215_s7]]   ;;  %s6219_s7 = smov 22  }
  0x17   :  { %7277 = sst [smem:[#allocation7_spill]] %s6321_s27 }
  0x18   :  { %7278 = sst [smem:[#allocation8_spill]] %s6326_s4 }
  0x19   :  { %s6336_s6 = sld [smem:[%s7268_s0 + %s6216_s15]]   ;;  %s6220_s15 = smov 23  }
  0x1a   :  { %s6341_s27 = sld [smem:[%s7268_s0 + %s6217_s22]]   ;;  %s6221_s22 = smov 24  }
  0x1b   :  { %s6346_s4 = sld [smem:[%s7268_s0 + %s6218_s28]]   ;;  %s6222_s28 = smov 25  }
  0x1c   :  { %7279 = sst [smem:[#allocation9_spill]] %s6331_s12 }
  0x1d   :  { %s6351_s12 = sld [smem:[%s7268_s0 + %s6219_s7]]   ;;  %s6223_s7 = smov 26  }
  0x1f   :  { %7280 = sst [smem:[#allocation10_spill]] %s6336_s6 }
  0x20   :  { %7281 = sst [smem:[#allocation11_spill]] %s6341_s27 }
  0x21   :  { %7282 = sst [smem:[#allocation12_spill]] %s6346_s4 }
  0x22   :  { %s6356_s6 = sld [smem:[%s7268_s0 + %s6220_s15]]   ;;  %s6224_s15 = smov 27  }
  0x23   :  { %7283 = sst [smem:[#allocation13_spill]] %s6351_s12 }
  0x24   :  { %s6361_s27 = sld [smem:[%s7268_s0 + %s6221_s22]]   ;;  %s6225_s22 = smov 28  }
  0x25   :  { %s6366_s4 = sld [smem:[%s7268_s0 + %s6222_s28]]   ;;  %s6226_s28 = smov 29  }
  0x26   :  { %s6371_s12 = sld [smem:[%s7268_s0 + %s6223_s7]]   ;;  %s6227_s7 = smov 30  }
  0x28   :  { %7284 = sst [smem:[#allocation14_spill]] %s6356_s6 }
  0x29   :  { %s6376_s6 = sld [smem:[%s7268_s0 + %s6224_s15]]  }
  0x2a   :  { %7285 = sst [smem:[#allocation15_spill]] %s6361_s27 }
  0x2b   :  { %7286 = sst [smem:[#allocation16_spill]] %s6366_s4 }
  0x2c   :  { %7287 = sst [smem:[#allocation17_spill]] %s6371_s12 }
  0x2d   :  { %s6381_s27 = sld [smem:[%s7268_s0 + %s6225_s22]]  }
  0x2e   :  { %s6386_s4 = sld [smem:[%s7268_s0 + %s6226_s28]]  }
  0x2f   :  { %s6391_s12 = sld [smem:[%s7268_s0 + %s6227_s7]]  }
  0x30   :  { %66 = vsyncpa [#allocation3], 0  ;;  %s83_s15 = sshll.u32 %s6271_s29, 4  ;;  %s6228_s16 = smov [#allocation2]   ;;  %s84_s15 = int_to_ptr.hbm [resolvable:$true] %s83_s15 }
  0x31   :  { %s85_s18 = sshll.u32 %s6228_s16, 4  ;;  %s6172_s22 = sshra.s32 %s84_s15, 4  ;;  %s86_s18 = int_to_ptr.vmem [resolvable:$true] %s85_s18  ;;  %s6173_s22 = int_to_ptr.hbm [resolvable:$true] %s6172_s22 }
  0x32   :  { %s6174_s23 = scalar_lea.hbm %s6173_s22, 576  ;;  %s6176_s26 = scalar_lea.hbm %s6271_s29, 576 }
  0x33   :  { %p6175_p0 = scmp.ne.s32.totalorder %s6173_s22, %s6174_s23  ;;  %p6177_p1 = scmp.lt.s32.totalorder %s6173_s22, %s6271_s29 }
  0x34   :  { %p6178_p2 = scmp.lt.s32.totalorder %s6176_s26, %s6174_s23 }
  0x36   :  { %p6179_p3 = por %p6178_p2, %p6177_p1 }
  0x38   :  { %p6180_p4 = pnand %p6179_p3, %p6175_p0 }
  0x3a   :  { %6183 = shalt.err (!%p6180_p4)
}
  0x3b   :  { %s6229_s0 = smov 64   ;;  %s6230_s28 = smov 4  }
  0x3c   :  { %91 = dma.hbm_to_vmem [thread:$0]  %s84_s15, 9216, %s86_s18, [#allocation3], %s6229_s0, %s6229_s0, %s6230_s28  }
  0x3d   :  { %6196 = dma.done.wait [#allocation3], 9216  }
  0x3e   :  { %6197 = vsyncadd [#allocation3], 4294958080  ;;  %vm235_vm0 = vcmask 1043456   ;;  %vm236_vm1 = vcmask 1044480   ;;  %v6231_v0 = vmov 65535   ;;  %v5885_v6 = vld [vmem:[%s6241_s5] sm:$0xff] }
  0x3f   :  { %v237_v1 = vsel %vm235_vm0, 4294967295, %v6231_v0  ;;  %v4871_v2 = vld [vmem:[%s6251_s13] sm:$0xf]  ;;  %v5893_v3 = vld [vmem:[%s6251_s13] sm:$0x10]  ;;  %v5891_v7 = vld [vmem:[%s6241_s5 + $0x30] sm:$0xff] }
  0x40   :  { %v238_v4 = vsel %vm236_vm1, %v237_v1, 0  ;;  %v4872_v5 = vor.u32 %v5893_v3, %v4871_v2  ;;  %vm210_vm2 = vcmask 72704   ;;  %v5886_v9 = vld [vmem:[%s6241_s5 + $0x8] sm:$0xff]  ;;  %v5892_v10 = vld [vmem:[%s6241_s5 + $0x38] sm:$0xff]  ;;  %v5887_v11 = vld [vmem:[%s6241_s5 + $0x10] sm:$0xff]  ;;  %vm1437_vm3 = vcmask 130048  }
  0x41   :  { %v5888_v12 = vld [vmem:[%s6241_s5 + $0x18] sm:$0xff]  ;;  %v5889_v13 = vld [vmem:[%s6241_s5 + $0x20] sm:$0xff]  ;;  %v5890_v14 = vld [vmem:[%s6241_s5 + $0x28] sm:$0xff]  ;;  %s7354_s5 = sld [smem:[#allocation5_spill]]  ;;  %vm3207_vm4 = vcmask 261120   ;;  %vm4307_vm5 = vcmask 64512  }
  0x42   :  { %v240_v8 = vand.u32 %v4872_v5, %v238_v4  ;;  %v6161_v22 = vld [vmem:[%s6256_s17] ss:$0 sm:$0xff]  ;;  %s7356_s13 = sld [smem:[#allocation6_spill]]  ;;  %vm4385_vm6 = vcmask 523264  }
  0x43   :  { %s7357_s17 = sld [smem:[#allocation8_spill]] }
  0x44   :  { %249 = vmatpush.bf16.msra.mxu0 %v240_v8  ;;  %6105 = vmatpush.bf16.msra.mxu2 %v240_v8  ;;  %v5894_v8 = vld [vmem:[#allocation2] sm:$0xff]  ;;  %s7360_s29 = sld [smem:[#allocation12_spill]] }
  0x47   :  { %4873 = vmatmul.msk.bf16.vlgmr.msra.gmra.mxu0 %vm210_vm2, %v5885_v6  ;;  %4879 = vmatmul.msk.bf16.vlgmr.msra.gmra.mxu2 %vm210_vm2, %v5891_v7 }
  0x57   :  { %4874 = vmatmul.msk.bf16.gmra.mxu0 %vm210_vm2, %v5886_v9  ;;  %4880 = vmatmul.msk.bf16.gmra.mxu2 %vm210_vm2, %v5892_v10  ;;  %v5900_v9 = vld [vmem:[#allocation2 + $0x30] sm:$0xff]  ;;  %v5895_v10 = vld [vmem:[#allocation2 + $0x8] sm:$0xff] }
  0x67   :  { %4875 = vmatmul.msk.bf16.gmra.mxu0 %vm210_vm2, %v5887_v11  ;;  %v5901_v11 = vld [vmem:[#allocation2 + $0x38] sm:$0xff] }
  0x77   :  { %4876 = vmatmul.msk.bf16.gmra.mxu0 %vm210_vm2, %v5888_v12  ;;  %v5896_v12 = vld [vmem:[#allocation2 + $0x10] sm:$0xff] }
  0x87   :  { %4877 = vmatmul.msk.bf16.gmra.mxu0 %vm210_vm2, %v5889_v13  ;;  %v5902_v13 = vld [vmem:[#allocation2 + $0x40] sm:$0xff] }
  0x97   :  { %4878 = vmatmul.msk.bf16.gmra.mxu0 %vm210_vm2, %v5890_v14  ;;  %v5897_v14 = vld [vmem:[#allocation2 + $0x18] sm:$0xff] }
  0xc4   :  { %v6407_v15 = vpop.f32.mrf.mxu0 }
  0xc5   :  { %v252_v2 = vadd.f32 %v6161_v22, %v6407_v15  ;;  %v5903_v15 = vld [vmem:[#allocation2 + $0x48] sm:$0xff] }
  0xc7   :  { %v291_v6 = vmax.f32 %v252_v2, 0.0 }
  0xca   :  { %v281_v16 = vpop.f32.mrf.mxu2 }
  0xcb   :  { %v282_v24 = vadd.f32 %v6161_v22, %v281_v16  ;;  %v5898_v16 = vld [vmem:[#allocation2 + $0x20] sm:$0xff] }
  0xcc   :  { %v253_v17 = vpop.f32.mrf.mxu0 }
  0xcd   :  { %v303_v30 = vmax.f32 %v282_v24, 0.0  ;;  %v254_v63 = vadd.f32 %v6161_v22, %v253_v17  ;;  %v5904_v17 = vld [vmem:[#allocation2 + $0x50] sm:$0xff]  ;;  %v5907_v24 = vld [vmem:[#allocation2 + $0x68] sm:$0xff] }
  0xcf   :  { %v292_v4 = vmax.f32 %v254_v63, 0.0 }
  0xd1   :  { %v606_v7 = vpack.c.bf16 %v292_v4, %v291_v6  ;;  %v5914_v4 = vld [vmem:[#allocation2 + $0xa0] sm:$0xff] }
  0xd2   :  { %v283_v18 = vpop.f32.mrf.mxu2 }
  0xd3   :  { %v284_v25 = vadd.f32 %v6161_v22, %v283_v18  ;;  %v5964_v18 = vld [vmem:[#allocation2 + $0x230] sm:$0xff] }
  0xd4   :  { %v256_v19 = vpop.f32.mrf.mxu0 }
  0xd5   :  { %v304_v31 = vmax.f32 %v284_v25, 0.0  ;;  %v257_v61 = vadd.f32 %v6161_v22, %v256_v19  ;;  %v5899_v19 = vld [vmem:[#allocation2 + $0x28] sm:$0xff]  ;;  %v5908_v25 = vld [vmem:[#allocation2 + $0x70] sm:$0xff] }
  0xd7   :  { %v612_v34 = vpack.c.bf16 %v304_v31, %v303_v30  ;;  %v293_v3 = vmax.f32 %v257_v61, 0.0  ;;  %v5913_v61 = vld [vmem:[#allocation2 + $0x98] sm:$0xff] }
  0xda   :  { %v286_v20 = vpop.f32.mrf.mxu2 }
  0xdb   :  { %v287_v23 = vadd.f32 %v6161_v22, %v286_v20  ;;  %v5905_v20 = vld [vmem:[#allocation2 + $0x58] sm:$0xff] }
  0xdc   :  { %v258_v21 = vpop.f32.mrf.mxu0 }
  0xdd   :  { %v305_v27 = vmax.f32 %v287_v23, 0.0  ;;  %v259_v58 = vadd.f32 %v6161_v22, %v258_v21  ;;  %v5965_v21 = vld [vmem:[#allocation2 + $0x238] sm:$0xff]  ;;  %v5966_v23 = vld [vmem:[%s6276_s3] sm:$0xff] }
  0xdf   :  { %v294_v0 = vmax.f32 %v259_v58, 0.0 }
  0xe1   :  { %v607_v5 = vpack.c.bf16 %v294_v0, %v293_v3 }
  0xe2   :  { %v288_v26 = vpop.f32.mrf.mxu2 }
  0xe3   :  { %v289_v28 = vadd.f32 %v6161_v22, %v288_v26 }
  0xe4   :  { %v261_v29 = vpop.f32.mrf.mxu0 }
  0xe5   :  { %v306_v32 = vmax.f32 %v289_v28, 0.0  ;;  %v262_v56 = vadd.f32 %v6161_v22, %v261_v29  ;;  %v5967_v28 = vld [vmem:[%s6276_s3 + $0x8] sm:$0xff] }
  0xe6   :  { %1469 = vmatpush.bf16.msrb.mxu2 %v5967_v28 }
  0xe7   :  { %v613_v33 = vpack.c.bf16 %v306_v32, %v305_v27  ;;  %v295_v62 = vmax.f32 %v262_v56, 0.0 }
  0xe9   :  { %1046 = vmatpush.bf16.msrb.mxu0 %v613_v33  ;;  %6106 = vmatpush.bf16.msra.mxu1 %v613_v33 }
  0xea   :  { %6107 = vmatpush.bf16.msra.mxu3 %v613_v33  ;;  %v5909_v33 = vld [vmem:[#allocation2 + $0x78] sm:$0xff] }
  0xec   :  { %v263_v35 = vpop.f32.mrf.mxu0 }
  0xed   :  { %1047 = vmatpush.bf16.msrb.mxu0 %v612_v34  ;;  %6108 = vmatpush.bf16.msra.mxu1 %v612_v34  ;;  %v264_v53 = vadd.f32 %v6161_v22, %v263_v35 }
  0xee   :  { %6109 = vmatpush.bf16.msra.mxu3 %v612_v34 }
  0xef   :  { %v296_v59 = vmax.f32 %v264_v53, 0.0 }
  0xf1   :  { %v608_v1 = vpack.c.bf16 %v296_v59, %v295_v62 }
  0xf4   :  { %v266_v36 = vpop.f32.mrf.mxu0 }
  0xf5   :  { %v267_v51 = vadd.f32 %v6161_v22, %v266_v36 }
  0xf7   :  { %v297_v57 = vmax.f32 %v267_v51, 0.0 }
  0xfc   :  { %v268_v37 = vpop.f32.mrf.mxu0 }
  0xfd   :  { %v269_v48 = vadd.f32 %v6161_v22, %v268_v37 }
  0xff   :  { %v298_v54 = vmax.f32 %v269_v48, 0.0 }
 0x101   :  { %v609_v60 = vpack.c.bf16 %v298_v54, %v297_v57  ;;  %v5912_v54 = vld [vmem:[#allocation2 + $0x90] sm:$0xff] }
 0x104   :  { %v271_v38 = vpop.f32.mrf.mxu0 }
 0x105   :  { %v272_v45 = vadd.f32 %v6161_v22, %v271_v38 }
 0x107   :  { %v299_v52 = vmax.f32 %v272_v45, 0.0 }
 0x10c   :  { %v273_v39 = vpop.f32.mrf.mxu0 }
 0x10d   :  { %v274_v43 = vadd.f32 %v6161_v22, %v273_v39 }
 0x10f   :  { %v300_v49 = vmax.f32 %v274_v43, 0.0 }
 0x111   :  { %v610_v55 = vpack.c.bf16 %v300_v49, %v299_v52 }
 0x114   :  { %v276_v40 = vpop.f32.mrf.mxu0 }
 0x115   :  { %v277_v41 = vadd.f32 %v6161_v22, %v276_v40  ;;  %v5910_v40 = vld [vmem:[#allocation2 + $0x80] sm:$0xff] }
 0x117   :  { %v301_v46 = vmax.f32 %v277_v41, 0.0 }
 0x11c   :  { %v278_v42 = vpop.f32.mrf.mxu0 }
 0x11d   :  { %v279_v44 = vadd.f32 %v6161_v22, %v278_v42  ;;  %v5906_v22 = vld [vmem:[#allocation2 + $0x60] sm:$0xff] }
 0x11f   :  { %v302_v47 = vmax.f32 %v279_v44, 0.0 }
 0x121   :  { %v611_v50 = vpack.c.bf16 %v302_v47, %v301_v46  ;;  %v5911_v47 = vld [vmem:[#allocation2 + $0x88] sm:$0xff] }
 0x123   :  { %1048 = vmatpush.bf16.msrb.mxu0 %v611_v50  ;;  %6110 = vmatpush.bf16.msra.mxu1 %v611_v50 }
 0x124   :  { %6111 = vmatpush.bf16.msra.mxu3 %v611_v50 }
 0x127   :  { %1049 = vmatpush.bf16.msrb.mxu0 %v610_v55  ;;  %6112 = vmatpush.bf16.msra.mxu1 %v610_v55 }
 0x128   :  { %6113 = vmatpush.bf16.msra.mxu3 %v610_v55 }
 0x12b   :  { %1050 = vmatpush.bf16.msrb.mxu0 %v609_v60  ;;  %6114 = vmatpush.bf16.msra.mxu1 %v609_v60 }
 0x12c   :  { %6115 = vmatpush.bf16.msra.mxu3 %v609_v60 }
 0x12f   :  { %1051 = vmatpush.bf16.msrb.mxu0 %v608_v1  ;;  %6116 = vmatpush.bf16.msra.mxu1 %v608_v1 }
 0x130   :  { %6117 = vmatpush.bf16.msra.mxu3 %v608_v1 }
 0x133   :  { %1052 = vmatpush.bf16.msrb.mxu0 %v607_v5  ;;  %6118 = vmatpush.bf16.msra.mxu1 %v607_v5 }
 0x134   :  { %6119 = vmatpush.bf16.msra.mxu3 %v607_v5 }
 0x137   :  { %1053 = vmatpush.bf16.msrb.mxu0 %v606_v7  ;;  %6120 = vmatpush.bf16.msra.mxu1 %v606_v7 }
 0x138   :  { %6121 = vmatpush.bf16.msra.mxu3 %v606_v7 }
 0x13a   :  { %1054 = vmatmul.bf16.vlgmr.msrb.gmra.mxu0 %v5894_v8  ;;  %1084 = vmatmul.bf16.vlgmr.msra.gmra.mxu1 %v5900_v9  ;;  %v5915_v9 = vld [vmem:[#allocation2 + $0xa8] sm:$0xff] }
 0x13b   :  { %1404 = vmatmul.bf16.vlgmr.msra.gmra.mxu3 %v5964_v18 }
 0x13c   :  { %1548 = vmatpush.bf16.msrb.mxu3 %v5966_v23 }
 0x14a   :  { %1059 = vmatmul.bf16.gmra.mxu0 %v5895_v10  ;;  %1089 = vmatmul.bf16.gmra.mxu1 %v5901_v11 }
 0x14b   :  { %1409 = vmatmul.bf16.gmra.mxu3 %v5965_v21  ;;  %v5917_v21 = vld [vmem:[#allocation2 + $0xb8] sm:$0xff] }
 0x15a   :  { %1064 = vmatmul.bf16.gmra.mxu0 %v5896_v12  ;;  %1094 = vmatmul.bf16.gmra.mxu1 %v5902_v13 }
 0x16a   :  { %1069 = vmatmul.bf16.gmra.mxu0 %v5897_v14  ;;  %1099 = vmatmul.bf16.gmra.mxu1 %v5903_v15  ;;  %v5916_v15 = vld [vmem:[#allocation2 + $0xb0] sm:$0xff] }
 0x17a   :  { %1074 = vmatmul.bf16.gmra.mxu0 %v5898_v16  ;;  %1104 = vmatmul.bf16.gmra.mxu1 %v5904_v17  ;;  %v5968_v17 = vld [vmem:[%s6276_s3 + $0x10] sm:$0xff] }
 0x17b   :  { %1635 = vmatpush.bf16.msra.mxu0 %v5968_v17 }
 0x18a   :  { %1079 = vmatmul.bf16.gmra.mxu0 %v5899_v19  ;;  %1109 = vmatmul.bf16.gmra.mxu1 %v5905_v20 }
 0x19a   :  { %1114 = vmatmul.bf16.gmra.mxu1 %v5906_v22 }
 0x1aa   :  { %1119 = vmatmul.bf16.gmra.mxu1 %v5907_v24 }
 0x1b7   :  { %v1055_v26 = vpop.f32.mrf.mxu0  ;;  %v6412_v27 = vpop.f32.mrf.mxu1 }
 0x1ba   :  { %1124 = vmatmul.bf16.gmra.mxu1 %v5908_v25 }
 0x1be   :  { %v6432_v8 = vpop.f32.mrf.mxu3 }
 0x1bf   :  { %v1057_v29 = vpop.f32.mrf.mxu0  ;;  %v6415_v30 = vpop.f32.mrf.mxu1 }
 0x1c0   :  { %v1415_v31 = vpack.c.bf16 %v1057_v29, %v1055_v26  ;;  %v1421_v32 = vpack.c.bf16 %v6415_v30, %v6412_v27  ;;  %v5918_v27 = vld [vmem:[#allocation2 + $0xc0] sm:$0xff] }
 0x1c2   :  { %5185 = vmatmul.msk.bf16.vlgmr.msrb.gmra.mxu3 %vm1437_vm3, %v1415_v31 }
 0x1c6   :  { %v6436_v11 = vpop.f32.mrf.mxu3 }
 0x1c7   :  { %v1060_v34 = vpop.f32.mrf.mxu0  ;;  %v6420_v35 = vpop.f32.mrf.mxu1 }
 0x1ca   :  { %1129 = vmatmul.bf16.gmra.mxu1 %v5909_v33 }
 0x1ce   :  { %v6440_v14 = vpop.f32.mrf.mxu3 }
 0x1cf   :  { %v1062_v36 = vpop.f32.mrf.mxu0  ;;  %v1092_v37 = vpop.f32.mrf.mxu1 }
 0x1d0   :  { %v1416_v38 = vpack.c.bf16 %v1062_v36, %v1060_v34  ;;  %v1422_v39 = vpack.c.bf16 %v1092_v37, %v6420_v35  ;;  %v5919_v34 = vld [vmem:[#allocation2 + $0xc8] sm:$0xff] }
 0x1d2   :  { %5186 = vmatmul.msk.bf16.gmra.mxu3 %vm1437_vm3, %v1416_v38 }
 0x1d6   :  { %v6443_v18 = vpop.f32.mrf.mxu3 }
 0x1d7   :  { %v1065_v41 = vpop.f32.mrf.mxu0  ;;  %v1095_v42 = vpop.f32.mrf.mxu1 }
 0x1da   :  { %1134 = vmatmul.bf16.gmra.mxu1 %v5910_v40 }
 0x1df   :  { %v1067_v43 = vpop.f32.mrf.mxu0  ;;  %v1097_v44 = vpop.f32.mrf.mxu1 }
 0x1e0   :  { %v1417_v45 = vpack.c.bf16 %v1067_v43, %v1065_v41  ;;  %v1423_v46 = vpack.c.bf16 %v1097_v44, %v1095_v42  ;;  %v5920_v43 = vld [vmem:[#allocation2 + $0xd0] sm:$0xff] }
 0x1e2   :  { %5173 = vmatmul.msk.bf16.vlgmr.msrb.gmra.mxu2 %vm1437_vm3, %v1423_v46  ;;  %5187 = vmatmul.msk.bf16.gmra.mxu3 %vm1437_vm3, %v1417_v45 }
 0x1e7   :  { %v1070_v48 = vpop.f32.mrf.mxu0  ;;  %v1100_v49 = vpop.f32.mrf.mxu1 }
 0x1ea   :  { %1139 = vmatmul.bf16.gmra.mxu1 %v5911_v47 }
 0x1ef   :  { %v1072_v50 = vpop.f32.mrf.mxu0  ;;  %v1102_v51 = vpop.f32.mrf.mxu1 }
 0x1f0   :  { %v1418_v52 = vpack.c.bf16 %v1072_v50, %v1070_v48  ;;  %v1424_v53 = vpack.c.bf16 %v1102_v51, %v1100_v49 }
 0x1f2   :  { %5174 = vmatmul.msk.bf16.gmra.mxu2 %vm1437_vm3, %v1424_v53  ;;  %5188 = vmatmul.msk.bf16.gmra.mxu3 %vm1437_vm3, %v1418_v52  ;;  %v5921_v52 = vld [vmem:[#allocation2 + $0xd8] sm:$0xff] }
 0x1f7   :  { %v1075_v55 = vpop.f32.mrf.mxu0  ;;  %v1105_v56 = vpop.f32.mrf.mxu1 }
 0x1fa   :  { %1144 = vmatmul.bf16.gmra.mxu1 %v5912_v54 }
 0x1ff   :  { %v1077_v57 = vpop.f32.mrf.mxu0  ;;  %v1107_v58 = vpop.f32.mrf.mxu1 }
 0x200   :  { %v1419_v59 = vpack.c.bf16 %v1077_v57, %v1075_v55  ;;  %v1425_v60 = vpack.c.bf16 %v1107_v58, %v1105_v56 }
 0x202   :  { %5175 = vmatmul.msk.bf16.gmra.mxu2 %vm1437_vm3, %v1425_v60  ;;  %5189 = vmatmul.msk.bf16.gmra.mxu3 %vm1437_vm3, %v1419_v59  ;;  %v5922_v60 = vld [vmem:[#allocation2 + $0xe0] sm:$0xff] }
 0x207   :  { %v1080_v62 = vpop.f32.mrf.mxu0  ;;  %v1110_v63 = vpop.f32.mrf.mxu1 }
 0x20a   :  { %1149 = vmatmul.bf16.gmra.mxu1 %v5913_v61 }
 0x20f   :  { %v1082_v0 = vpop.f32.mrf.mxu0  ;;  %v1112_v1 = vpop.f32.mrf.mxu1 }
 0x210   :  { %v1420_v2 = vpack.c.bf16 %v1082_v0, %v1080_v62  ;;  %v1426_v3 = vpack.c.bf16 %v1112_v1, %v1110_v63 }
 0x212   :  { %5176 = vmatmul.msk.bf16.gmra.mxu2 %vm1437_vm3, %v1426_v3  ;;  %5190 = vmatmul.msk.bf16.gmra.mxu3 %vm1437_vm3, %v1420_v2 }
 0x217   :  { %v1115_v5 = vpop.f32.mrf.mxu1 }
 0x21a   :  { %1154 = vmatmul.bf16.gmra.mxu1 %v5914_v4 }
 0x21f   :  { %v1117_v6 = vpop.f32.mrf.mxu1 }
 0x220   :  { %v1427_v7 = vpack.c.bf16 %v1117_v6, %v1115_v5  ;;  %v5923_v5 = vld [vmem:[#allocation2 + $0xe8] sm:$0xff] }
 0x222   :  { %5177 = vmatmul.msk.bf16.gmra.mxu2 %vm1437_vm3, %v1427_v7  ;;  %5191 = vmatmul.msk.bf16.gmra.mxu3 %vm1437_vm3, %v1421_v32 }
 0x227   :  { %v1120_v10 = vpop.f32.mrf.mxu1 }
 0x22a   :  { %1159 = vmatmul.bf16.gmra.mxu1 %v5915_v9 }
 0x22f   :  { %v1122_v12 = vpop.f32.mrf.mxu1 }
 0x230   :  { %v1428_v13 = vpack.c.bf16 %v1122_v12, %v1120_v10 }
 0x232   :  { %5178 = vmatmul.msk.bf16.gmra.mxu2 %vm1437_vm3, %v1428_v13  ;;  %5192 = vmatmul.msk.bf16.gmra.mxu3 %vm1437_vm3, %v1422_v39 }
 0x237   :  { %v1125_v16 = vpop.f32.mrf.mxu1 }
 0x23a   :  { %1164 = vmatmul.bf16.gmra.mxu1 %v5916_v15 }
 0x23f   :  { %v1127_v19 = vpop.f32.mrf.mxu1 }
 0x240   :  { %v1429_v20 = vpack.c.bf16 %v1127_v19, %v1125_v16  ;;  %v5924_v16 = vld [vmem:[#allocation2 + $0xf0] sm:$0xff] }
 0x242   :  { %5179 = vmatmul.msk.bf16.gmra.mxu2 %vm1437_vm3, %v1429_v20 }
 0x245   :  { %v1550_v23 = vpop.f32.mrf.mxu3 }
 0x247   :  { %v1130_v22 = vpop.f32.mrf.mxu1 }
 0x24a   :  { %1169 = vmatmul.bf16.gmra.mxu1 %v5917_v21  ;;  %v5969_v21 = vld [vmem:[%s6276_s3 + $0x18] sm:$0xff] }
 0x24b   :  { %1738 = vmatpush.bf16.msra.mxu2 %v5969_v21 }
 0x24d   :  { %v6447_v26 = vpop.f32.mrf.mxu3 }
 0x24f   :  { %v1132_v24 = vpop.f32.mrf.mxu1 }
 0x250   :  { %v1430_v25 = vpack.c.bf16 %v1132_v24, %v1130_v22 }
 0x252   :  { %5180 = vmatmul.msk.bf16.gmra.mxu2 %vm1437_vm3, %v1430_v25 }
 0x255   :  { %v1555_v29 = vpop.f32.mrf.mxu3 }
 0x257   :  { %v1135_v28 = vpop.f32.mrf.mxu1 }
 0x25a   :  { %1174 = vmatmul.bf16.gmra.mxu1 %v5918_v27 }
 0x25d   :  { %v6452_v35 = vpop.f32.mrf.mxu3 }
 0x25f   :  { %v1137_v30 = vpop.f32.mrf.mxu1 }
 0x260   :  { %v1590_v31 = vpack.c.bf16 %v1137_v30, %v1135_v28  ;;  %v5925_v28 = vld [vmem:[#allocation2 + $0xf8] sm:$0xff] }
 0x262   :  { %5197 = vmatmul.msk.bf16.vlgmr.msra.gmra.mxu0 %vm1437_vm3, %v1590_v31 }
 0x265   :  { %v1471_v32 = vpop.f32.mrf.mxu2  ;;  %v1560_v40 = vpop.f32.mrf.mxu3 }
 0x266   :  { %v6450_v33 = vadd.f32 %v1550_v23, %v1471_v32 }
 0x267   :  { %v1140_v36 = vpop.f32.mrf.mxu1 }
 0x26a   :  { %1179 = vmatmul.bf16.gmra.mxu1 %v5919_v34 }
 0x26d   :  { %v6454_v37 = vpop.f32.mrf.mxu2  ;;  %v6459_v45 = vpop.f32.mrf.mxu3 }
 0x26f   :  { %v1142_v38 = vpop.f32.mrf.mxu1 }
 0x270   :  { %v1591_v39 = vpack.c.bf16 %v1142_v38, %v1140_v36 }
 0x272   :  { %5198 = vmatmul.msk.bf16.gmra.mxu0 %vm1437_vm3, %v1591_v39 }
 0x275   :  { %v1476_v41 = vpop.f32.mrf.mxu2  ;;  %v1565_v49 = vpop.f32.mrf.mxu3 }
 0x276   :  { %v6457_v42 = vadd.f32 %v1555_v29, %v1476_v41 }
 0x277   :  { %v1145_v44 = vpop.f32.mrf.mxu1 }
 0x27a   :  { %1184 = vmatmul.bf16.gmra.mxu1 %v5920_v43 }
 0x27d   :  { %v6461_v46 = vpop.f32.mrf.mxu2  ;;  %v6468_v55 = vpop.f32.mrf.mxu3 }
 0x27f   :  { %v1147_v47 = vpop.f32.mrf.mxu1 }
 0x280   :  { %v1592_v48 = vpack.c.bf16 %v1147_v47, %v1145_v44 }
 0x282   :  { %5199 = vmatmul.msk.bf16.gmra.mxu0 %vm1437_vm3, %v1592_v48 }
 0x285   :  { %v1481_v50 = vpop.f32.mrf.mxu2  ;;  %v1570_v62 = vpop.f32.mrf.mxu3 }
 0x286   :  { %v6464_v51 = vadd.f32 %v1560_v40, %v1481_v50  ;;  %v5926_v40 = vld [vmem:[#allocation2 + $0x100] sm:$0xff] }
 0x287   :  { %v1150_v53 = vpop.f32.mrf.mxu1 }
 0x28a   :  { %1189 = vmatmul.bf16.gmra.mxu1 %v5921_v52 }
 0x28d   :  { %v6466_v54 = vpop.f32.mrf.mxu2  ;;  %v6476_v2 = vpop.f32.mrf.mxu3 }
 0x28f   :  { %v1152_v56 = vpop.f32.mrf.mxu1 }
 0x290   :  { %v1593_v57 = vpack.c.bf16 %v1152_v56, %v1150_v53 }
 0x292   :  { %5200 = vmatmul.msk.bf16.gmra.mxu0 %vm1437_vm3, %v1593_v57 }
 0x295   :  { %v1486_v58 = vpop.f32.mrf.mxu2  ;;  %v1575_v7 = vpop.f32.mrf.mxu3 }
 0x296   :  { %v6471_v59 = vadd.f32 %v1565_v49, %v1486_v58  ;;  %v5927_v49 = vld [vmem:[#allocation2 + $0x108] sm:$0xff] }
 0x297   :  { %v1155_v61 = vpop.f32.mrf.mxu1 }
 0x29a   :  { %1194 = vmatmul.bf16.gmra.mxu1 %v5922_v60  ;;  %v5928_v60 = vld [vmem:[#allocation2 + $0x110] sm:$0xff] }
 0x29d   :  { %v6473_v63 = vpop.f32.mrf.mxu2  ;;  %v6485_v17 = vpop.f32.mrf.mxu3 }
 0x29f   :  { %v1157_v0 = vpop.f32.mrf.mxu1 }
 0x2a0   :  { %v1594_v1 = vpack.c.bf16 %v1157_v0, %v1155_v61 }
 0x2a2   :  { %5201 = vmatmul.msk.bf16.gmra.mxu0 %vm1437_vm3, %v1594_v1 }
 0x2a5   :  { %v1491_v3 = vpop.f32.mrf.mxu2  ;;  %v1580_v24 = vpop.f32.mrf.mxu3 }
 0x2a6   :  { %v6478_v4 = vadd.f32 %v1570_v62, %v1491_v3 }
 0x2a7   :  { %v1160_v6 = vpop.f32.mrf.mxu1 }
 0x2aa   :  { %1199 = vmatmul.bf16.gmra.mxu1 %v5923_v5  ;;  %v5929_v5 = vld [vmem:[#allocation2 + $0x118] sm:$0xff] }
 0x2ad   :  { %v6480_v9 = vpop.f32.mrf.mxu2  ;;  %v6493_v30 = vpop.f32.mrf.mxu3 }
 0x2af   :  { %v1162_v10 = vpop.f32.mrf.mxu1 }
 0x2b0   :  { %v1595_v12 = vpack.c.bf16 %v1162_v10, %v1160_v6 }
 0x2b2   :  { %5202 = vmatmul.msk.bf16.gmra.mxu0 %vm1437_vm3, %v1595_v12 }
 0x2b5   :  { %v1496_v13 = vpop.f32.mrf.mxu2  ;;  %v1585_v36 = vpop.f32.mrf.mxu3 }
 0x2b6   :  { %v6483_v15 = vadd.f32 %v1575_v7, %v1496_v13 }
 0x2b7   :  { %v1165_v19 = vpop.f32.mrf.mxu1 }
 0x2ba   :  { %1204 = vmatmul.bf16.gmra.mxu1 %v5924_v16  ;;  %v5930_v16 = vld [vmem:[#allocation2 + $0x120] sm:$0xff] }
 0x2bd   :  { %v6487_v20 = vpop.f32.mrf.mxu2 }
 0x2bf   :  { %v1167_v22 = vpop.f32.mrf.mxu1 }
 0x2c0   :  { %v1596_v23 = vpack.c.bf16 %v1167_v22, %v1165_v19 }
 0x2c2   :  { %5203 = vmatmul.msk.bf16.gmra.mxu0 %vm1437_vm3, %v1596_v23 }
 0x2c5   :  { %v1501_v25 = vpop.f32.mrf.mxu2 }
 0x2c6   :  { %v6491_v27 = vadd.f32 %v1580_v24, %v1501_v25  ;;  %v5931_v25 = vld [vmem:[#allocation2 + $0x128] sm:$0xff] }
 0x2c7   :  { %v1170_v29 = vpop.f32.mrf.mxu1 }
 0x2ca   :  { %1209 = vmatmul.bf16.gmra.mxu1 %v5925_v28 }
 0x2cd   :  { %v6495_v31 = vpop.f32.mrf.mxu2 }
 0x2cf   :  { %v1172_v32 = vpop.f32.mrf.mxu1 }
 0x2d0   :  { %v1597_v34 = vpack.c.bf16 %v1172_v32, %v1170_v29 }
 0x2d2   :  { %5204 = vmatmul.msk.bf16.gmra.mxu0 %vm1437_vm3, %v1597_v34 }
 0x2d5   :  { %v1506_v38 = vpop.f32.mrf.mxu2 }
 0x2d6   :  { %v6498_v39 = vadd.f32 %v1585_v36, %v1506_v38  ;;  %v5932_v38 = vld [vmem:[#allocation2 + $0x130] sm:$0xff] }
 0x2d7   :  { %v1175_v41 = vpop.f32.mrf.mxu1 }
 0x2da   :  { %1214 = vmatmul.bf16.gmra.mxu1 %v5926_v40 }
 0x2df   :  { %v1177_v43 = vpop.f32.mrf.mxu1  ;;  %v1637_v44 = vpop.f32.mrf.mxu0 }
 0x2e0   :  { %v1693_v47 = vpack.c.bf16 %v1177_v43, %v1175_v41  ;;  %v6501_v48 = vadd.f32 %v1637_v44, %v6450_v33 }
 0x2e2   :  { %5209 = vmatmul.msk.bf16.vlgmr.msra.gmra.mxu2 %vm1437_vm3, %v1693_v47 }
 0x2e7   :  { %v1180_v50 = vpop.f32.mrf.mxu1  ;;  %v6504_v52 = vpop.f32.mrf.mxu0 }
 0x2ea   :  { %1219 = vmatmul.bf16.gmra.mxu1 %v5927_v49 }
 0x2ef   :  { %v1182_v53 = vpop.f32.mrf.mxu1  ;;  %v1642_v56 = vpop.f32.mrf.mxu0 }
 0x2f0   :  { %v1694_v57 = vpack.c.bf16 %v1182_v53, %v1180_v50  ;;  %v6507_v58 = vadd.f32 %v1642_v56, %v6457_v42  ;;  %v5933_v50 = vld [vmem:[#allocation2 + $0x138] sm:$0xff] }
 0x2f2   :  { %5210 = vmatmul.msk.bf16.gmra.mxu2 %vm1437_vm3, %v1694_v57 }
 0x2f7   :  { %v1185_v61 = vpop.f32.mrf.mxu1  ;;  %v6510_v62 = vpop.f32.mrf.mxu0 }
 0x2fa   :  { %1224 = vmatmul.bf16.gmra.mxu1 %v5928_v60 }
 0x2ff   :  { %v1187_v33 = vpop.f32.mrf.mxu1  ;;  %v1647_v0 = vpop.f32.mrf.mxu0 }
 0x300   :  { %v1695_v1 = vpack.c.bf16 %v1187_v33, %v1185_v61  ;;  %v6513_v3 = vadd.f32 %v1647_v0, %v6464_v51  ;;  %v5934_v33 = vld [vmem:[#allocation2 + $0x140] sm:$0xff] }
 0x302   :  { %5211 = vmatmul.msk.bf16.gmra.mxu2 %vm1437_vm3, %v1695_v1 }
 0x307   :  { %v1190_v6 = vpop.f32.mrf.mxu1  ;;  %v6516_v7 = vpop.f32.mrf.mxu0 }
 0x30a   :  { %1229 = vmatmul.bf16.gmra.mxu1 %v5929_v5 }
 0x30f   :  { %v1192_v42 = vpop.f32.mrf.mxu1  ;;  %v1652_v10 = vpop.f32.mrf.mxu0 }
 0x310   :  { %v1696_v12 = vpack.c.bf16 %v1192_v42, %v1190_v6  ;;  %v6519_v13 = vadd.f32 %v1652_v10, %v6471_v59  ;;  %v5935_v10 = vld [vmem:[#allocation2 + $0x148] sm:$0xff] }
 0x312   :  { %5212 = vmatmul.msk.bf16.gmra.mxu2 %vm1437_vm3, %v1696_v12 }
 0x317   :  { %v1195_v19 = vpop.f32.mrf.mxu1  ;;  %v6522_v21 = vpop.f32.mrf.mxu0 }
 0x31a   :  { %1234 = vmatmul.bf16.gmra.mxu1 %v5930_v16 }
 0x31f   :  { %v1197_v51 = vpop.f32.mrf.mxu1  ;;  %v1657_v22 = vpop.f32.mrf.mxu0 }
 0x320   :  { %v1697_v23 = vpack.c.bf16 %v1197_v51, %v1195_v19  ;;  %v6525_v24 = vadd.f32 %v1657_v22, %v6478_v4  ;;  %v5970_v4 = vld [vmem:[%s6276_s3 + $0x20] sm:$0xff] }
 0x321   :  { %1841 = vmatpush.bf16.msra.mxu3 %v5970_v4 }
 0x322   :  { %5213 = vmatmul.msk.bf16.gmra.mxu2 %vm1437_vm3, %v1697_v23  ;;  %v5936_v23 = vld [vmem:[#allocation2 + $0x150] sm:$0xff] }
 0x327   :  { %v1200_v28 = vpop.f32.mrf.mxu1  ;;  %v6528_v59 = vpop.f32.mrf.mxu0 }
 0x32a   :  { %1239 = vmatmul.bf16.gmra.mxu1 %v5931_v25 }
 0x32f   :  { %v1202_v29 = vpop.f32.mrf.mxu1  ;;  %v1662_v32 = vpop.f32.mrf.mxu0 }
 0x330   :  { %v1698_v34 = vpack.c.bf16 %v1202_v29, %v1200_v28  ;;  %v6531_v36 = vadd.f32 %v1662_v32, %v6483_v15 }
 0x332   :  { %5214 = vmatmul.msk.bf16.gmra.mxu2 %vm1437_vm3, %v1698_v34 }
 0x337   :  { %v1205_v40 = vpop.f32.mrf.mxu1  ;;  %v6534_v41 = vpop.f32.mrf.mxu0 }
 0x33a   :  { %1244 = vmatmul.bf16.gmra.mxu1 %v5932_v38  ;;  %v5937_v38 = vld [vmem:[#allocation2 + $0x158] sm:$0xff] }
 0x33f   :  { %v1207_v43 = vpop.f32.mrf.mxu1  ;;  %v1667_v44 = vpop.f32.mrf.mxu0 }
 0x340   :  { %v1699_v47 = vpack.c.bf16 %v1207_v43, %v1205_v40  ;;  %v6538_v49 = vadd.f32 %v1667_v44, %v6491_v27  ;;  %v6547_v27 = vpop.f32.mrf.mxu2 }
 0x342   :  { %5215 = vmatmul.msk.bf16.gmra.mxu2 %vm1437_vm3, %v1699_v47 }
 0x347   :  { %v1210_v15 = vpop.f32.mrf.mxu1  ;;  %v6541_v53 = vpop.f32.mrf.mxu0 }
 0x34a   :  { %1249 = vmatmul.bf16.gmra.mxu1 %v5933_v50  ;;  %v5938_v50 = vld [vmem:[#allocation2 + $0x160] sm:$0xff] }
 0x34f   :  { %v1212_v56 = vpop.f32.mrf.mxu1  ;;  %v1672_v57 = vpop.f32.mrf.mxu0 }
 0x350   :  { %v1700_v60 = vpack.c.bf16 %v1212_v56, %v1210_v15  ;;  %v6544_v61 = vadd.f32 %v1672_v57, %v6498_v39 }
 0x352   :  { %5216 = vmatmul.msk.bf16.gmra.mxu2 %vm1437_vm3, %v1700_v60 }
 0x357   :  { %v1215_v0 = vpop.f32.mrf.mxu1 }
 0x35a   :  { %1254 = vmatmul.bf16.gmra.mxu1 %v5934_v33 }
 0x35f   :  { %v1217_v1 = vpop.f32.mrf.mxu1 }
 0x360   :  { %v1796_v5 = vpack.c.bf16 %v1217_v1, %v1215_v0  ;;  %v5939_v0 = vld [vmem:[#allocation2 + $0x168] sm:$0xff] }
 0x362   :  { %5221 = vmatmul.msk.bf16.vlgmr.msra.gmra.mxu3 %vm1437_vm3, %v1796_v5 }
 0x365   :  { %v1740_v6 = vpop.f32.mrf.mxu2 }
 0x366   :  { %v6551_v42 = vadd.f32 %v1740_v6, %v6501_v48 }
 0x367   :  { %v1220_v12 = vpop.f32.mrf.mxu1 }
 0x36a   :  { %1259 = vmatmul.bf16.gmra.mxu1 %v5935_v10 }
 0x36d   :  { %v6553_v39 = vpop.f32.mrf.mxu2 }
 0x36f   :  { %v1222_v16 = vpop.f32.mrf.mxu1 }
 0x370   :  { %v1797_v19 = vpack.c.bf16 %v1222_v16, %v1220_v12  ;;  %v5940_v16 = vld [vmem:[#allocation2 + $0x170] sm:$0xff] }
 0x372   :  { %5222 = vmatmul.msk.bf16.gmra.mxu3 %vm1437_vm3, %v1797_v19 }
 0x375   :  { %v1745_v51 = vpop.f32.mrf.mxu2 }
 0x376   :  { %v6557_v22 = vadd.f32 %v1745_v51, %v6507_v58 }
 0x377   :  { %v1225_v25 = vpop.f32.mrf.mxu1 }
 0x37a   :  { %1264 = vmatmul.bf16.gmra.mxu1 %v5936_v23 }
 0x37d   :  { %v6559_v28 = vpop.f32.mrf.mxu2 }
 0x37f   :  { %v1227_v48 = vpop.f32.mrf.mxu1 }
 0x380   :  { %v1798_v29 = vpack.c.bf16 %v1227_v48, %v1225_v25 }
 0x382   :  { %5223 = vmatmul.msk.bf16.gmra.mxu3 %vm1437_vm3, %v1798_v29 }
 0x385   :  { %v1750_v32 = vpop.f32.mrf.mxu2 }
 0x386   :  { %v6563_v34 = vadd.f32 %v1750_v32, %v6513_v3  ;;  %v5941_v32 = vld [vmem:[#allocation2 + $0x178] sm:$0xff] }
 0x387   :  { %v1230_v40 = vpop.f32.mrf.mxu1 }
 0x38a   :  { %1269 = vmatmul.bf16.gmra.mxu1 %v5937_v38 }
 0x38d   :  { %v6565_v4 = vpop.f32.mrf.mxu2 }
 0x38f   :  { %v1232_v58 = vpop.f32.mrf.mxu1 }
 0x390   :  { %v1799_v43 = vpack.c.bf16 %v1232_v58, %v1230_v40 }
 0x392   :  { %5224 = vmatmul.msk.bf16.gmra.mxu3 %vm1437_vm3, %v1799_v43 }
 0x395   :  { %v1755_v44 = vpop.f32.mrf.mxu2 }
 0x396   :  { %v6569_v47 = vadd.f32 %v1755_v44, %v6519_v13 }
 0x397   :  { %v1235_v15 = vpop.f32.mrf.mxu1 }
 0x39a   :  { %1274 = vmatmul.bf16.gmra.mxu1 %v5938_v50  ;;  %v5942_v50 = vld [vmem:[#allocation2 + $0x180] sm:$0xff] }
 0x39d   :  { %v6571_v56 = vpop.f32.mrf.mxu2 }
 0x39f   :  { %v1237_v3 = vpop.f32.mrf.mxu1 }
 0x3a0   :  { %v1800_v57 = vpack.c.bf16 %v1237_v3, %v1235_v15  ;;  %v6596_v3 = vpop.f32.mrf.mxu3 }
 0x3a2   :  { %5225 = vmatmul.msk.bf16.gmra.mxu3 %vm1437_vm3, %v1800_v57 }
 0x3a5   :  { %v1760_v60 = vpop.f32.mrf.mxu2 }
 0x3a6   :  { %v6575_v33 = vadd.f32 %v1760_v60, %v6525_v24  ;;  %v5971_v24 = vld [vmem:[%s6276_s3 + $0x28] sm:$0xff] }
 0x3a7   :  { %v1240_v1 = vpop.f32.mrf.mxu1  ;;  %1944 = vmatpush.bf16.msrb.mxu0 %v5971_v24  ;;  %v5944_v24 = vld [vmem:[#allocation2 + $0x190] sm:$0xff] }
 0x3aa   :  { %1279 = vmatmul.bf16.gmra.mxu1 %v5939_v0 }
 0x3ad   :  { %v6577_v5 = vpop.f32.mrf.mxu2 }
 0x3af   :  { %v1242_v13 = vpop.f32.mrf.mxu1 }
 0x3b0   :  { %v1801_v6 = vpack.c.bf16 %v1242_v13, %v1240_v1  ;;  %v5943_v1 = vld [vmem:[#allocation2 + $0x188] sm:$0xff] }
 0x3b2   :  { %5226 = vmatmul.msk.bf16.gmra.mxu3 %vm1437_vm3, %v1801_v6 }
 0x3b5   :  { %v1765_v10 = vpop.f32.mrf.mxu2 }
 0x3b6   :  { %v6581_v12 = vadd.f32 %v1765_v10, %v6531_v36 }
 0x3b7   :  { %v1245_v19 = vpop.f32.mrf.mxu1 }
 0x3ba   :  { %1284 = vmatmul.bf16.gmra.mxu1 %v5940_v16 }
 0x3bd   :  { %v6583_v51 = vpop.f32.mrf.mxu2 }
 0x3bf   :  { %v1247_v23 = vpop.f32.mrf.mxu1 }
 0x3c0   :  { %v1802_v25 = vpack.c.bf16 %v1247_v23, %v1245_v19 }
 0x3c2   :  { %5227 = vmatmul.msk.bf16.gmra.mxu3 %vm1437_vm3, %v1802_v25 }
 0x3c5   :  { %v1770_v48 = vpop.f32.mrf.mxu2 }
 0x3c6   :  { %v6588_v29 = vadd.f32 %v1770_v48, %v6538_v49 }
 0x3c7   :  { %v1250_v38 = vpop.f32.mrf.mxu1 }
 0x3ca   :  { %1289 = vmatmul.bf16.gmra.mxu1 %v5941_v32 }
 0x3cd   :  { %v6590_v36 = vpop.f32.mrf.mxu2 }
 0x3cf   :  { %v1252_v40 = vpop.f32.mrf.mxu1 }
 0x3d0   :  { %v1803_v58 = vpack.c.bf16 %v1252_v40, %v1250_v38  ;;  %v5945_v40 = vld [vmem:[#allocation2 + $0x198] sm:$0xff] }
 0x3d2   :  { %5228 = vmatmul.msk.bf16.gmra.mxu3 %vm1437_vm3, %v1803_v58 }
 0x3d5   :  { %v1775_v43 = vpop.f32.mrf.mxu2 }
 0x3d6   :  { %v6594_v44 = vadd.f32 %v1775_v43, %v6544_v61 }
 0x3d7   :  { %v1255_v15 = vpop.f32.mrf.mxu1 }
 0x3da   :  { %1294 = vmatmul.bf16.gmra.mxu1 %v5942_v50 }
 0x3df   :  { %v1257_v49 = vpop.f32.mrf.mxu1 }
 0x3e0   :  { %v1899_v57 = vpack.c.bf16 %v1257_v49, %v1255_v15 }
 0x3e2   :  { %5233 = vmatmul.msk.bf16.vlgmr.msrb.gmra.mxu0 %vm1437_vm3, %v1899_v57  ;;  %v5946_v57 = vld [vmem:[#allocation2 + $0x1a0] sm:$0xff] }
 0x3e5   :  { %v1843_v60 = vpop.f32.mrf.mxu3 }
 0x3e6   :  { %v6600_v0 = vadd.f32 %v1843_v60, %v6551_v42 }
 0x3e7   :  { %v1260_v13 = vpop.f32.mrf.mxu1 }
 0x3ea   :  { %1299 = vmatmul.bf16.gmra.mxu1 %v5943_v1 }
 0x3ed   :  { %v6602_v6 = vpop.f32.mrf.mxu3 }
 0x3ee   :  { %7288 = vst [vmem:[#allocation18_spill] sm:$0xff] %v6602_v6 }
 0x3ef   :  { %v1262_v61 = vpop.f32.mrf.mxu1 }
 0x3f0   :  { %v1900_v10 = vpack.c.bf16 %v1262_v61, %v1260_v13 }
 0x3f2   :  { %5234 = vmatmul.msk.bf16.gmra.mxu0 %vm1437_vm3, %v1900_v10 }
 0x3f5   :  { %v1848_v16 = vpop.f32.mrf.mxu3 }
 0x3f6   :  { %v6606_v19 = vadd.f32 %v1848_v16, %v6557_v22  ;;  %v5947_v16 = vld [vmem:[#allocation2 + $0x1a8] sm:$0xff] }
 0x3f7   :  { %v1265_v23 = vpop.f32.mrf.mxu1 }
 0x3fa   :  { %1304 = vmatmul.bf16.gmra.mxu1 %v5944_v24 }
 0x3fd   :  { %v6608_v25 = vpop.f32.mrf.mxu3 }
 0x3ff   :  { %v1267_v42 = vpop.f32.mrf.mxu1 }
 0x400   :  { %v1901_v48 = vpack.c.bf16 %v1267_v42, %v1265_v23 }
 0x402   :  { %5235 = vmatmul.msk.bf16.gmra.mxu0 %vm1437_vm3, %v1901_v48 }
 0x405   :  { %v1853_v32 = vpop.f32.mrf.mxu3 }
 0x406   :  { %v6612_v38 = vadd.f32 %v1853_v32, %v6563_v34 }
 0x407   :  { %v1270_v58 = vpop.f32.mrf.mxu1 }
 0x40a   :  { %1309 = vmatmul.bf16.gmra.mxu1 %v5945_v40  ;;  %v5948_v40 = vld [vmem:[#allocation2 + $0x1b0] sm:$0xff] }
 0x40d   :  { %v6614_v43 = vpop.f32.mrf.mxu3 }
 0x40e   :  { %7289 = vst [vmem:[#allocation19_spill] sm:$0xff] %v6614_v43 }
 0x40f   :  { %v1272_v22 = vpop.f32.mrf.mxu1 }
 0x410   :  { %v1902_v50 = vpack.c.bf16 %v1272_v22, %v1270_v58 }
 0x412   :  { %5236 = vmatmul.msk.bf16.gmra.mxu0 %vm1437_vm3, %v1902_v50 }
 0x415   :  { %v1858_v15 = vpop.f32.mrf.mxu3 }
 0x416   :  { %v6618_v49 = vadd.f32 %v1858_v15, %v6569_v47 }
 0x417   :  { %v1275_v60 = vpop.f32.mrf.mxu1 }
 0x41a   :  { %1314 = vmatmul.bf16.gmra.mxu1 %v5946_v57 }
 0x41d   :  { %v6620_v1 = vpop.f32.mrf.mxu3 }
 0x41f   :  { %v1277_v34 = vpop.f32.mrf.mxu1 }
 0x420   :  { %v1903_v13 = vpack.c.bf16 %v1277_v34, %v1275_v60  ;;  %v5949_v34 = vld [vmem:[#allocation2 + $0x1b8] sm:$0xff] }
 0x422   :  { %5237 = vmatmul.msk.bf16.gmra.mxu0 %vm1437_vm3, %v1903_v13 }
 0x425   :  { %v1863_v61 = vpop.f32.mrf.mxu3 }
 0x426   :  { %v6624_v10 = vadd.f32 %v1863_v61, %v6575_v33  ;;  %v5972_v33 = vld [vmem:[%s6276_s3 + $0x30] sm:$0xff] }
 0x427   :  { %v1280_v24 = vpop.f32.mrf.mxu1  ;;  %2047 = vmatpush.bf16.msrb.mxu2 %v5972_v33 }
 0x42a   :  { %1319 = vmatmul.bf16.gmra.mxu1 %v5947_v16 }
 0x42d   :  { %v6626_v23 = vpop.f32.mrf.mxu3 }
 0x42e   :  { %7290 = vst [vmem:[#allocation20_spill] sm:$0xff] %v6626_v23 }
 0x42f   :  { %v1282_v47 = vpop.f32.mrf.mxu1 }
 0x430   :  { %v1904_v42 = vpack.c.bf16 %v1282_v47, %v1280_v24 }
 0x432   :  { %5238 = vmatmul.msk.bf16.gmra.mxu0 %vm1437_vm3, %v1904_v42  ;;  %v5950_v42 = vld [vmem:[#allocation2 + $0x1c0] sm:$0xff] }
 0x435   :  { %v1868_v48 = vpop.f32.mrf.mxu3 }
 0x436   :  { %v6630_v32 = vadd.f32 %v1868_v48, %v6581_v12  ;;  %v6645_v48 = vpop.f32.mrf.mxu0 }
 0x437   :  { %v1285_v58 = vpop.f32.mrf.mxu1 }
 0x43a   :  { %1324 = vmatmul.bf16.gmra.mxu1 %v5948_v40 }
 0x43d   :  { %v6632_v22 = vpop.f32.mrf.mxu3 }
 0x43f   :  { %v1287_v50 = vpop.f32.mrf.mxu1 }
 0x440   :  { %v1905_v15 = vpack.c.bf16 %v1287_v50, %v1285_v58 }
 0x442   :  { %5239 = vmatmul.msk.bf16.gmra.mxu0 %vm1437_vm3, %v1905_v15  ;;  %v5951_v15 = vld [vmem:[#allocation2 + $0x1c8] sm:$0xff] }
 0x445   :  { %v1873_v57 = vpop.f32.mrf.mxu3 }
 0x446   :  { %v6637_v60 = vadd.f32 %v1873_v57, %v6588_v29 }
 0x447   :  { %v1290_v13 = vpop.f32.mrf.mxu1 }
 0x44a   :  { %1329 = vmatmul.bf16.gmra.mxu1 %v5949_v34 }
 0x44d   :  { %v6639_v12 = vpop.f32.mrf.mxu3 }
 0x44f   :  { %v1292_v61 = vpop.f32.mrf.mxu1 }
 0x450   :  { %v1906_v16 = vpack.c.bf16 %v1292_v61, %v1290_v13 }
 0x452   :  { %5240 = vmatmul.msk.bf16.gmra.mxu0 %vm1437_vm3, %v1906_v16 }
 0x455   :  { %v1878_v24 = vpop.f32.mrf.mxu3 }
 0x456   :  { %v6643_v47 = vadd.f32 %v1878_v24, %v6594_v44  ;;  %v5952_v24 = vld [vmem:[#allocation2 + $0x1d0] sm:$0xff] }
 0x457   :  { %v1295_v40 = vpop.f32.mrf.mxu1 }
 0x45a   :  { %1334 = vmatmul.bf16.gmra.mxu1 %v5950_v42 }
 0x45f   :  { %v1297_v29 = vpop.f32.mrf.mxu1  ;;  %v1946_v58 = vpop.f32.mrf.mxu0 }
 0x460   :  { %v2002_v33 = vpack.c.bf16 %v1297_v29, %v1295_v40  ;;  %v6648_v50 = vadd.f32 %v1946_v58, %v6600_v0 }
 0x462   :  { %5245 = vmatmul.msk.bf16.vlgmr.msrb.gmra.mxu2 %vm1437_vm3, %v2002_v33 }
 0x467   :  { %v1300_v57 = vpop.f32.mrf.mxu1  ;;  %v6651_v34 = vpop.f32.mrf.mxu0 }
 0x468   :  { %7291 = vst [vmem:[#allocation21_spill] sm:$0xff] %v6651_v34 }
 0x46a   :  { %1339 = vmatmul.bf16.gmra.mxu1 %v5951_v15  ;;  %v5953_v15 = vld [vmem:[#allocation2 + $0x1d8] sm:$0xff] }
 0x46f   :  { %v1302_v44 = vpop.f32.mrf.mxu1  ;;  %v1951_v13 = vpop.f32.mrf.mxu0 }
 0x470   :  { %v2003_v61 = vpack.c.bf16 %v1302_v44, %v1300_v57  ;;  %v6654_v16 = vadd.f32 %v1951_v13, %v6606_v19 }
 0x472   :  { %5246 = vmatmul.msk.bf16.gmra.mxu2 %vm1437_vm3, %v2003_v61 }
 0x477   :  { %v1305_v42 = vpop.f32.mrf.mxu1  ;;  %v6657_v40 = vpop.f32.mrf.mxu0 }
 0x478   :  { %7292 = vst [vmem:[#allocation22_spill] sm:$0xff] %v6657_v40 }
 0x47a   :  { %1344 = vmatmul.bf16.gmra.mxu1 %v5952_v24  ;;  %v5954_v24 = vld [vmem:[#allocation2 + $0x1e0] sm:$0xff] }
 0x47f   :  { %v1307_v0 = vpop.f32.mrf.mxu1  ;;  %v1956_v29 = vpop.f32.mrf.mxu0 }
 0x480   :  { %v2004_v58 = vpack.c.bf16 %v1307_v0, %v1305_v42  ;;  %v6660_v33 = vadd.f32 %v1956_v29, %v6612_v38 }
 0x482   :  { %5247 = vmatmul.msk.bf16.gmra.mxu2 %vm1437_vm3, %v2004_v58 }
 0x487   :  { %v1310_v57 = vpop.f32.mrf.mxu1  ;;  %v6663_v44 = vpop.f32.mrf.mxu0 }
 0x488   :  { %7293 = vst [vmem:[#allocation23_spill] sm:$0xff] %v6663_v44 }
 0x48a   :  { %1349 = vmatmul.bf16.gmra.mxu1 %v5953_v15  ;;  %v5955_v15 = vld [vmem:[#allocation2 + $0x1e8] sm:$0xff] }
 0x48f   :  { %v1312_v19 = vpop.f32.mrf.mxu1  ;;  %v1961_v13 = vpop.f32.mrf.mxu0 }
 0x490   :  { %v2005_v61 = vpack.c.bf16 %v1312_v19, %v1310_v57  ;;  %v6666_v34 = vadd.f32 %v1961_v13, %v6618_v49 }
 0x492   :  { %5248 = vmatmul.msk.bf16.gmra.mxu2 %vm1437_vm3, %v2005_v61 }
 0x497   :  { %v1315_v42 = vpop.f32.mrf.mxu1  ;;  %v6669_v0 = vpop.f32.mrf.mxu0 }
 0x498   :  { %7294 = vst [vmem:[#allocation24_spill] sm:$0xff] %v6669_v0 }
 0x49a   :  { %1354 = vmatmul.bf16.gmra.mxu1 %v5954_v24  ;;  %v5956_v24 = vld [vmem:[#allocation2 + $0x1f0] sm:$0xff] }
 0x49f   :  { %v1317_v38 = vpop.f32.mrf.mxu1  ;;  %v1966_v29 = vpop.f32.mrf.mxu0 }
 0x4a0   :  { %v2006_v58 = vpack.c.bf16 %v1317_v38, %v1315_v42  ;;  %v6672_v40 = vadd.f32 %v1966_v29, %v6624_v10  ;;  %v5973_v10 = vld [vmem:[%s6276_s3 + $0x38] sm:$0xff] }
 0x4a1   :  { %2150 = vmatpush.bf16.msrb.mxu3 %v5973_v10 }
 0x4a2   :  { %5249 = vmatmul.msk.bf16.gmra.mxu2 %vm1437_vm3, %v2006_v58 }
 0x4a7   :  { %v1320_v57 = vpop.f32.mrf.mxu1  ;;  %v6675_v49 = vpop.f32.mrf.mxu0 }
 0x4a8   :  { %7295 = vst [vmem:[#allocation25_spill] sm:$0xff] %v6675_v49 }
 0x4aa   :  { %1359 = vmatmul.bf16.gmra.mxu1 %v5955_v15  ;;  %v5957_v15 = vld [vmem:[#allocation2 + $0x1f8] sm:$0xff] }
 0x4af   :  { %v1322_v19 = vpop.f32.mrf.mxu1  ;;  %v1971_v13 = vpop.f32.mrf.mxu0 }
 0x4b0   :  { %v2007_v61 = vpack.c.bf16 %v1322_v19, %v1320_v57  ;;  %v6678_v6 = vadd.f32 %v1971_v13, %v6630_v32 }
 0x4b2   :  { %7296 = vst [vmem:[#allocation26_spill] sm:$0xff] %v6678_v6  ;;  %5250 = vmatmul.msk.bf16.gmra.mxu2 %vm1437_vm3, %v2007_v61  ;;  %v5959_v6 = vld [vmem:[#allocation2 + $0x208] sm:$0xff] }
 0x4b7   :  { %v1325_v42 = vpop.f32.mrf.mxu1  ;;  %v6681_v38 = vpop.f32.mrf.mxu0 }
 0x4ba   :  { %1364 = vmatmul.bf16.gmra.mxu1 %v5956_v24 }
 0x4bf   :  { %v1327_v29 = vpop.f32.mrf.mxu1  ;;  %v1976_v58 = vpop.f32.mrf.mxu0 }
 0x4c0   :  { %v2008_v44 = vpack.c.bf16 %v1327_v29, %v1325_v42  ;;  %v6685_v43 = vadd.f32 %v1976_v58, %v6637_v60  ;;  %v5958_v42 = vld [vmem:[#allocation2 + $0x200] sm:$0xff]  ;;  %v6694_v60 = vpop.f32.mrf.mxu2 }
 0x4c2   :  { %5251 = vmatmul.msk.bf16.gmra.mxu2 %vm1437_vm3, %v2008_v44 }
 0x4c7   :  { %v1330_v32 = vpop.f32.mrf.mxu1  ;;  %v6688_v57 = vpop.f32.mrf.mxu0 }
 0x4ca   :  { %1369 = vmatmul.bf16.gmra.mxu1 %v5957_v15 }
 0x4cf   :  { %v1332_v19 = vpop.f32.mrf.mxu1  ;;  %v1981_v13 = vpop.f32.mrf.mxu0 }
 0x4d0   :  { %v2009_v61 = vpack.c.bf16 %v1332_v19, %v1330_v32  ;;  %v6691_v24 = vadd.f32 %v1981_v13, %v6643_v47 }
 0x4d2   :  { %5252 = vmatmul.msk.bf16.gmra.mxu2 %vm1437_vm3, %v2009_v61 }
 0x4d7   :  { %v1335_v29 = vpop.f32.mrf.mxu1 }
 0x4da   :  { %1374 = vmatmul.bf16.gmra.mxu1 %v5958_v42 }
 0x4df   :  { %v1337_v10 = vpop.f32.mrf.mxu1 }
 0x4e0   :  { %v2105_v44 = vpack.c.bf16 %v1337_v10, %v1335_v29  ;;  %v5960_v29 = vld [vmem:[#allocation2 + $0x210] sm:$0xff] }
 0x4e2   :  { %5257 = vmatmul.msk.bf16.vlgmr.msrb.gmra.mxu3 %vm1437_vm3, %v2105_v44 }
 0x4e5   :  { %v2049_v58 = vpop.f32.mrf.mxu2 }
 0x4e6   :  { %v6698_v15 = vadd.f32 %v2049_v58, %v6648_v50 }
 0x4e7   :  { %v1340_v32 = vpop.f32.mrf.mxu1 }
 0x4ea   :  { %1379 = vmatmul.bf16.gmra.mxu1 %v5959_v6 }
 0x4ed   :  { %v6700_v47 = vpop.f32.mrf.mxu2 }
 0x4ee   :  { %7297 = vst [vmem:[#allocation27_spill] sm:$0xff] %v6700_v47 }
 0x4ef   :  { %v1342_v19 = vpop.f32.mrf.mxu1 }
 0x4f0   :  { %v2106_v13 = vpack.c.bf16 %v1342_v19, %v1340_v32  ;;  %v5961_v32 = vld [vmem:[#allocation2 + $0x218] sm:$0xff] }
 0x4f2   :  { %5258 = vmatmul.msk.bf16.gmra.mxu3 %vm1437_vm3, %v2106_v13 }
 0x4f5   :  { %v2054_v61 = vpop.f32.mrf.mxu2 }
 0x4f6   :  { %v6704_v42 = vadd.f32 %v2054_v61, %v6654_v16 }
 0x4f7   :  { %v1345_v10 = vpop.f32.mrf.mxu1 }
 0x4fa   :  { %1384 = vmatmul.bf16.gmra.mxu1 %v5960_v29 }
 0x4fd   :  { %v6706_v44 = vpop.f32.mrf.mxu2 }
 0x4fe   :  { %7298 = vst [vmem:[#allocation28_spill] sm:$0xff] %v6706_v44 }
 0x4ff   :  { %v1347_v50 = vpop.f32.mrf.mxu1 }
 0x500   :  { %v2107_v58 = vpack.c.bf16 %v1347_v50, %v1345_v10  ;;  %v5962_v50 = vld [vmem:[#allocation2 + $0x220] sm:$0xff] }
 0x502   :  { %5259 = vmatmul.msk.bf16.gmra.mxu3 %vm1437_vm3, %v2107_v58 }
 0x505   :  { %v2059_v6 = vpop.f32.mrf.mxu2 }
 0x506   :  { %v6710_v47 = vadd.f32 %v2059_v6, %v6660_v33 }
 0x507   :  { %v1350_v19 = vpop.f32.mrf.mxu1 }
 0x50a   :  { %1389 = vmatmul.bf16.gmra.mxu1 %v5961_v32  ;;  %v5974_v32 = vld [vmem:[%s6276_s3 + $0x40] sm:$0xff]  ;;  %s7361_s3 = sld [smem:[#allocation11_spill]] }
 0x50b   :  { %2253 = vmatpush.bf16.msra.mxu0 %v5974_v32 }
 0x50d   :  { %v6712_v13 = vpop.f32.mrf.mxu2 }
 0x50e   :  { %7299 = vst [vmem:[#allocation29_spill] sm:$0xff] %v6712_v13  ;;  %v6232_v13 = vmov 0  }
 0x50f   :  { %v1352_v16 = vpop.f32.mrf.mxu1  ;;  %6158 = vset.pattern.permute.xlu0 %v6232_v13  ;;  %6160 = vset.pattern.permute.xlu2 %v6232_v13 }
 0x510   :  { %v2108_v61 = vpack.c.bf16 %v1352_v16, %v1350_v19  ;;  %6159 = vset.pattern.permute.xlu1 %v6232_v13  ;;  %v317_v13 = vld [vmem:[%s6246_s9 + $0x50] sm:$0xff] }
 0x511   :  { %376 = vperm.xlu2 %6160, %v317_v13  }
 0x512   :  { %5260 = vmatmul.msk.bf16.gmra.mxu3 %vm1437_vm3, %v2108_v61  ;;  %v5963_v61 = vld [vmem:[#allocation2 + $0x228] sm:$0xff] }
 0x515   :  { %v2064_v29 = vpop.f32.mrf.mxu2 }
 0x516   :  { %v6716_v10 = vadd.f32 %v2064_v29, %v6666_v34  ;;  %v321_v29 = vld [vmem:[%s6246_s9 + $0x70] sm:$0xff] }
 0x517   :  { %v1355_v58 = vpop.f32.mrf.mxu1  ;;  %396 = vperm.xlu0 %6158, %v321_v29   ;;  %v319_v29 = vld [vmem:[%s6246_s9 + $0x60] sm:$0xff] }
 0x518   :  { %386 = vperm.xlu1 %6159, %v319_v29   ;;  %v308_v29 = vld [vmem:[%s6246_s9 + $0x8] sm:$0xff] }
 0x51a   :  { %1394 = vmatmul.bf16.gmra.mxu1 %v5962_v50 }
 0x51d   :  { %v6718_v33 = vpop.f32.mrf.mxu2 }
 0x51e   :  { %7300 = vst [vmem:[#allocation30_spill] sm:$0xff] %v6718_v33  ;;  %v311_v33 = vld [vmem:[%s6246_s9 + $0x20] sm:$0xff] }
 0x51f   :  { %v1357_v6 = vpop.f32.mrf.mxu1 }
 0x520   :  { %v2109_v44 = vpack.c.bf16 %v1357_v6, %v1355_v58  ;;  %v315_v6 = vld [vmem:[%s6246_s9 + $0x40] sm:$0xff] }
 0x522   :  { %5261 = vmatmul.msk.bf16.gmra.mxu3 %vm1437_vm3, %v2109_v44 }
 0x525   :  { %v2069_v19 = vpop.f32.mrf.mxu2 }
 0x526   :  { %v6723_v16 = vadd.f32 %v2069_v19, %v6672_v40  ;;  %v322_v40 = vld [vmem:[%s6246_s9 + $0x78] sm:$0xff] }
 0x527   :  { %v1360_v34 = vpop.f32.mrf.mxu1  ;;  %401 = vperm.xlu0 %6158, %v322_v40   ;;  %v309_v40 = vld [vmem:[%s6246_s9 + $0x10] sm:$0xff] }
 0x52a   :  { %1399 = vmatmul.bf16.gmra.mxu1 %v5963_v61  ;;  %v314_v61 = vld [vmem:[%s6246_s9 + $0x38] sm:$0xff] }
 0x52f   :  { %v1362_v44 = vpop.f32.mrf.mxu1  ;;  %366 = vperm.xlu0 %6158, %v315_v6  }
 0x530   :  { %v2110_v50 = vpack.c.bf16 %v1362_v44, %v1360_v34  ;;  %v320_v44 = vld [vmem:[%s6246_s9 + $0x68] sm:$0xff] }
 0x531   :  { %391 = vperm.xlu1 %6159, %v320_v44   ;;  %v6742_v44 = vpop.f32.mrf.mxu3 }
 0x532   :  { %5262 = vmatmul.msk.bf16.gmra.mxu3 %vm1437_vm3, %v2110_v50  ;;  %v318_v50 = vld [vmem:[%s6246_s9 + $0x58] sm:$0xff] }
 0x533   :  { %381 = vperm.xlu2 %6160, %v318_v50  }
 0x537   :  { %v1365_v58 = vpop.f32.mrf.mxu1  ;;  %361 = vperm.xlu0 %6158, %v314_v61   ;;  %v312_v61 = vld [vmem:[%s6246_s9 + $0x28] sm:$0xff] }
 0x53f   :  { %v1367_v32 = vpop.f32.mrf.mxu1  ;;  %336 = vperm.xlu0 %6158, %v309_v40  }
 0x540   :  { %v2111_v19 = vpack.c.bf16 %v1367_v32, %v1365_v58  ;;  %v316_v32 = vld [vmem:[%s6246_s9 + $0x48] sm:$0xff] }
 0x541   :  { %371 = vperm.xlu1 %6159, %v316_v32  }
 0x542   :  { %5263 = vmatmul.msk.bf16.gmra.mxu3 %vm1437_vm3, %v2111_v19  ;;  %v313_v19 = vld [vmem:[%s6246_s9 + $0x30] sm:$0xff] }
 0x543   :  { %356 = vperm.xlu2 %6160, %v313_v19  }
 0x547   :  { %v1370_v34 = vpop.f32.mrf.mxu1  ;;  %331 = vperm.xlu0 %6158, %v308_v29  }
 0x549   :  { %346 = vperm.xlu1 %6159, %v311_v33  }
 0x54b   :  { %351 = vperm.xlu2 %6160, %v312_v61  }
 0x54f   :  { %v1372_v58 = vpop.f32.mrf.mxu1 }
 0x550   :  { %v2112_v6 = vpack.c.bf16 %v1372_v58, %v1370_v34  ;;  %v310_v34 = vld [vmem:[%s6246_s9 + $0x18] sm:$0xff]  ;;  %v307_v58 = vld [vmem:[%s6246_s9] sm:$0xff]  ;;  %s7355_s9 = sld [smem:[#allocation7_spill]] }
 0x551   :  { %341 = vperm.xlu1 %6159, %v310_v34  }
 0x552   :  { %5264 = vmatmul.msk.bf16.gmra.mxu3 %vm1437_vm3, %v2112_v6 }
 0x553   :  { %326 = vperm.xlu2 %6160, %v307_v58  }
 0x557   :  { %v1375_v13 = vpop.f32.mrf.mxu1 }
 0x55f   :  { %v1377_v50 = vpop.f32.mrf.mxu1 }
 0x560   :  { %v2208_v40 = vpack.c.bf16 %v1377_v50, %v1375_v13 }
 0x562   :  { %5269 = vmatmul.msk.bf16.vlgmr.msra.gmra.mxu0 %vm1437_vm3, %v2208_v40 }
 0x565   :  { %v2152_v6 = vpop.f32.mrf.mxu3 }
 0x566   :  { %v2192_v32 = vadd.f32 %v2152_v6, %v6698_v15 }
 0x567   :  { %v1380_v19 = vpop.f32.mrf.mxu1 }
 0x56d   :  { %v6748_v29 = vpop.f32.mrf.mxu3 }
 0x56e   :  { %7301 = vst [vmem:[#allocation31_spill] sm:$0xff] %v6748_v29 }
 0x56f   :  { %v1382_v49 = vpop.f32.mrf.mxu1 }
 0x570   :  { %v2209_v0 = vpack.c.bf16 %v1382_v49, %v1380_v19 }
 0x572   :  { %5270 = vmatmul.msk.bf16.gmra.mxu0 %vm1437_vm3, %v2209_v0 }
 0x575   :  { %v2157_v33 = vpop.f32.mrf.mxu3 }
 0x576   :  { %v2194_v61 = vadd.f32 %v2157_v33, %v6704_v42 }
 0x577   :  { %v1385_v13 = vpop.f32.mrf.mxu1 }
 0x57d   :  { %v6752_v50 = vpop.f32.mrf.mxu3 }
 0x57e   :  { %7302 = vst [vmem:[#allocation32_spill] sm:$0xff] %v6752_v50 }
 0x57f   :  { %v1387_v40 = vpop.f32.mrf.mxu1 }
 0x580   :  { %v2210_v23 = vpack.c.bf16 %v1387_v40, %v1385_v13 }
 0x582   :  { %5271 = vmatmul.msk.bf16.gmra.mxu0 %vm1437_vm3, %v2210_v23 }
 0x585   :  { %v2162_v34 = vpop.f32.mrf.mxu3 }
 0x586   :  { %v2196_v15 = vadd.f32 %v2162_v34, %v6710_v47 }
 0x587   :  { %v1390_v58 = vpop.f32.mrf.mxu1 }
 0x58d   :  { %v6756_v6 = vpop.f32.mrf.mxu3 }
 0x58e   :  { %7303 = vst [vmem:[#allocation33_spill] sm:$0xff] %v6756_v6 }
 0x58f   :  { %v1392_v29 = vpop.f32.mrf.mxu1 }
 0x590   :  { %v2211_v49 = vpack.c.bf16 %v1392_v29, %v1390_v58  ;;  %v2214_v29 = vpack.c.bf16 %v6436_v11, %v6432_v8 }
 0x592   :  { %5272 = vmatmul.msk.bf16.gmra.mxu0 %vm1437_vm3, %v2211_v49 }
 0x595   :  { %v2167_v0 = vpop.f32.mrf.mxu3 }
 0x596   :  { %v2198_v42 = vadd.f32 %v2167_v0, %v6716_v10  ;;  %v2215_v10 = vpack.c.bf16 %v6443_v18, %v6440_v14 }
 0x597   :  { %v1395_v19 = vpop.f32.mrf.mxu1 }
 0x59d   :  { %v6760_v33 = vpop.f32.mrf.mxu3 }
 0x59e   :  { %7304 = vst [vmem:[#allocation34_spill] sm:$0xff] %v6760_v33 }
 0x59f   :  { %v1397_v50 = vpop.f32.mrf.mxu1 }
 0x5a0   :  { %v2212_v13 = vpack.c.bf16 %v1397_v50, %v1395_v19  ;;  %v6771_v50 = vpop.f32.mrf.mxu0 }
 0x5a2   :  { %5273 = vmatmul.msk.bf16.gmra.mxu0 %vm1437_vm3, %v2212_v13 }
 0x5a5   :  { %v2172_v23 = vpop.f32.mrf.mxu3 }
 0x5a6   :  { %v2200_v47 = vadd.f32 %v2172_v23, %v6723_v16  ;;  %v6787_v23 = vpop.f32.mrf.mxu2 }
 0x5a7   :  { %v1400_v40 = vpop.f32.mrf.mxu1  ;;  %7312 = vst [vmem:[#allocation42_spill] sm:$0xff] %v6787_v23 }
 0x5af   :  { %v1402_v34 = vpop.f32.mrf.mxu1 }
 0x5b0   :  { %v2213_v6 = vpack.c.bf16 %v1402_v34, %v1400_v40  ;;  %v6789_v40 = vpop.f32.mrf.mxu3  ;;  %v6793_v34 = vpop.f32.mrf.mxu2 }
 0x5b1   :  { %7313 = vst [vmem:[#allocation43_spill] sm:$0xff] %v6789_v40 }
 0x5b2   :  { %5274 = vmatmul.msk.bf16.gmra.mxu0 %vm1437_vm3, %v2213_v6 }
 0x5c2   :  { %5275 = vmatmul.msk.bf16.gmra.mxu0 %vm1437_vm3, %v2214_v29 }
 0x5d2   :  { %5276 = vmatmul.msk.bf16.gmra.mxu0 %vm1437_vm3, %v2215_v10  ;;  %v6797_v10 = vpop.f32.mrf.mxu3 }
 0x5d3   :  { %7316 = vst [vmem:[#allocation46_spill] sm:$0xff] %v6797_v10  ;;  %v1588_v10 = vadd.f32 %v6596_v3, %v6547_v27 }
 0x5df   :  { %v2255_v58 = vpop.f32.mrf.mxu0 }
 0x5e0   :  { %v6773_v49 = vadd.f32 %v2255_v58, %v2192_v32  ;;  %v6801_v58 = vpop.f32.mrf.mxu2 }
 0x5e2   :  { %7305 = vst [vmem:[#allocation35_spill] sm:$0xff] %v6773_v49  ;;  %v397_v49 = vpop.permute.xlu0 %396 }
 0x5e7   :  { %v6775_v16 = vpop.f32.mrf.mxu0 }
 0x5e8   :  { %7306 = vst [vmem:[#allocation36_spill] sm:$0xff] %v6775_v16  ;;  %v6811_v16 = vpop.permute.xlu1 %386 }
 0x5ef   :  { %v2260_v0 = vpop.f32.mrf.mxu0 }
 0x5f0   :  { %v6777_v19 = vadd.f32 %v2260_v0, %v2194_v61  ;;  %v6803_v0 = vpop.f32.mrf.mxu3 }
 0x5f2   :  { %7307 = vst [vmem:[#allocation37_spill] sm:$0xff] %v6777_v19 }
 0x5f7   :  { %v6779_v6 = vpop.f32.mrf.mxu0 }
 0x5f8   :  { %7308 = vst [vmem:[#allocation38_spill] sm:$0xff] %v6779_v6  ;;  %v6815_v6 = vpop.permute.xlu0 %401 }
 0x5ff   :  { %v2265_v8 = vpop.f32.mrf.mxu0 }
 0x600   :  { %v6781_v11 = vadd.f32 %v2265_v8, %v2196_v15  ;;  %v2079_v8 = vpop.f32.mrf.mxu2  ;;  %v6829_v23 = vpop.permute.xlu0 %366 }
 0x602   :  { %7309 = vst [vmem:[#allocation39_spill] sm:$0xff] %v6781_v11 }
 0x607   :  { %v6783_v13 = vpop.f32.mrf.mxu0 }
 0x608   :  { %7310 = vst [vmem:[#allocation40_spill] sm:$0xff] %v6783_v13  ;;  %v1583_v13 = vadd.f32 %v6493_v30, %v6495_v31  ;;  %v1558_v30 = vadd.f32 %v6452_v35, %v6461_v46  ;;  %v1563_v31 = vadd.f32 %v6459_v45, %v6466_v54 }
 0x60a   :  { %v1680_v35 = vadd.f32 %v6510_v62, %v1558_v30  ;;  %v1682_v46 = vadd.f32 %v6516_v7, %v1563_v31  ;;  %v6883_v31 = vld [vmem:[%s6266_s25] ss:$0 sm:$0xff]  ;;  %s7359_s25 = sld [smem:[#allocation10_spill]] }
 0x60c   :  { %v1783_v62 = vadd.f32 %v6559_v28, %v1680_v35 }
 0x60f   :  { %v2270_v14 = vpop.f32.mrf.mxu0 }
 0x610   :  { %v6785_v18 = vadd.f32 %v2270_v14, %v2198_v42  ;;  %v6807_v14 = vpop.f32.mrf.mxu3 }
 0x612   :  { %7311 = vst [vmem:[#allocation41_spill] sm:$0xff] %v6785_v18  ;;  %v6817_v18 = vpop.permute.xlu2 %376 }
 0x613   :  { %7320 = vst [vmem:[#allocation50_spill] sm:$0xff] %v6817_v18 }
 0x617   :  { %v6791_v32 = vpop.f32.mrf.mxu0 }
 0x618   :  { %7314 = vst [vmem:[#allocation44_spill] sm:$0xff] %v6791_v32 }
 0x61f   :  { %v2275_v61 = vpop.f32.mrf.mxu0 }
 0x620   :  { %v6795_v29 = vadd.f32 %v2275_v61, %v2200_v47  ;;  %v2081_v47 = vpop.f32.mrf.mxu2  ;;  %v2184_v61 = vpop.f32.mrf.mxu3 }
 0x622   :  { %7315 = vst [vmem:[#allocation45_spill] sm:$0xff] %v6795_v29  ;;  %v392_v29 = vpop.permute.xlu1 %391 }
 0x627   :  { %v6799_v15 = vpop.f32.mrf.mxu0 }
 0x628   :  { %7317 = vst [vmem:[#allocation47_spill] sm:$0xff] %v6799_v15  ;;  %v2084_v32 = vpop.f32.mrf.mxu2  ;;  %v1690_v15 = vadd.f32 %v6541_v53, %v1583_v13  ;;  %v2187_v40 = vpop.f32.mrf.mxu3  ;;  %v1692_v53 = vadd.f32 %v6645_v48, %v1588_v10  ;;  %v7321_v13 = vld [vmem:[#allocation20_spill] sm:$0xff] }
 0x62a   :  { %v1793_v18 = vadd.f32 %v6590_v36, %v1690_v15  ;;  %v382_v36 = vpop.permute.xlu2 %381  ;;  %v372_v48 = vpop.permute.xlu1 %371 }
 0x62b   :  { %v362_v15 = vpop.permute.xlu0 %361 }
 0x62c   :  { %v1896_v27 = vadd.f32 %v6639_v12, %v1793_v18  ;;  %v7322_v18 = vld [vmem:[#allocation24_spill] sm:$0xff] }
 0x62f   :  { %v6805_v42 = vpop.f32.mrf.mxu0 }
 0x630   :  { %7318 = vst [vmem:[#allocation48_spill] sm:$0xff] %v6805_v42  ;;  %v1578_v42 = vadd.f32 %v6485_v17, %v6487_v20  ;;  %v1568_v17 = vadd.f32 %v6468_v55, %v6473_v63  ;;  %v1795_v63 = vadd.f32 %v6694_v60, %v1692_v53  ;;  %v2101_v60 = vadd.f32 %v2079_v8, %v6685_v43  ;;  %v7323_v8 = vld [vmem:[#allocation25_spill] sm:$0xff]  ;;  %v7326_v53 = vld [vmem:[#allocation46_spill] sm:$0xff] }
 0x632   :  { %v1688_v20 = vadd.f32 %v6534_v41, %v1578_v42  ;;  %v1684_v45 = vadd.f32 %v6522_v21, %v1568_v17  ;;  %v2204_v10 = vadd.f32 %v6807_v14, %v2101_v60  ;;  %v6877_v42 = vld [vmem:[%s6281_s8] ss:$0 sm:$0xff]  ;;  %v357_v17 = vpop.permute.xlu2 %356  ;;  %v7333_v60 = vld [vmem:[#allocation47_spill] sm:$0xff]  ;;  %s7362_s8 = sld [smem:[#allocation15_spill]] }
 0x634   :  { %v1791_v54 = vadd.f32 %v6583_v51, %v1688_v20  ;;  %v1787_v7 = vadd.f32 %v6571_v56, %v1684_v45  ;;  %v1785_v51 = vadd.f32 %v6565_v4, %v1682_v46  ;;  %v2086_v56 = vpop.f32.mrf.mxu2 }
 0x636   :  { %v1894_v21 = vadd.f32 %v6632_v22, %v1791_v54  ;;  %v6866_v22 = vld [vmem:[%s6261_s21] ss:$0 sm:$0xff]  ;;  %s7358_s21 = sld [smem:[#allocation9_spill]] }
 0x637   :  { %v6809_v19 = vpop.f32.mrf.mxu0  ;;  %v418_v35 = vmul.f32 %v6866_v22, %v382_v36 }
 0x638   :  { %7319 = vst [vmem:[#allocation49_spill] sm:$0xff] %v6809_v19  ;;  %v1553_v19 = vadd.f32 %v6447_v26, %v6454_v37  ;;  %v1573_v26 = vadd.f32 %v6476_v2, %v6480_v9  ;;  %v1999_v2 = vadd.f32 %v6688_v57, %v1896_v27  ;;  %v2103_v9 = vadd.f32 %v2084_v32, %v6691_v24 }
 0x639   :  { %v6861_v24 = vadd.f32 %v6608_v25, %v1783_v62  ;;  %v1997_v28 = vadd.f32 %v6681_v38, %v1894_v21  ;;  %v2189_v38 = vpop.f32.mrf.mxu3  ;;  %v7330_v21 = vld [vmem:[#allocation48_spill] sm:$0xff] }
 0x63a   :  { %v1678_v37 = vadd.f32 %v6504_v52, %v1553_v19  ;;  %v1686_v55 = vadd.f32 %v6528_v59, %v1573_v26  ;;  %v1898_v59 = vadd.f32 %v6742_v44, %v1795_v63  ;;  %v2102_v3 = vadd.f32 %v2081_v47, %v1999_v2  ;;  %v7325_v26 = vld [vmem:[#allocation42_spill] sm:$0xff] }
 0x63b   :  { %v2206_v12 = vadd.f32 %v2187_v40, %v2103_v9  ;;  %v2100_v40 = vadd.f32 %v6801_v58, %v1997_v28  ;;  %v419_v58 = vmul.f32 %v6866_v22, %v6811_v16  ;;  %v7329_v63 = vld [vmem:[#allocation50_spill] sm:$0xff] }
 0x63c   :  { %v6852_v52 = vadd.f32 %v6553_v39, %v1678_v37  ;;  %v1789_v57 = vadd.f32 %v6577_v5, %v1686_v55  ;;  %v1890_v39 = vadd.f32 %v6620_v1, %v1787_v7  ;;  %v2001_v4 = vadd.f32 %v6771_v50, %v1898_v59  ;;  %v7328_v55 = vld [vmem:[#allocation43_spill] sm:$0xff]  ;;  %v347_v7 = vpop.permute.xlu1 %346 }
 0x63d   :  { %v2205_v44 = vadd.f32 %v2184_v61, %v2102_v3  ;;  %v421_v1 = vmul.f32 %v6866_v22, %v397_v49  ;;  %v420_v50 = vmul.f32 %v6866_v22, %v392_v29  ;;  %v7324_v61 = vld [vmem:[#allocation26_spill] sm:$0xff]  ;;  %v422_v49 = vmul.f32 %v6866_v22, %v6815_v6 }
 0x63e   :  { %v1892_v5 = vadd.f32 %v7321_v13, %v1789_v57  ;;  %v1993_v25 = vadd.f32 %v7322_v18, %v1890_v39  ;;  %v2104_v32 = vadd.f32 %v2086_v56, %v2001_v4  ;;  %v2099_v30 = vadd.f32 %v6793_v34, %v7324_v61  ;;  %v7332_v39 = vld [vmem:[#allocation30_spill] sm:$0xff]  ;;  %v7334_v18 = vld [vmem:[#allocation23_spill] sm:$0xff] }
 0x63f   :  { %v6813_v11 = vpop.f32.mrf.mxu0  ;;  %v2203_v14 = vadd.f32 %v6803_v0, %v2100_v40  ;;  %v441_v27 = vadd.f32 %v6883_v31, %v421_v1  ;;  %v440_v46 = vadd.f32 %v6883_v31, %v420_v50  ;;  %v7327_v16 = vld [vmem:[#allocation49_spill] sm:$0xff]  ;;  %v417_v2 = vmul.f32 %v6866_v22, %v7329_v63  ;;  %v7335_v1 = vld [vmem:[#allocation34_spill] sm:$0xff] }
 0x640   :  { %v1995_v47 = vadd.f32 %v7323_v8, %v1892_v5  ;;  %v2207_v29 = vadd.f32 %v2189_v38, %v2104_v32  ;;  %v2307_v20 = vadd.f32 %v6813_v11, %v2204_v10  ;;  %v2202_v34 = vadd.f32 %v7326_v53, %v2099_v30  ;;  %v7336_v8 = vld [vmem:[#allocation29_spill] sm:$0xff]  ;;  %v7339_v53 = vld [vmem:[#allocation22_spill] sm:$0xff] }
 0x641   :  { %v2306_v45 = vadd.f32 %v7327_v16, %v2203_v14  ;;  %v442_v9 = vadd.f32 %v6883_v31, %v422_v49  ;;  %v439_v62 = vadd.f32 %v6883_v31, %v419_v58  ;;  %v2096_v28 = vadd.f32 %v7332_v39, %v1993_v25  ;;  %v337_v25 = vpop.permute.xlu0 %336  ;;  %v7337_v49 = vld [vmem:[#allocation44_spill] sm:$0xff]  ;;  %v352_v14 = vpop.permute.xlu2 %351  ;;  %v7346_v39 = vld [vmem:[#allocation41_spill] sm:$0xff] }
 0x642   :  { %v2098_v37 = vadd.f32 %v7325_v26, %v1995_v47  ;;  %v2305_v36 = vadd.f32 %v7330_v21, %v2202_v34  ;;  %v438_v56 = vadd.f32 %v6883_v31, %v418_v35  ;;  %v416_v4 = vmul.f32 %v6866_v22, %v372_v48  ;;  %v7338_v26 = vld [vmem:[#allocation18_spill] sm:$0xff] }
 0x643   :  { %v2199_v38 = vadd.f32 %v7335_v1, %v2096_v28  ;;  %v437_v32 = vadd.f32 %v6883_v31, %v417_v2  ;;  %v414_v61 = vmul.f32 %v6866_v22, %v362_v15  ;;  %v1989_v34 = vadd.f32 %v7339_v53, %v6861_v24  ;;  %v7343_v24 = vld [vmem:[#allocation40_spill] sm:$0xff] }
 0x644   :  { %v2201_v11 = vadd.f32 %v7328_v55, %v2098_v37  ;;  %v2324_v10 = vadd.f32 %v6877_v42, %v2305_v36  ;;  %v436_v30 = vadd.f32 %v6883_v31, %v416_v4  ;;  %v1884_v37 = vadd.f32 %v7338_v26, %v6852_v52  ;;  %v342_v2 = vpop.permute.xlu1 %341  ;;  %v7344_v36 = vld [vmem:[#allocation21_spill] sm:$0xff] }
 0x645   :  { %v2302_v58 = vadd.f32 %v7337_v49, %v2199_v38  ;;  %v413_v15 = vmul.f32 %v6866_v22, %v357_v17  ;;  %v434_v52 = vadd.f32 %v6883_v31, %v414_v61  ;;  %v2320_v28 = vadd.f32 %v6877_v42, %v7346_v39  ;;  %v5980_v39 = vld [vmem:[%s6286_s14 + $0x28] sm:$0xff] }
 0x647   :  { %v2287_v33 = vpop.f32.mrf.mxu0  ;;  %v2321_v17 = vadd.f32 %v6877_v42, %v2302_v58  ;;  %v7351_v58 = vld [vmem:[#allocation36_spill] sm:$0xff] }
 0x648   :  { %v2308_v43 = vadd.f32 %v2287_v33, %v2205_v44  ;;  %v2304_v44 = vadd.f32 %v7333_v60, %v2201_v11  ;;  %v412_v11 = vmul.f32 %v6866_v22, %v352_v14  ;;  %v7347_v60 = vld [vmem:[#allocation27_spill] sm:$0xff] }
 0x649   :  { %v2337_v38 = vadd.f32 %v2321_v17, %v434_v52 }
 0x64a   :  { %v2327_v0 = vadd.f32 %v6877_v42, %v2308_v43 }
 0x64b   :  { %v2353_v26 = vmax.f32 %v2337_v38, 0.0  ;;  %v5985_v38 = vld [vmem:[%s6286_s14 + $0x50] sm:$0xff] }
 0x64c   :  { %v2343_v13 = vadd.f32 %v2327_v0, %v440_v46  ;;  %v7341_v46 = vld [vmem:[#allocation45_spill] sm:$0xff] }
 0x64d   :  { %v2322_v16 = vadd.f32 %v6877_v42, %v7341_v46 }
 0x64f   :  { %v2290_v41 = vpop.f32.mrf.mxu0 }
 0x650   :  { %v2309_v19 = vadd.f32 %v2290_v41, %v2206_v12  ;;  %v2326_v41 = vadd.f32 %v6877_v42, %v2307_v20  ;;  %v7331_v12 = vld [vmem:[#allocation19_spill] sm:$0xff] }
 0x651   :  { %v1888_v57 = vadd.f32 %v7331_v12, %v1785_v51  ;;  %v415_v51 = vmul.f32 %v6866_v22, %v6829_v23  ;;  %v2359_v23 = vmax.f32 %v2343_v13, 0.0  ;;  %v433_v12 = vadd.f32 %v6883_v31, %v413_v15 }
 0x652   :  { %v2328_v33 = vadd.f32 %v6877_v42, %v2309_v19  ;;  %v2325_v19 = vadd.f32 %v6877_v42, %v2306_v45  ;;  %v2342_v50 = vadd.f32 %v2326_v41, %v439_v62  ;;  %v2340_v45 = vadd.f32 %v2324_v10, %v437_v32 }
 0x653   :  { %v1991_v40 = vadd.f32 %v7334_v18, %v1888_v57  ;;  %v1987_v41 = vadd.f32 %v7344_v36, %v1884_v37  ;;  %v411_v57 = vmul.f32 %v6866_v22, %v347_v7  ;;  %v410_v13 = vmul.f32 %v6866_v22, %v342_v2 }
 0x654   :  { %v2344_v59 = vadd.f32 %v2328_v33, %v441_v27  ;;  %v2341_v20 = vadd.f32 %v2325_v19, %v438_v56  ;;  %v7340_v27 = vld [vmem:[#allocation33_spill] sm:$0xff]  ;;  %v2358_v0 = vmax.f32 %v2342_v50, 0.0  ;;  %v2356_v4 = vmax.f32 %v2340_v45, 0.0 }
 0x655   :  { %v2094_v47 = vadd.f32 %v7336_v8, %v1991_v40  ;;  %v432_v19 = vadd.f32 %v6883_v31, %v412_v11  ;;  %v332_v40 = vpop.permute.xlu0 %331  ;;  %v409_v50 = vmul.f32 %v6866_v22, %v337_v25  ;;  %v7350_v8 = vld [vmem:[#allocation39_spill] sm:$0xff]  ;;  %v2336_v61 = vadd.f32 %v2320_v28, %v433_v12  ;;  %v5978_v12 = vld [vmem:[%s6286_s14 + $0x18] sm:$0xff]  ;;  %v5981_v28 = vld [vmem:[%s6286_s14 + $0x30] sm:$0xff] }
 0x656   :  { %v2360_v48 = vmax.f32 %v2344_v59, 0.0  ;;  %v6941_v62 = vpack.c.bf16 %v2359_v23, %v2358_v0  ;;  %v2357_v21 = vmax.f32 %v2341_v20, 0.0  ;;  %v7345_v59 = vld [vmem:[#allocation32_spill] sm:$0xff]  ;;  %v408_v49 = vmul.f32 %v6866_v22, %v332_v40 }
 0x657   :  { %v2292_v6 = vpop.f32.mrf.mxu0  ;;  %v2197_v35 = vadd.f32 %v7340_v27, %v2094_v47  ;;  %v2318_v47 = vadd.f32 %v6877_v42, %v7350_v8  ;;  %v429_v53 = vadd.f32 %v6883_v31, %v409_v50  ;;  %v2352_v15 = vmax.f32 %v2336_v61, 0.0 }
 0x658   :  { %v2310_v54 = vadd.f32 %v2292_v6, %v2207_v29  ;;  %v2323_v29 = vadd.f32 %v6877_v42, %v2304_v44  ;;  %v435_v6 = vadd.f32 %v6883_v31, %v415_v51  ;;  %v2090_v44 = vadd.f32 %v7347_v60, %v1987_v41  ;;  %v7349_v51 = vld [vmem:[#allocation31_spill] sm:$0xff]  ;;  %v5975_v41 = vld [vmem:[%s6286_s14] sm:$0xff] }
 0x659   :  { %v2300_v63 = vadd.f32 %v7343_v24, %v2197_v35  ;;  %v6955_v7 = vpack.c.bf16 %v2357_v21, %v2356_v4  ;;  %v6976_v45 = vpack.c.bf16 %v2353_v26, %v2352_v15  ;;  %v5983_v4 = vld [vmem:[%s6286_s14 + $0x40] sm:$0xff]  ;;  %v5989_v26 = vld [vmem:[%s6286_s14 + $0x70] sm:$0xff] }
 0x65a   :  { %v2329_v3 = vadd.f32 %v6877_v42, %v2310_v54  ;;  %v7342_v54 = vld [vmem:[#allocation28_spill] sm:$0xff]  ;;  %v2338_v56 = vadd.f32 %v2322_v16, %v435_v6  ;;  %v2193_v10 = vadd.f32 %v7349_v51, %v2090_v44  ;;  %v428_v6 = vadd.f32 %v6883_v31, %v408_v49  ;;  %v5994_v44 = vld [vmem:[%s6291_s19 + $0x8] sm:$0xff]  ;;  %v5993_v51 = vld [vmem:[%s6291_s19] sm:$0xff] }
 0x65b   :  { %v2092_v55 = vadd.f32 %v7342_v54, %v1989_v34  ;;  %v2319_v1 = vadd.f32 %v6877_v42, %v2300_v63  ;;  %v7352_v34 = vld [vmem:[#allocation37_spill] sm:$0xff]  ;;  %2655 = vmatpush.bf16.msra.mxu3 %v5994_v44 }
 0x65c   :  { %v2345_v5 = vadd.f32 %v2329_v3, %v442_v9  ;;  %v2339_v9 = vadd.f32 %v2323_v29, %v436_v30  ;;  %v2354_v30 = vmax.f32 %v2338_v56, 0.0  ;;  %v2296_v14 = vadd.f32 %v7351_v58, %v2193_v10  ;;  %v5982_v56 = vld [vmem:[%s6286_s14 + $0x38] sm:$0xff]  ;;  %v5995_v58 = vld [vmem:[%s6291_s19 + $0x10] sm:$0xff] }
 0x65d   :  { %v2195_v3 = vadd.f32 %v7345_v59, %v2092_v55  ;;  %v430_v29 = vadd.f32 %v6883_v31, %v410_v13  ;;  %v2335_v23 = vadd.f32 %v2319_v1, %v432_v19  ;;  %v2316_v27 = vadd.f32 %v6877_v42, %v7352_v34  ;;  %v5976_v59 = vld [vmem:[%s6286_s14 + $0x8] sm:$0xff] }
 0x65e   :  { %v2361_v43 = vmax.f32 %v2345_v5, 0.0  ;;  %v7348_v5 = vld [vmem:[#allocation38_spill] sm:$0xff]  ;;  %v2355_v32 = vmax.f32 %v2339_v9, 0.0  ;;  %v2315_v46 = vadd.f32 %v6877_v42, %v2296_v14 }
 0x65f   :  { %v2298_v18 = vadd.f32 %v7348_v5, %v2195_v3  ;;  %v2351_v0 = vmax.f32 %v2335_v23, 0.0  ;;  %v2332_v52 = vadd.f32 %v2316_v27, %v429_v53  ;;  %v5977_v3 = vld [vmem:[%s6286_s14 + $0x10] sm:$0xff]  ;;  %v5984_v5 = vld [vmem:[%s6286_s14 + $0x48] sm:$0xff]  ;;  %2686 = vmatpush.bf16.msrb.mxu3 %v5993_v51  ;;  %v5996_v53 = vld [vmem:[%s6291_s19 + $0x18] sm:$0xff] }
 0x660   :  { %v6924_v33 = vpack.c.bf16 %v2361_v43, %v2360_v48  ;;  %v327_v48 = vpop.permute.xlu2 %326  ;;  %v431_v43 = vadd.f32 %v6883_v31, %v411_v57  ;;  %v6967_v25 = vpack.c.bf16 %v2355_v32, %v2354_v30  ;;  %v2331_v24 = vadd.f32 %v2315_v46, %v428_v6  ;;  %v5979_v57 = vld [vmem:[%s6286_s14 + $0x20] sm:$0xff] }
 0x661   :  { %v2317_v20 = vadd.f32 %v6877_v42, %v2298_v18  ;;  %v407_v37 = vmul.f32 %v6866_v22, %v327_v48  ;;  %v7353_v22 = vld [vmem:[#allocation35_spill] sm:$0xff]  ;;  %v2348_v9 = vmax.f32 %v2332_v52, 0.0  ;;  %v5986_v48 = vld [vmem:[%s6286_s14 + $0x58] sm:$0xff]  ;;  %v5987_v30 = vld [vmem:[%s6286_s14 + $0x60] sm:$0xff] }
 0x662   :  { %2533 = vmatpush.bf16.msra.mxu2 %v6924_v33  ;;  %v2334_v35 = vadd.f32 %v2318_v47, %v431_v43  ;;  %v2314_v55 = vadd.f32 %v6877_v42, %v7353_v22  ;;  %v2347_v42 = vmax.f32 %v2331_v24, 0.0  ;;  %v5997_v43 = vld [vmem:[%s6291_s19 + $0x20] sm:$0xff]  ;;  %v6000_v24 = vld [vmem:[%s6291_s19 + $0x38] sm:$0xff] }
 0x663   :  { %v2333_v16 = vadd.f32 %v2317_v20, %v430_v29  ;;  %v427_v54 = vadd.f32 %v6883_v31, %v407_v37  ;;  %2793 = vmatpush.bf16.msrb.mxu0 %v5997_v43  ;;  %v5988_v29 = vld [vmem:[%s6286_s14 + $0x68] sm:$0xff] }
 0x664   :  { %v2350_v11 = vmax.f32 %v2334_v35, 0.0  ;;  %v5990_v35 = vld [vmem:[%s6286_s14 + $0x78] sm:$0xff] }
 0x665   :  { %v2349_v2 = vmax.f32 %v2333_v16, 0.0  ;;  %v2330_v17 = vadd.f32 %v2314_v55, %v427_v54  ;;  %v5991_v16 = vld [vmem:[%s6286_s14 + $0x80] sm:$0xff]  ;;  %v5998_v54 = vld [vmem:[%s6291_s19 + $0x28] sm:$0xff] }
 0x666   :  { %2534 = vmatpush.bf16.msra.mxu2 %v6941_v62  ;;  %v6982_v63 = vpack.c.bf16 %v2351_v0, %v2350_v11  ;;  %v5992_v11 = vld [vmem:[%s6286_s14 + $0x88] sm:$0xff]  ;;  %s7363_s14 = sld [smem:[#allocation16_spill]] }
 0x667   :  { %v6985_v31 = vpack.c.bf16 %v2349_v2, %v2348_v9  ;;  %v2346_v21 = vmax.f32 %v2330_v17, 0.0 }
 0x669   :  { %v6988_v36 = vpack.c.bf16 %v2347_v42, %v2346_v21 }
 0x66a   :  { %2535 = vmatpush.bf16.msra.mxu2 %v6955_v7 }
 0x66e   :  { %2536 = vmatpush.bf16.msra.mxu2 %v6967_v25 }
 0x672   :  { %2537 = vmatpush.bf16.msra.mxu2 %v6976_v45 }
 0x676   :  { %2538 = vmatpush.bf16.msra.mxu2 %v6982_v63 }
 0x67a   :  { %2539 = vmatpush.bf16.msra.mxu2 %v6985_v31 }
 0x67e   :  { %2540 = vmatpush.bf16.msra.mxu2 %v6988_v36 }
 0x681   :  { %2541 = vmatmul.bf16.vlgmr.msra.gmra.mxu2 %v5975_v41  ;;  %v5999_v41 = vld [vmem:[%s6291_s19 + $0x30] sm:$0xff] }
 0x682   :  { %6122 = vmatpush.bf16.msrb.mxu2 %v5997_v43  ;;  %2867 = vmatpush.bf16.msra.mxu0 %v5999_v41 }
 0x691   :  { %2546 = vmatmul.bf16.gmra.mxu2 %v5976_v59 }
 0x6a1   :  { %2551 = vmatmul.bf16.gmra.mxu2 %v5977_v3 }
 0x6b1   :  { %2556 = vmatmul.bf16.gmra.mxu2 %v5978_v12 }
 0x6c1   :  { %2561 = vmatmul.bf16.gmra.mxu2 %v5979_v57 }
 0x6d1   :  { %2566 = vmatmul.bf16.gmra.mxu2 %v5980_v39 }
 0x6e1   :  { %2571 = vmatmul.bf16.gmra.mxu2 %v5981_v28 }
 0x6f1   :  { %2576 = vmatmul.bf16.gmra.mxu2 %v5982_v56 }
 0x701   :  { %2581 = vmatmul.bf16.gmra.mxu2 %v5983_v4 }
 0x704   :  { %v2542_v60 = vpop.f32.mrf.mxu2 }
 0x70c   :  { %v2544_v19 = vpop.f32.mrf.mxu2 }
 0x70d   :  { %v2632_v13 = vpack.c.bf16 %v2544_v19, %v2542_v60 }
 0x711   :  { %2586 = vmatmul.bf16.gmra.mxu2 %v5984_v5 }
 0x714   :  { %v2547_v18 = vpop.f32.mrf.mxu2 }
 0x71c   :  { %v2549_v40 = vpop.f32.mrf.mxu2 }
 0x71d   :  { %v2633_v1 = vpack.c.bf16 %v2549_v40, %v2547_v18 }
 0x721   :  { %2591 = vmatmul.bf16.gmra.mxu2 %v5985_v38 }
 0x724   :  { %v2552_v32 = vpop.f32.mrf.mxu2 }
 0x72c   :  { %v2554_v10 = vpop.f32.mrf.mxu2 }
 0x72d   :  { %v2634_v50 = vpack.c.bf16 %v2554_v10, %v2552_v32 }
 0x72f   :  { %5353 = vmatmul.msk.bf16.vlgmr.msra.gmra.mxu3 %vm1437_vm3, %v2634_v50 }
 0x730   :  { %2719 = vmatpush.bf16.msra.mxu3 %v5995_v58 }
 0x731   :  { %2596 = vmatmul.bf16.gmra.mxu2 %v5986_v48 }
 0x734   :  { %v2557_v8 = vpop.f32.mrf.mxu2 }
 0x73c   :  { %v2559_v47 = vpop.f32.mrf.mxu2 }
 0x73d   :  { %v2635_v61 = vpack.c.bf16 %v2559_v47, %v2557_v8 }
 0x73f   :  { %5354 = vmatmul.msk.bf16.gmra.mxu3 %vm1437_vm3, %v2635_v61 }
 0x741   :  { %2601 = vmatmul.bf16.gmra.mxu2 %v5987_v30 }
 0x744   :  { %v2562_v49 = vpop.f32.mrf.mxu2 }
 0x74c   :  { %v2564_v14 = vpop.f32.mrf.mxu2 }
 0x74d   :  { %v2698_v27 = vpack.c.bf16 %v2564_v14, %v2562_v49 }
 0x74f   :  { %5359 = vmatmul.msk.bf16.vlgmr.msrb.gmra.mxu3 %vm1437_vm3, %v2632_v13 }
 0x750   :  { %2756 = vmatpush.bf16.msrb.mxu3 %v5996_v53 }
 0x751   :  { %2606 = vmatmul.bf16.gmra.mxu2 %v5988_v29 }
 0x754   :  { %v2567_v20 = vpop.f32.mrf.mxu2 }
 0x75c   :  { %v2569_v23 = vpop.f32.mrf.mxu2 }
 0x75d   :  { %v2699_v46 = vpack.c.bf16 %v2569_v23, %v2567_v20 }
 0x75f   :  { %5360 = vmatmul.msk.bf16.gmra.mxu3 %vm1437_vm3, %v2633_v1  ;;  %v6001_v1 = vld [vmem:[%s6291_s19 + $0x40] sm:$0xff]  ;;  %s7364_s19 = sld [smem:[#allocation13_spill]] }
 0x761   :  { %2611 = vmatmul.bf16.gmra.mxu2 %v5989_v26 }
 0x764   :  { %v2572_v37 = vpop.f32.mrf.mxu2 }
 0x76c   :  { %v2574_v34 = vpop.f32.mrf.mxu2 }
 0x76d   :  { %v2735_v55 = vpack.c.bf16 %v2574_v34, %v2572_v37 }
 0x76f   :  { %5365 = vmatmul.msk.bf16.vlgmr.msra.gmra.mxu3 %vm1437_vm3, %v2698_v27 }
 0x770   :  { %2830 = vmatpush.bf16.msra.mxu3 %v5998_v54 }
 0x771   :  { %2616 = vmatmul.bf16.gmra.mxu2 %v5990_v35 }
 0x774   :  { %v2577_v15 = vpop.f32.mrf.mxu2 }
 0x77c   :  { %v2579_v6 = vpop.f32.mrf.mxu2 }
 0x77d   :  { %v2736_v9 = vpack.c.bf16 %v2579_v6, %v2577_v15 }
 0x77f   :  { %5366 = vmatmul.msk.bf16.gmra.mxu3 %vm1437_vm3, %v2699_v46 }
 0x781   :  { %2621 = vmatmul.bf16.gmra.mxu2 %v5991_v16  ;;  %v6002_v16 = vld [vmem:[%s6301_s30] sm:$0xff] }
 0x784   :  { %v2582_v0 = vpop.f32.mrf.mxu2 }
 0x78c   :  { %v2584_v22 = vpop.f32.mrf.mxu2 }
 0x78d   :  { %v2772_v52 = vpack.c.bf16 %v2584_v22, %v2582_v0 }
 0x78f   :  { %5371 = vmatmul.msk.bf16.vlgmr.msrb.gmra.mxu3 %vm1437_vm3, %v2735_v55  ;;  %5377 = vmatmul.msk.bf16.vlgmr.msrb.gmra.mxu0 %vm1437_vm3, %v2772_v52  ;;  %v6003_v52 = vld [vmem:[%s6301_s30 + $0x8] sm:$0xff]  ;;  %s7366_s30 = sld [smem:[#allocation17_spill]] }
 0x790   :  { %2904 = vmatpush.bf16.msrb.mxu3 %v6000_v24  ;;  %2941 = vmatpush.bf16.msrb.mxu0 %v6001_v1 }
 0x791   :  { %2626 = vmatmul.bf16.gmra.mxu2 %v5992_v11 }
 0x794   :  { %v2587_v2 = vpop.f32.mrf.mxu2 }
 0x79c   :  { %v2589_v17 = vpop.f32.mrf.mxu2 }
 0x79d   :  { %v2773_v42 = vpack.c.bf16 %v2589_v17, %v2587_v2 }
 0x79f   :  { %5372 = vmatmul.msk.bf16.gmra.mxu3 %vm1437_vm3, %v2736_v9 }
 0x7a1   :  { %5378 = vmatmul.msk.bf16.vlgmr.msrb.gmra.mxu2 %vm1437_vm3, %v2773_v42 }
 0x7a4   :  { %v2592_v21 = vpop.f32.mrf.mxu2 }
 0x7ac   :  { %v2594_v59 = vpop.f32.mrf.mxu2 }
 0x7ad   :  { %v2809_v3 = vpack.c.bf16 %v2594_v59, %v2592_v21 }
 0x7af   :  { %5383 = vmatmul.msk.bf16.vlgmr.msra.gmra.mxu3 %vm1437_vm3, %v2809_v3 }
 0x7b0   :  { %2987 = vmatpush.bf16.msra.mxu3 %v6924_v33 }
 0x7b2   :  { %v2657_v12 = vpop.f32.mrf.mxu3 }
 0x7b4   :  { %2988 = vmatpush.bf16.msra.mxu3 %v6941_v62  ;;  %v2597_v57 = vpop.f32.mrf.mxu2 }
 0x7b8   :  { %2989 = vmatpush.bf16.msra.mxu3 %v6955_v7 }
 0x7ba   :  { %v7031_v39 = vpop.f32.mrf.mxu3 }
 0x7bc   :  { %2990 = vmatpush.bf16.msra.mxu3 %v6967_v25  ;;  %v2599_v28 = vpop.f32.mrf.mxu2 }
 0x7bd   :  { %v2810_v56 = vpack.c.bf16 %v2599_v28, %v2597_v57 }
 0x7bf   :  { %5384 = vmatmul.msk.bf16.gmra.mxu3 %vm1437_vm3, %v2810_v56 }
 0x7c0   :  { %2991 = vmatpush.bf16.msra.mxu3 %v6976_v45 }
 0x7c2   :  { %v2662_v4 = vpop.f32.mrf.mxu3 }
 0x7c4   :  { %2992 = vmatpush.bf16.msra.mxu3 %v6982_v63  ;;  %v2602_v33 = vpop.f32.mrf.mxu2 }
 0x7c8   :  { %2993 = vmatpush.bf16.msra.mxu3 %v6985_v31 }
 0x7ca   :  { %v7038_v62 = vpop.f32.mrf.mxu3 }
 0x7cc   :  { %2994 = vmatpush.bf16.msra.mxu3 %v6988_v36  ;;  %v2604_v7 = vpop.f32.mrf.mxu2 }
 0x7cd   :  { %v2846_v60 = vpack.c.bf16 %v2604_v7, %v2602_v33 }
 0x7cf   :  { %5389 = vmatmul.msk.bf16.vlgmr.msra.gmra.mxu0 %vm1437_vm3, %v2846_v60 }
 0x7d2   :  { %v2688_v25 = vpop.f32.mrf.mxu3 }
 0x7d3   :  { %v2689_v44 = vadd.f32 %v2688_v25, %v2657_v12 }
 0x7d4   :  { %v2607_v19 = vpop.f32.mrf.mxu2 }
 0x7da   :  { %v2690_v13 = vpop.f32.mrf.mxu3 }
 0x7db   :  { %v2691_v41 = vadd.f32 %v2690_v13, %v7031_v39 }
 0x7dc   :  { %v2609_v45 = vpop.f32.mrf.mxu2 }
 0x7dd   :  { %v2847_v5 = vpack.c.bf16 %v2609_v45, %v2607_v19 }
 0x7df   :  { %5390 = vmatmul.msk.bf16.gmra.mxu0 %vm1437_vm3, %v2847_v5 }
 0x7e2   :  { %v2693_v63 = vpop.f32.mrf.mxu3 }
 0x7e3   :  { %v2694_v18 = vadd.f32 %v2693_v63, %v2662_v4 }
 0x7e4   :  { %v2612_v31 = vpop.f32.mrf.mxu2 }
 0x7ea   :  { %v2695_v40 = vpop.f32.mrf.mxu3 }
 0x7eb   :  { %v2696_v3 = vadd.f32 %v2695_v40, %v7038_v62 }
 0x7ec   :  { %v2614_v38 = vpop.f32.mrf.mxu2 }
 0x7ed   :  { %v2883_v32 = vpack.c.bf16 %v2614_v38, %v2612_v31 }
 0x7ef   :  { %5395 = vmatmul.msk.bf16.vlgmr.msrb.gmra.mxu3 %vm1437_vm3, %v2883_v32 }
 0x7f2   :  { %v2721_v36 = vpop.f32.mrf.mxu3 }
 0x7f3   :  { %v2731_v51 = vadd.f32 %v2721_v36, %v2689_v44 }
 0x7f4   :  { %v2617_v10 = vpop.f32.mrf.mxu2 }
 0x7fa   :  { %v2723_v50 = vpop.f32.mrf.mxu3 }
 0x7fb   :  { %v2732_v12 = vadd.f32 %v2723_v50, %v2691_v41 }
 0x7fc   :  { %v2619_v48 = vpop.f32.mrf.mxu2 }
 0x7fd   :  { %v2884_v43 = vpack.c.bf16 %v2619_v48, %v2617_v10 }
 0x7ff   :  { %5396 = vmatmul.msk.bf16.gmra.mxu3 %vm1437_vm3, %v2884_v43 }
 0x802   :  { %v2726_v8 = vpop.f32.mrf.mxu3 }
 0x803   :  { %v2733_v47 = vadd.f32 %v2726_v8, %v2694_v18 }
 0x804   :  { %v2622_v61 = vpop.f32.mrf.mxu2 }
 0x80a   :  { %v2728_v30 = vpop.f32.mrf.mxu3 }
 0x80b   :  { %v2734_v28 = vadd.f32 %v2728_v30, %v2696_v3 }
 0x80c   :  { %v2624_v49 = vpop.f32.mrf.mxu2  ;;  %v2795_v23 = vpop.f32.mrf.mxu0 }
 0x80d   :  { %v2920_v58 = vpack.c.bf16 %v2624_v49, %v2622_v61 }
 0x80f   :  { %5401 = vmatmul.msk.bf16.vlgmr.msrb.gmra.mxu0 %vm1437_vm3, %v2920_v58  ;;  %2995 = vmatmul.bf16.vlgmr.msra.gmra.mxu3 %v6002_v16 }
 0x812   :  { %v2758_v14 = vpop.f32.mrf.mxu3 }
 0x813   :  { %v2768_v29 = vadd.f32 %v2758_v14, %v2731_v51  ;;  %v6165_v51 = vld [vmem:[%s6296_s24] ss:$0 sm:$0xff]  ;;  %s7365_s24 = sld [smem:[#allocation14_spill]] }
 0x814   :  { %v2627_v20 = vpop.f32.mrf.mxu2  ;;  %v2797_v46 = vpop.f32.mrf.mxu0 }
 0x815   :  { %v2805_v26 = vadd.f32 %v2795_v23, %v2768_v29 }
 0x81a   :  { %v2760_v37 = vpop.f32.mrf.mxu3 }
 0x81b   :  { %v2769_v56 = vadd.f32 %v2760_v37, %v2732_v12  ;;  %v6006_v37 = vld [vmem:[%s6316_s20 + $0x8] sm:$0xff]  ;;  %v6015_v12 = vld [vmem:[%s6316_s20 + $0x50] sm:$0xff] }
 0x81c   :  { %v2629_v53 = vpop.f32.mrf.mxu2 }
 0x81d   :  { %v2921_v34 = vpack.c.bf16 %v2629_v53, %v2627_v20  ;;  %v2806_v60 = vadd.f32 %v2797_v46, %v2769_v56  ;;  %v6007_v53 = vld [vmem:[%s6316_s20 + $0x10] sm:$0xff]  ;;  %v6028_v56 = vld [vmem:[%s7355_s9 + $0x28] sm:$0xff] }
 0x81e   :  { %3465 = vmatpush.bf16.msra.mxu2 %v6028_v56 }
 0x81f   :  { %5402 = vmatmul.msk.bf16.gmra.mxu0 %vm1437_vm3, %v2921_v34  ;;  %3000 = vmatmul.bf16.gmra.mxu3 %v6003_v52  ;;  %v6008_v34 = vld [vmem:[%s6316_s20 + $0x18] sm:$0xff] }
 0x820   :  { %v6012_v52 = vld [vmem:[%s6316_s20 + $0x38] sm:$0xff] }
 0x822   :  { %v2763_v27 = vpop.f32.mrf.mxu3 }
 0x823   :  { %v2770_v35 = vadd.f32 %v2763_v27, %v2733_v47 }
 0x824   :  { %v2800_v21 = vpop.f32.mrf.mxu2 }
 0x825   :  { %v2807_v4 = vadd.f32 %v2800_v21, %v2770_v35  ;;  %v6004_v35 = vld [vmem:[%s7354_s5] sm:$0xff]  ;;  %v6014_v21 = vld [vmem:[%s6316_s20 + $0x48] sm:$0xff] }
 0x826   :  { %3030 = vmatpush.bf16.msra.mxu0 %v6004_v35 }
 0x82a   :  { %v2765_v15 = vpop.f32.mrf.mxu3 }
 0x82b   :  { %v2771_v33 = vadd.f32 %v2765_v15, %v2734_v28  ;;  %v6009_v15 = vld [vmem:[%s6316_s20 + $0x20] sm:$0xff]  ;;  %v6024_v28 = vld [vmem:[%s7355_s9 + $0x8] sm:$0xff] }
 0x82c   :  { %v2802_v7 = vpop.f32.mrf.mxu2 }
 0x82d   :  { %v2808_v19 = vadd.f32 %v2802_v7, %v2771_v33  ;;  %v6027_v33 = vld [vmem:[%s7355_s9 + $0x20] sm:$0xff] }
 0x82e   :  { %3466 = vmatpush.bf16.msra.mxu2 %v6027_v33 }
 0x832   :  { %v2832_v6 = vpop.f32.mrf.mxu3 }
 0x833   :  { %v2842_v63 = vadd.f32 %v2832_v6, %v2805_v26  ;;  %v6005_v26 = vld [vmem:[%s6316_s20] sm:$0xff] }
 0x83a   :  { %v2834_v0 = vpop.f32.mrf.mxu3 }
 0x83b   :  { %v2843_v45 = vadd.f32 %v2834_v0, %v2806_v60  ;;  %v6010_v0 = vld [vmem:[%s6316_s20 + $0x28] sm:$0xff] }
 0x842   :  { %v2837_v22 = vpop.f32.mrf.mxu3 }
 0x843   :  { %v2844_v25 = vadd.f32 %v2837_v22, %v2807_v4  ;;  %v6023_v4 = vld [vmem:[%s7355_s9] sm:$0xff] }
 0x84a   :  { %v2839_v11 = vpop.f32.mrf.mxu3 }
 0x84b   :  { %v2845_v18 = vadd.f32 %v2839_v11, %v2808_v19  ;;  %v6013_v11 = vld [vmem:[%s6316_s20 + $0x40] sm:$0xff] }
 0x84c   :  { %v2869_v54 = vpop.f32.mrf.mxu0 }
 0x84d   :  { %v2879_v62 = vadd.f32 %v2869_v54, %v2842_v63 }
 0x854   :  { %v2871_v55 = vpop.f32.mrf.mxu0 }
 0x855   :  { %v2880_v39 = vadd.f32 %v2871_v55, %v2843_v45  ;;  %v6011_v55 = vld [vmem:[%s6316_s20 + $0x30] sm:$0xff] }
 0x85c   :  { %v2874_v24 = vpop.f32.mrf.mxu0 }
 0x85d   :  { %v2881_v5 = vadd.f32 %v2874_v24, %v2844_v25  ;;  %v6016_v25 = vld [vmem:[%s6316_s20 + $0x58] sm:$0xff] }
 0x864   :  { %v2876_v17 = vpop.f32.mrf.mxu0 }
 0x865   :  { %v2882_v40 = vadd.f32 %v2876_v17, %v2845_v18  ;;  %v6025_v17 = vld [vmem:[%s7355_s9 + $0x10] sm:$0xff]  ;;  %v6030_v18 = vld [vmem:[%s7355_s9 + $0x38] sm:$0xff] }
 0x872   :  { %v2906_v2 = vpop.f32.mrf.mxu3 }
 0x873   :  { %v2916_v32 = vadd.f32 %v2906_v2, %v2879_v62  ;;  %v6026_v2 = vld [vmem:[%s7355_s9 + $0x18] sm:$0xff]  ;;  %v6018_v62 = vld [vmem:[%s6316_s20 + $0x68] sm:$0xff] }
 0x874   :  { %3389 = vmatpush.bf16.msrb.mxu0 %v6026_v2 }
 0x878   :  { %3390 = vmatpush.bf16.msrb.mxu0 %v6025_v17 }
 0x87a   :  { %v2908_v9 = vpop.f32.mrf.mxu3 }
 0x87b   :  { %v2917_v1 = vadd.f32 %v2908_v9, %v2880_v39  ;;  %v6029_v39 = vld [vmem:[%s7355_s9 + $0x30] sm:$0xff] }
 0x882   :  { %v2911_v57 = vpop.f32.mrf.mxu3 }
 0x883   :  { %v2918_v13 = vadd.f32 %v2911_v57, %v2881_v5  ;;  %v6017_v5 = vld [vmem:[%s6316_s20 + $0x60] sm:$0xff] }
 0x88a   :  { %v2913_v31 = vpop.f32.mrf.mxu3 }
 0x88b   :  { %v2919_v36 = vadd.f32 %v2913_v31, %v2882_v40 }
 0x88c   :  { %v2943_v42 = vpop.f32.mrf.mxu0 }
 0x88d   :  { %v2953_v48 = vadd.f32 %v2943_v42, %v2916_v32  ;;  %v6019_v32 = vld [vmem:[%s6316_s20 + $0x70] sm:$0xff] }
 0x88f   :  { %v2960_v30 = vadd.f32 %v6165_v51, %v2953_v48 }
 0x891   :  { %v2964_v20 = vmax.f32 %v2960_v30, 0.0  ;;  %v6021_v30 = vld [vmem:[%s6316_s20 + $0x80] sm:$0xff] }
 0x892   :  { %v2996_v27 = vpop.f32.mrf.mxu3 }
 0x894   :  { %v2945_v59 = vpop.f32.mrf.mxu0 }
 0x895   :  { %v2954_v10 = vadd.f32 %v2945_v59, %v2917_v1 }
 0x897   :  { %v2961_v47 = vadd.f32 %v6165_v51, %v2954_v10  ;;  %v6031_v10 = vld [vmem:[%s7355_s9 + $0x40] sm:$0xff] }
 0x899   :  { %v2965_v14 = vmax.f32 %v2961_v47, 0.0 }
 0x89a   :  { %v2998_v6 = vpop.f32.mrf.mxu3 }
 0x89b   :  { %v3115_v23 = vpack.c.bf16 %v2965_v14, %v2964_v20  ;;  %v3006_v46 = vpack.c.bf16 %v2998_v6, %v2996_v27 }
 0x89c   :  { %v2948_v44 = vpop.f32.mrf.mxu0 }
 0x89d   :  { %v2955_v38 = vadd.f32 %v2948_v44, %v2918_v13  ;;  %5415 = vmatmul.msk.bf16.vlgmr.msra.gmra.mxu0 %vm1437_vm3, %v3006_v46  ;;  %v6036_v46 = vld [vmem:[%s7355_s9 + $0x68] sm:$0xff] }
 0x89e   :  { %3426 = vmatpush.bf16.msra.mxu0 %v6024_v28 }
 0x89f   :  { %v2962_v43 = vadd.f32 %v6165_v51, %v2955_v38 }
 0x8a1   :  { %v2966_v49 = vmax.f32 %v2962_v43, 0.0  ;;  %v6020_v43 = vld [vmem:[%s6316_s20 + $0x78] sm:$0xff] }
 0x8a2   :  { %v3001_v16 = vpop.f32.mrf.mxu3  ;;  %3427 = vmatpush.bf16.msra.mxu0 %v6023_v4 }
 0x8a4   :  { %v2950_v50 = vpop.f32.mrf.mxu0 }
 0x8a5   :  { %v2956_v8 = vadd.f32 %v2950_v50, %v2919_v36 }
 0x8a7   :  { %v2963_v61 = vadd.f32 %v6165_v51, %v2956_v8  ;;  %v6032_v51 = vld [vmem:[%s7355_s9 + $0x48] sm:$0xff] }
 0x8a8   :  { %3551 = vmatpush.bf16.msrb.mxu2 %v6032_v51 }
 0x8a9   :  { %v2967_v58 = vmax.f32 %v2963_v61, 0.0 }
 0x8aa   :  { %v3003_v54 = vpop.f32.mrf.mxu3 }
 0x8ab   :  { %v3116_v29 = vpack.c.bf16 %v2967_v58, %v2966_v49  ;;  %v3007_v22 = vpack.c.bf16 %v3003_v54, %v3001_v16  ;;  %v6034_v58 = vld [vmem:[%s7355_s9 + $0x58] sm:$0xff]  ;;  %v6035_v16 = vld [vmem:[%s7355_s9 + $0x60] sm:$0xff] }
 0x8ac   :  { %3552 = vmatpush.bf16.msrb.mxu2 %v6031_v10 }
 0x8ad   :  { %3268 = vmatpush.bf16.msrb.mxu3 %v3116_v29  ;;  %5416 = vmatmul.msk.bf16.gmra.mxu0 %vm1437_vm3, %v3007_v22  ;;  %v6033_v29 = vld [vmem:[%s7355_s9 + $0x50] sm:$0xff] }
 0x8b1   :  { %3269 = vmatpush.bf16.msrb.mxu3 %v3115_v23 }
 0x8b4   :  { %5489 = vmatmul.msk.bf16.vlgmr.msrb.gmra.mxu3 %vm3207_vm4, %v6005_v26  ;;  %v6022_v26 = vld [vmem:[%s6316_s20 + $0x88] sm:$0xff] }
 0x8c4   :  { %5490 = vmatmul.msk.bf16.gmra.mxu3 %vm3207_vm4, %v6006_v37 }
 0x8d4   :  { %5491 = vmatmul.msk.bf16.gmra.mxu3 %vm3207_vm4, %v6007_v53 }
 0x8e4   :  { %5492 = vmatmul.msk.bf16.gmra.mxu3 %vm3207_vm4, %v6008_v34 }
 0x8f4   :  { %5493 = vmatmul.msk.bf16.gmra.mxu3 %vm3207_vm4, %v6009_v15 }
 0x904   :  { %5494 = vmatmul.msk.bf16.gmra.mxu3 %vm3207_vm4, %v6010_v0 }
 0x914   :  { %5495 = vmatmul.msk.bf16.gmra.mxu3 %vm3207_vm4, %v6011_v55 }
 0x91a   :  { %v7109_v14 = vpop.f32.mrf.mxu0 }
 0x922   :  { %v7114_v37 = vpop.f32.mrf.mxu0 }
 0x924   :  { %5496 = vmatmul.msk.bf16.gmra.mxu3 %vm3207_vm4, %v6012_v52 }
 0x92a   :  { %v7117_v34 = vpop.f32.mrf.mxu0 }
 0x932   :  { %v7120_v15 = vpop.f32.mrf.mxu0 }
 0x934   :  { %5497 = vmatmul.msk.bf16.gmra.mxu3 %vm3207_vm4, %v6013_v11 }
 0x937   :  { %v3271_v24 = vpop.f32.mrf.mxu3 }
 0x93f   :  { %v3273_v9 = vpop.f32.mrf.mxu3 }
 0x940   :  { %v3361_v42 = vpack.c.bf16 %v3273_v9, %v3271_v24 }
 0x944   :  { %5498 = vmatmul.msk.bf16.gmra.mxu3 %vm3207_vm4, %v6014_v21  ;;  %v6037_v21 = vld [vmem:[%s7355_s9 + $0x70] sm:$0xff] }
 0x947   :  { %v3276_v41 = vpop.f32.mrf.mxu3 }
 0x94f   :  { %v3278_v59 = vpop.f32.mrf.mxu3 }
 0x950   :  { %v3362_v3 = vpack.c.bf16 %v3278_v59, %v3276_v41 }
 0x954   :  { %5499 = vmatmul.msk.bf16.gmra.mxu3 %vm3207_vm4, %v6015_v12 }
 0x957   :  { %v3281_v57 = vpop.f32.mrf.mxu3 }
 0x95f   :  { %v3283_v7 = vpop.f32.mrf.mxu3 }
 0x960   :  { %v3363_v60 = vpack.c.bf16 %v3283_v7, %v3281_v57 }
 0x962   :  { %5515 = vmatmul.msk.bf16.vlgmr.msrb.gmra.mxu0 %vm3207_vm4, %v3363_v60 }
 0x963   :  { %3508 = vmatpush.bf16.msrb.mxu0 %v6030_v18  ;;  %v6040_v18 = vld [vmem:[%s7355_s9 + $0x88] sm:$0xff] }
 0x964   :  { %5500 = vmatmul.msk.bf16.gmra.mxu3 %vm3207_vm4, %v6016_v25 }
 0x967   :  { %v3286_v44 = vpop.f32.mrf.mxu3  ;;  %3509 = vmatpush.bf16.msrb.mxu0 %v6029_v39  ;;  %v6039_v39 = vld [vmem:[%s7355_s9 + $0x80] sm:$0xff] }
 0x96f   :  { %v3288_v19 = vpop.f32.mrf.mxu3 }
 0x970   :  { %v3364_v45 = vpack.c.bf16 %v3288_v19, %v3286_v44 }
 0x972   :  { %5516 = vmatmul.msk.bf16.gmra.mxu0 %vm3207_vm4, %v3364_v45 }
 0x974   :  { %5501 = vmatmul.msk.bf16.gmra.mxu3 %vm3207_vm4, %v6017_v5 }
 0x977   :  { %v3291_v63 = vpop.f32.mrf.mxu3 }
 0x97f   :  { %v3293_v13 = vpop.f32.mrf.mxu3 }
 0x980   :  { %v3439_v31 = vpack.c.bf16 %v3293_v13, %v3291_v63 }
 0x982   :  { %5525 = vmatmul.msk.bf16.vlgmr.msra.gmra.mxu0 %vm3207_vm4, %v3361_v42  ;;  %5535 = vmatmul.msk.bf16.vlgmr.msra.gmra.mxu2 %vm3207_vm4, %v3439_v31  ;;  %v6038_v42 = vld [vmem:[%s7355_s9 + $0x78] sm:$0xff] }
 0x983   :  { %3594 = vmatpush.bf16.msra.mxu0 %v6034_v58  ;;  %3637 = vmatpush.bf16.msra.mxu2 %v6036_v46 }
 0x984   :  { %5502 = vmatmul.msk.bf16.gmra.mxu3 %vm3207_vm4, %v6018_v62 }
 0x987   :  { %v3296_v40 = vpop.f32.mrf.mxu3  ;;  %3595 = vmatpush.bf16.msra.mxu0 %v6033_v29  ;;  %3638 = vmatpush.bf16.msra.mxu2 %v6035_v16 }
 0x98f   :  { %v3298_v1 = vpop.f32.mrf.mxu3 }
 0x990   :  { %v3440_v38 = vpack.c.bf16 %v3298_v1, %v3296_v40 }
 0x992   :  { %5526 = vmatmul.msk.bf16.gmra.mxu0 %vm3207_vm4, %v3362_v3  ;;  %5536 = vmatmul.msk.bf16.gmra.mxu2 %vm3207_vm4, %v3440_v38 }
 0x994   :  { %5503 = vmatmul.msk.bf16.gmra.mxu3 %vm3207_vm4, %v6019_v32 }
 0x997   :  { %v3301_v36 = vpop.f32.mrf.mxu3 }
 0x99f   :  { %v3303_v50 = vpop.f32.mrf.mxu3 }
 0x9a0   :  { %v3482_v48 = vpack.c.bf16 %v3303_v50, %v3301_v36 }
 0x9a2   :  { %5545 = vmatmul.msk.bf16.vlgmr.msrb.gmra.mxu0 %vm3207_vm4, %v3482_v48 }
 0x9a3   :  { %3680 = vmatpush.bf16.msrb.mxu0 %v6038_v42  ;;  %v6167_v42 = vld [vmem:[%s7357_s17] ss:$0 sm:$0xff] }
 0x9a4   :  { %5504 = vmatmul.msk.bf16.gmra.mxu3 %vm3207_vm4, %v6020_v43 }
 0x9a7   :  { %v3306_v8 = vpop.f32.mrf.mxu3  ;;  %3681 = vmatpush.bf16.msrb.mxu0 %v6037_v21 }
 0x9af   :  { %v3308_v47 = vpop.f32.mrf.mxu3 }
 0x9b0   :  { %v3483_v61 = vpack.c.bf16 %v3308_v47, %v3306_v8 }
 0x9b2   :  { %5546 = vmatmul.msk.bf16.gmra.mxu0 %vm3207_vm4, %v3483_v61 }
 0x9b4   :  { %5505 = vmatmul.msk.bf16.gmra.mxu3 %vm3207_vm4, %v6021_v30 }
 0x9b7   :  { %v3311_v49 = vpop.f32.mrf.mxu3 }
 0x9bf   :  { %v3313_v20 = vpop.f32.mrf.mxu3 }
 0x9c0   :  { %v3525_v23 = vpack.c.bf16 %v3313_v20, %v3311_v49 }
 0x9c2   :  { %5555 = vmatmul.msk.bf16.vlgmr.msrb.gmra.mxu2 %vm3207_vm4, %v3525_v23 }
 0x9c3   :  { %3723 = vmatpush.bf16.msrb.mxu2 %v6040_v18 }
 0x9c4   :  { %5506 = vmatmul.msk.bf16.gmra.mxu3 %vm3207_vm4, %v6022_v26 }
 0x9c7   :  { %v3316_v53 = vpop.f32.mrf.mxu3  ;;  %3724 = vmatpush.bf16.msrb.mxu2 %v6039_v39 }
 0x9cf   :  { %v3318_v27 = vpop.f32.mrf.mxu3 }
 0x9d0   :  { %v3526_v35 = vpack.c.bf16 %v3318_v27, %v3316_v53 }
 0x9d2   :  { %5556 = vmatmul.msk.bf16.gmra.mxu2 %vm3207_vm4, %v3526_v35 }
 0x9d7   :  { %v3321_v6 = vpop.f32.mrf.mxu3 }
 0x9df   :  { %v3323_v0 = vpop.f32.mrf.mxu3  ;;  %v3392_v54 = vpop.f32.mrf.mxu0 }
 0x9e0   :  { %v3568_v22 = vpack.c.bf16 %v3323_v0, %v3321_v6 }
 0x9e2   :  { %5565 = vmatmul.msk.bf16.vlgmr.msra.gmra.mxu0 %vm3207_vm4, %v3568_v22 }
 0x9e7   :  { %v3326_v55 = vpop.f32.mrf.mxu3  ;;  %v7125_v52 = vpop.f32.mrf.mxu0 }
 0x9ef   :  { %v3328_v11 = vpop.f32.mrf.mxu3  ;;  %v3397_v24 = vpop.f32.mrf.mxu0 }
 0x9f0   :  { %v3569_v2 = vpack.c.bf16 %v3328_v11, %v3326_v55 }
 0x9f2   :  { %5566 = vmatmul.msk.bf16.gmra.mxu0 %vm3207_vm4, %v3569_v2  ;;  %v6166_v2 = vld [vmem:[%s7356_s13] ss:$0 sm:$0xff] }
 0x9f7   :  { %v3331_v17 = vpop.f32.mrf.mxu3  ;;  %v7128_v9 = vpop.f32.mrf.mxu0 }
 0x9ff   :  { %v3333_v41 = vpop.f32.mrf.mxu3  ;;  %v3429_v59 = vpop.f32.mrf.mxu0 }
 0xa00   :  { %v3611_v3 = vpack.c.bf16 %v3333_v41, %v3331_v17  ;;  %v3430_v12 = vadd.f32 %v3429_v59, %v3392_v54 }
 0xa02   :  { %5575 = vmatmul.msk.bf16.vlgmr.msra.gmra.mxu2 %vm3207_vm4, %v3611_v3  ;;  %v3033_v3 = vadd.f32 %v6166_v2, %v7109_v14 }
 0xa05   :  { %v3468_v57 = vpop.f32.mrf.mxu2 }
 0xa06   :  { %v3478_v28 = vadd.f32 %v3468_v57, %v3430_v12 }
 0xa07   :  { %v3336_v56 = vpop.f32.mrf.mxu3  ;;  %v7133_v4 = vpop.f32.mrf.mxu0 }
 0xa0d   :  { %v7135_v33 = vpop.f32.mrf.mxu2 }
 0xa0f   :  { %v3338_v7 = vpop.f32.mrf.mxu3  ;;  %v3434_v60 = vpop.f32.mrf.mxu0 }
 0xa10   :  { %v3612_v25 = vpack.c.bf16 %v3338_v7, %v3336_v56  ;;  %v3435_v44 = vadd.f32 %v3434_v60, %v3397_v24 }
 0xa12   :  { %5576 = vmatmul.msk.bf16.gmra.mxu2 %vm3207_vm4, %v3612_v25 }
 0xa15   :  { %v3473_v19 = vpop.f32.mrf.mxu2 }
 0xa16   :  { %v3480_v45 = vadd.f32 %v3473_v19, %v3435_v44 }
 0xa17   :  { %v3341_v5 = vpop.f32.mrf.mxu3  ;;  %v3436_v63 = vpop.f32.mrf.mxu0 }
 0xa18   :  { %v3437_v25 = vadd.f32 %v3436_v63, %v7128_v9 }
 0xa1d   :  { %v3475_v48 = vpop.f32.mrf.mxu2 }
 0xa1f   :  { %v3343_v13 = vpop.f32.mrf.mxu3  ;;  %v3511_v31 = vpop.f32.mrf.mxu0 }
 0xa20   :  { %v3654_v62 = vpack.c.bf16 %v3343_v13, %v3341_v5  ;;  %v3521_v40 = vadd.f32 %v3511_v31, %v3478_v28  ;;  %v3432_v28 = vadd.f32 %v7133_v4, %v7125_v52  ;;  %v3038_v52 = vadd.f32 %v6166_v2, %v7117_v34 }
 0xa22   :  { %5585 = vmatmul.msk.bf16.vlgmr.msrb.gmra.mxu0 %vm3207_vm4, %v3654_v62  ;;  %v3479_v7 = vadd.f32 %v7135_v33, %v3432_v28 }
 0xa27   :  { %v3346_v1 = vpop.f32.mrf.mxu3  ;;  %v3513_v38 = vpop.f32.mrf.mxu0 }
 0xa28   :  { %v3522_v44 = vadd.f32 %v3513_v38, %v3479_v7 }
 0xa2f   :  { %v3348_v32 = vpop.f32.mrf.mxu3  ;;  %v3516_v36 = vpop.f32.mrf.mxu0 }
 0xa30   :  { %v3655_v51 = vpack.c.bf16 %v3348_v32, %v3346_v1  ;;  %v3523_v10 = vadd.f32 %v3516_v36, %v3480_v45  ;;  %v3481_v45 = vadd.f32 %v3475_v48, %v3437_v25  ;;  %v6060_v25 = vld [vmem:[%s7359_s25 + $0x78] sm:$0xff] }
 0xa32   :  { %5586 = vmatmul.msk.bf16.gmra.mxu0 %vm3207_vm4, %v3655_v51 }
 0xa37   :  { %v3351_v50 = vpop.f32.mrf.mxu3  ;;  %v3518_v26 = vpop.f32.mrf.mxu0 }
 0xa38   :  { %v3524_v39 = vadd.f32 %v3518_v26, %v3481_v45  ;;  %v6041_v26 = vld [vmem:[%s7358_s21] sm:$0xff] }
 0xa3f   :  { %v3353_v43 = vpop.f32.mrf.mxu3 }
 0xa40   :  { %v3697_v8 = vpack.c.bf16 %v3353_v43, %v3351_v50  ;;  %v3035_v43 = vadd.f32 %v6166_v2, %v7114_v37  ;;  %v6042_v37 = vld [vmem:[%s7358_s21 + $0x8] sm:$0xff] }
 0xa42   :  { %5595 = vmatmul.msk.bf16.vlgmr.msrb.gmra.mxu2 %vm3207_vm4, %v3697_v8  ;;  %v3040_v8 = vadd.f32 %v6166_v2, %v7120_v15  ;;  %v6043_v15 = vld [vmem:[%s7358_s21 + $0x10] sm:$0xff]  ;;  %v6049_v2 = vld [vmem:[%s7359_s25 + $0x20] sm:$0xff] }
 0xa45   :  { %v3554_v47 = vpop.f32.mrf.mxu2 }
 0xa46   :  { %v3564_v61 = vadd.f32 %v3554_v47, %v3521_v40 }
 0xa47   :  { %v3356_v30 = vpop.f32.mrf.mxu3 }
 0xa4d   :  { %v3556_v49 = vpop.f32.mrf.mxu2 }
 0xa4e   :  { %v3565_v5 = vadd.f32 %v3556_v49, %v3522_v44  ;;  %v6053_v44 = vld [vmem:[%s7359_s25 + $0x40] sm:$0xff] }
 0xa4f   :  { %v3358_v58 = vpop.f32.mrf.mxu3 }
 0xa50   :  { %v3698_v29 = vpack.c.bf16 %v3358_v58, %v3356_v30 }
 0xa52   :  { %5596 = vmatmul.msk.bf16.gmra.mxu2 %vm3207_vm4, %v3698_v29 }
 0xa55   :  { %v3559_v20 = vpop.f32.mrf.mxu2 }
 0xa56   :  { %v3566_v23 = vadd.f32 %v3559_v20, %v3523_v10 }
 0xa5d   :  { %v3561_v27 = vpop.f32.mrf.mxu2 }
 0xa5e   :  { %v3567_v62 = vadd.f32 %v3561_v27, %v3524_v39  ;;  %v3763_v27 = vld [vmem:[%s7358_s21 + $0x20] sm:$0xf] }
 0xa5f   :  { %v3597_v53 = vpop.f32.mrf.mxu0 }
 0xa60   :  { %v3607_v11 = vadd.f32 %v3597_v53, %v3564_v61  ;;  %v6044_v53 = vld [vmem:[%s7358_s21 + $0x18] sm:$0xff] }
 0xa67   :  { %v3599_v35 = vpop.f32.mrf.mxu0 }
 0xa68   :  { %v3608_v13 = vadd.f32 %v3599_v35, %v3565_v5  ;;  %v3820_v35 = vunpack.c.l.b16 %v3763_v27  ;;  %v6058_v5 = vld [vmem:[%s7359_s25 + $0x68] sm:$0xff]  ;;  %v6168_v27 = vld [vmem:[%s7361_s3] ss:$0 sm:$0xff] }
 0xa6f   :  { %v3602_v46 = vpop.f32.mrf.mxu0 }
 0xa70   :  { %v3609_v19 = vadd.f32 %v3602_v46, %v3566_v23  ;;  %v6048_v46 = vld [vmem:[%s7359_s25 + $0x18] sm:$0xff] }
 0xa71   :  { %3897 = vmatpush.bf16.msra.mxu2 %v6048_v46 }
 0xa77   :  { %v3604_v0 = vpop.f32.mrf.mxu0 }
 0xa78   :  { %v3610_v4 = vadd.f32 %v3604_v0, %v3567_v62  ;;  %v6046_v0 = vld [vmem:[%s7359_s25 + $0x8] sm:$0xff] }
 0xa85   :  { %v3640_v6 = vpop.f32.mrf.mxu2 }
 0xa86   :  { %v3650_v24 = vadd.f32 %v3640_v6, %v3607_v11  ;;  %v3825_v6 = vpack.c.b16 %v3820_v35, %v3820_v35  ;;  %v6050_v11 = vld [vmem:[%s7359_s25 + $0x28] sm:$0xff] }
 0xa8d   :  { %v3642_v16 = vpop.f32.mrf.mxu2 }
 0xa8e   :  { %v3651_v40 = vadd.f32 %v3642_v16, %v3608_v13  ;;  %v6047_v16 = vld [vmem:[%s7359_s25 + $0x10] sm:$0xff] }
 0xa8f   :  { %3898 = vmatpush.bf16.msra.mxu2 %v6047_v16 }
 0xa93   :  { %3925 = vmatpush.bf16.msrb.mxu2 %v6046_v0 }
 0xa95   :  { %v3645_v54 = vpop.f32.mrf.mxu2 }
 0xa96   :  { %v3652_v18 = vadd.f32 %v3645_v54, %v3609_v19  ;;  %v6045_v54 = vld [vmem:[%s7359_s25] sm:$0xff]  ;;  %v6059_v19 = vld [vmem:[%s7359_s25 + $0x70] sm:$0xff] }
 0xa97   :  { %3926 = vmatpush.bf16.msrb.mxu2 %v6045_v54 }
 0xa9d   :  { %v3647_v55 = vpop.f32.mrf.mxu2 }
 0xa9e   :  { %v3653_v51 = vadd.f32 %v3647_v55, %v3610_v4 }
 0xa9f   :  { %v3683_v22 = vpop.f32.mrf.mxu0 }
 0xaa0   :  { %v3693_v17 = vadd.f32 %v3683_v22, %v3650_v24 }
 0xaa7   :  { %v3685_v21 = vpop.f32.mrf.mxu0 }
 0xaa8   :  { %v3694_v32 = vadd.f32 %v3685_v21, %v3651_v40  ;;  %v6062_v40 = vld [vmem:[%s7359_s25 + $0x88] sm:$0xff] }
 0xaaf   :  { %v3688_v60 = vpop.f32.mrf.mxu0 }
 0xab0   :  { %v3695_v31 = vadd.f32 %v3688_v60, %v3652_v18 }
 0xab7   :  { %v3690_v36 = vpop.f32.mrf.mxu0 }
 0xab8   :  { %v3696_v38 = vadd.f32 %v3690_v36, %v3653_v51 }
 0xac5   :  { %v3726_v41 = vpop.f32.mrf.mxu2 }
 0xac6   :  { %v3736_v59 = vadd.f32 %v3726_v41, %v3693_v17 }
 0xac8   :  { %v3743_v12 = vadd.f32 %v6167_v42, %v3736_v59  ;;  %v6056_v59 = vld [vmem:[%s7359_s25 + $0x58] sm:$0xff] }
 0xaca   :  { %v3747_v57 = vadd.f32 %v3743_v12, %v3033_v3  ;;  %v6051_v3 = vld [vmem:[%s7359_s25 + $0x30] sm:$0xff] }
 0xacb   :  { %v6055_v12 = vld [vmem:[%s7359_s25 + $0x50] sm:$0xff] }
 0xacc   :  { %v3751_v20 = vmax.f32 %v3747_v57, 0.0 }
 0xacd   :  { %v3728_v56 = vpop.f32.mrf.mxu2 }
 0xace   :  { %v3737_v9 = vadd.f32 %v3728_v56, %v3694_v32  ;;  %v6054_v56 = vld [vmem:[%s7359_s25 + $0x48] sm:$0xff] }
 0xad0   :  { %v3744_v50 = vadd.f32 %v6167_v42, %v3737_v9 }
 0xad2   :  { %v3748_v61 = vadd.f32 %v3744_v50, %v3035_v43 }
 0xad4   :  { %v3752_v29 = vmax.f32 %v3748_v61, 0.0 }
 0xad5   :  { %v3731_v14 = vpop.f32.mrf.mxu2 }
 0xad6   :  { %v3738_v1 = vadd.f32 %v3731_v14, %v3695_v31  ;;  %v3801_v23 = vpack.c.bf16 %v3752_v29, %v3751_v20  ;;  %v6057_v31 = vld [vmem:[%s7359_s25 + $0x60] sm:$0xff] }
 0xad8   :  { %v3745_v33 = vadd.f32 %v6167_v42, %v3738_v1 }
 0xada   :  { %v3749_v63 = vadd.f32 %v3745_v33, %v3038_v52  ;;  %v6061_v52 = vld [vmem:[%s7359_s25 + $0x80] sm:$0xff] }
 0xadc   :  { %v3753_v30 = vmax.f32 %v3749_v63, 0.0 }
 0xadd   :  { %v3733_v10 = vpop.f32.mrf.mxu2 }
 0xade   :  { %v3739_v48 = vadd.f32 %v3733_v10, %v3696_v38 }
 0xae0   :  { %v3746_v47 = vadd.f32 %v6167_v42, %v3739_v48  ;;  %v6052_v42 = vld [vmem:[%s7359_s25 + $0x38] sm:$0xff] }
 0xae2   :  { %v3750_v34 = vadd.f32 %v3746_v47, %v3040_v8 }
 0xae4   :  { %v3754_v49 = vmax.f32 %v3750_v34, 0.0 }
 0xae6   :  { %v3802_v58 = vpack.c.bf16 %v3754_v49, %v3753_v30  ;;  %v4147_v30 = vld [vmem:[%s7360_s29] sm:$0xf] }
 0xae8   :  { %3847 = vmatpush.bf16.msra.mxu0 %v3802_v58  ;;  %4162 = vmatpush.bf16.msra.mxu3 %v3802_v58 }
 0xaec   :  { %3848 = vmatpush.bf16.msra.mxu0 %v3801_v23  ;;  %4163 = vmatpush.bf16.msra.mxu3 %v3801_v23 }
 0xaef   :  { %5613 = vmatmul.msk.bf16.vlgmr.msra.gmra.mxu0 %vm3207_vm4, %v6041_v26  ;;  %5699 = vmatmul.msk.bf16.vlgmr.msra.gmra.mxu3 %vm3207_vm4, %v4147_v30  ;;  %v6095_v30 = vld [vmem:[%s7363_s14 + $0xd0] sm:$0xff] }
 0xaf0   :  { %4044 = vmatpush.bf16.msrb.mxu0 %v6056_v59  ;;  %v6064_v59 = vld [vmem:[%s7364_s19 + $0x8] sm:$0xff] }
 0xaf4   :  { %4045 = vmatpush.bf16.msrb.mxu0 %v6055_v12 }
 0xaf8   :  { %4104 = vmatpush.bf16.msra.mxu0 %v6060_v25  ;;  %v6075_v25 = vld [vmem:[%s7363_s14 + $0x30] sm:$0xff] }
 0xafc   :  { %4105 = vmatpush.bf16.msra.mxu0 %v6059_v19  ;;  %v6074_v19 = vld [vmem:[%s7363_s14 + $0x28] sm:$0xff] }
 0xaff   :  { %5614 = vmatmul.msk.bf16.gmra.mxu0 %vm3207_vm4, %v6042_v37 }
 0xb0f   :  { %5615 = vmatmul.msk.bf16.gmra.mxu0 %vm3207_vm4, %v6043_v15 }
 0xb1f   :  { %5616 = vmatmul.msk.bf16.gmra.mxu0 %vm3207_vm4, %v6044_v53 }
 0xb2f   :  { %5617 = vmatmul.msk.bf16.gmra.mxu0 %vm3207_vm4, %v3825_v6 }
 0xb6c   :  { %v3850_v22 = vpop.f32.mrf.mxu0 }
 0xb6d   :  { %v3874_v41 = vpack.c.bf16 %v3850_v22, %v3850_v22 }
 0xb72   :  { %v4165_v12 = vpop.f32.mrf.mxu3 }
 0xb74   :  { %v3852_v55 = vpop.f32.mrf.mxu0 }
 0xb75   :  { %v3875_v24 = vpack.c.bf16 %v3852_v55, %v3852_v55  ;;  %v6065_v55 = vld [vmem:[%s7362_s8] sm:$0xff] }
 0xb77   :  { %5626 = vmatmul.msk.bf16.vlgmr.msra.gmra.mxu2 %vm3207_vm4, %v3875_v24  ;;  %v6067_v24 = vld [vmem:[%s7362_s8 + $0x10] sm:$0xff] }
 0xb78   :  { %3954 = vmatpush.bf16.msra.mxu2 %v6050_v11  ;;  %v6066_v11 = vld [vmem:[%s7362_s8 + $0x8] sm:$0xff] }
 0xb7c   :  { %v3855_v17 = vpop.f32.mrf.mxu0  ;;  %3955 = vmatpush.bf16.msra.mxu2 %v6049_v2  ;;  %v6076_v2 = vld [vmem:[%s7363_s14 + $0x38] sm:$0xff] }
 0xb7d   :  { %v3932_v28 = vpack.c.bf16 %v3855_v17, %v3855_v17  ;;  %4393 = vmatpush.bf16.msrb.mxu3 %v6076_v2  ;;  %v6068_v17 = vld [vmem:[%s7362_s8 + $0x18] sm:$0xff] }
 0xb81   :  { %4394 = vmatpush.bf16.msrb.mxu3 %v6075_v25 }
 0xb84   :  { %v3857_v21 = vpop.f32.mrf.mxu0 }
 0xb85   :  { %v3962_v39 = vpack.c.bf16 %v3857_v21, %v3857_v21  ;;  %4395 = vmatpush.bf16.msrb.mxu3 %v6074_v19  ;;  %v4773_v19 = vld [vmem:[%s6381_s27 + $0x38] sm:$0xff] }
 0xb87   :  { %5635 = vmatmul.msk.bf16.vlgmr.msrb.gmra.mxu2 %vm3207_vm4, %v3874_v41 }
 0xb88   :  { %3984 = vmatpush.bf16.msrb.mxu2 %v6052_v42  ;;  %v4209_v42 = vld [vmem:[%s7362_s8 + $0x20] sm:$0xf] }
 0xb89   :  { %v4301_v21 = vunpack.c.l.b16 %v4209_v42 }
 0xb8b   :  { %v4306_v41 = vpack.c.b16 %v4301_v21, %v4301_v21 }
 0xb8c   :  { %3985 = vmatpush.bf16.msrb.mxu2 %v6051_v3  ;;  %v3860_v57 = vpop.f32.mrf.mxu0  ;;  %v6063_v3 = vld [vmem:[%s7364_s19] sm:$0xff] }
 0xb8d   :  { %v3992_v62 = vpack.c.bf16 %v3860_v57, %v3860_v57  ;;  %v4169_v57 = vpack.c.bf16 %v4165_v12, %v4165_v12 }
 0xb94   :  { %v3862_v7 = vpop.f32.mrf.mxu0 }
 0xb95   :  { %v4022_v60 = vpack.c.bf16 %v3862_v7, %v3862_v7  ;;  %v4167_v7 = vpop.f32.mrf.mxu3 }
 0xb97   :  { %5644 = vmatmul.msk.bf16.vlgmr.msra.gmra.mxu2 %vm3207_vm4, %v3932_v28  ;;  %5671 = vmatmul.msk.bf16.vlgmr.msrb.gmra.mxu0 %vm3207_vm4, %v4022_v60  ;;  %v6072_v28 = vld [vmem:[%s7363_s14 + $0x18] sm:$0xff]  ;;  %v6070_v60 = vld [vmem:[%s7363_s14 + $0x8] sm:$0xff] }
 0xb98   :  { %4014 = vmatpush.bf16.msra.mxu2 %v6054_v56  ;;  %4194 = vmatpush.bf16.msrb.mxu0 %v6064_v59  ;;  %v6071_v56 = vld [vmem:[%s7363_s14 + $0x10] sm:$0xff] }
 0xb9c   :  { %4015 = vmatpush.bf16.msra.mxu2 %v6053_v44  ;;  %v3865_v45 = vpop.f32.mrf.mxu0  ;;  %4195 = vmatpush.bf16.msrb.mxu0 %v6063_v3  ;;  %v6069_v44 = vld [vmem:[%s7363_s14] sm:$0xff] }
 0xb9d   :  { %v4052_v4 = vpack.c.bf16 %v3865_v45, %v3865_v45  ;;  %v6073_v45 = vld [vmem:[%s7363_s14 + $0x20] sm:$0xff] }
 0xb9e   :  { %4396 = vmatpush.bf16.msrb.mxu3 %v6073_v45  ;;  %v4772_v45 = vld [vmem:[%s6381_s27 + $0x30] sm:$0xff] }
 0xba4   :  { %v3867_v18 = vpop.f32.mrf.mxu0 }
 0xba5   :  { %v4082_v13 = vpack.c.bf16 %v3867_v18, %v3867_v18  ;;  %v6084_v18 = vld [vmem:[%s7363_s14 + $0x78] sm:$0xff] }
 0xba7   :  { %5653 = vmatmul.msk.bf16.vlgmr.msrb.gmra.mxu2 %vm3207_vm4, %v3962_v39  ;;  %5689 = vmatmul.msk.bf16.vlgmr.msra.gmra.mxu0 %vm3207_vm4, %v4082_v13  ;;  %v6079_v39 = vld [vmem:[%s7363_s14 + $0x50] sm:$0xff] }
 0xba8   :  { %4074 = vmatpush.bf16.msrb.mxu2 %v6058_v5  ;;  %4433 = vmatpush.bf16.msra.mxu0 %v6072_v28  ;;  %v6080_v5 = vld [vmem:[%s7363_s14 + $0x58] sm:$0xff]  ;;  %v6083_v13 = vld [vmem:[%s7363_s14 + $0x70] sm:$0xff] }
 0xba9   :  { %4474 = vmatpush.bf16.msra.mxu3 %v6080_v5  ;;  %v4771_v5 = vld [vmem:[%s6381_s27 + $0x28] sm:$0xff] }
 0xbac   :  { %4075 = vmatpush.bf16.msrb.mxu2 %v6057_v31  ;;  %v3870_v14 = vpop.f32.mrf.mxu0  ;;  %4434 = vmatpush.bf16.msra.mxu0 %v6071_v56  ;;  %v6078_v31 = vld [vmem:[%s7363_s14 + $0x48] sm:$0xff] }
 0xbad   :  { %v4112_v32 = vpack.c.bf16 %v3870_v14, %v3870_v14  ;;  %4475 = vmatpush.bf16.msra.mxu3 %v6079_v39  ;;  %v6082_v14 = vld [vmem:[%s7363_s14 + $0x68] sm:$0xff]  ;;  %v4770_v39 = vld [vmem:[%s6381_s27 + $0x20] sm:$0xff] }
 0xbb0   :  { %4435 = vmatpush.bf16.msra.mxu0 %v6070_v60 }
 0xbb1   :  { %4476 = vmatpush.bf16.msra.mxu3 %v6078_v31 }
 0xbb4   :  { %v3872_v1 = vpop.f32.mrf.mxu0  ;;  %4436 = vmatpush.bf16.msra.mxu0 %v6069_v44 }
 0xbb7   :  { %5662 = vmatmul.msk.bf16.vlgmr.msra.gmra.mxu2 %vm3207_vm4, %v3992_v62  ;;  %5708 = vmatmul.msk.bf16.vlgmr.msrb.gmra.mxu0 %vm3207_vm4, %v4169_v57  ;;  %v6077_v62 = vld [vmem:[%s7363_s14 + $0x40] sm:$0xff] }
 0xbb8   :  { %4134 = vmatpush.bf16.msra.mxu2 %v6062_v40  ;;  %4516 = vmatpush.bf16.msrb.mxu0 %v6084_v18  ;;  %v6081_v40 = vld [vmem:[%s7363_s14 + $0x60] sm:$0xff] }
 0xbb9   :  { %4477 = vmatpush.bf16.msra.mxu3 %v6077_v62 }
 0xbbc   :  { %4135 = vmatpush.bf16.msra.mxu2 %v6061_v52  ;;  %4517 = vmatpush.bf16.msrb.mxu0 %v6083_v13  ;;  %v6092_v52 = vld [vmem:[%s7363_s14 + $0xb8] sm:$0xff] }
 0xbc0   :  { %4518 = vmatpush.bf16.msrb.mxu0 %v6082_v14  ;;  %v4769_v14 = vld [vmem:[%s6381_s27 + $0x18] sm:$0xff] }
 0xbc4   :  { %4519 = vmatpush.bf16.msrb.mxu0 %v6081_v40  ;;  %v4768_v40 = vld [vmem:[%s6381_s27 + $0x10] sm:$0xff] }
 0xbc7   :  { %5680 = vmatmul.msk.bf16.vlgmr.msrb.gmra.mxu2 %vm3207_vm4, %v4052_v4 }
 0xbd7   :  { %5698 = vmatmul.msk.bf16.vlgmr.msra.gmra.mxu2 %vm3207_vm4, %v4112_v32  ;;  %v6091_v32 = vld [vmem:[%s7363_s14 + $0xb0] sm:$0xff] }
 0xbfa   :  { %v3900_v33 = vpop.f32.mrf.mxu2 }
 0xc02   :  { %v3902_v36 = vpop.f32.mrf.mxu2 }
 0xc03   :  { %v6088_v36 = vld [vmem:[%s7363_s14 + $0x98] sm:$0xff] }
 0xc0a   :  { %v3928_v51 = vpop.f32.mrf.mxu2 }
 0xc0b   :  { %v3929_v61 = vadd.f32 %v3928_v51, %v3900_v33  ;;  %v6090_v51 = vld [vmem:[%s7363_s14 + $0xa8] sm:$0xff] }
 0xc12   :  { %v3930_v9 = vpop.f32.mrf.mxu2 }
 0xc14   :  { %v4047_v63 = vpop.f32.mrf.mxu0 }
 0xc1a   :  { %v3957_v38 = vpop.f32.mrf.mxu2 }
 0xc1b   :  { %v3961_v34 = vadd.f32 %v3957_v38, %v3929_v61  ;;  %v6089_v38 = vld [vmem:[%s7363_s14 + $0xa0] sm:$0xff]  ;;  %v6100_v61 = vld [vmem:[%s7363_s14 + $0xf8] sm:$0xff] }
 0xc1c   :  { %v4049_v10 = vpop.f32.mrf.mxu0 }
 0xc22   :  { %v3959_v50 = vpop.f32.mrf.mxu2 }
 0xc23   :  { %v6086_v50 = vld [vmem:[%s7363_s14 + $0x88] sm:$0xff] }
 0xc24   :  { %v4107_v48 = vpop.f32.mrf.mxu0 }
 0xc2a   :  { %v3987_v43 = vpop.f32.mrf.mxu2 }
 0xc2b   :  { %v3991_v49 = vadd.f32 %v3987_v43, %v3961_v34 }
 0xc2c   :  { %v4109_v8 = vpop.f32.mrf.mxu0 }
 0xc32   :  { %v3989_v47 = vpop.f32.mrf.mxu2 }
 0xc33   :  { %v6096_v47 = vld [vmem:[%s7363_s14 + $0xd8] sm:$0xff] }
 0xc34   :  { %v4197_v2 = vpop.f32.mrf.mxu0 }
 0xc3a   :  { %v4017_v58 = vpop.f32.mrf.mxu2 }
 0xc3b   :  { %v4021_v29 = vadd.f32 %v4017_v58, %v3991_v49  ;;  %v6099_v49 = vld [vmem:[%s7363_s14 + $0xf0] sm:$0xff] }
 0xc3d   :  { %v4051_v20 = vadd.f32 %v4047_v63, %v4021_v29  ;;  %v6087_v63 = vld [vmem:[%s7363_s14 + $0x90] sm:$0xff]  ;;  %v6094_v29 = vld [vmem:[%s7363_s14 + $0xc8] sm:$0xff] }
 0xc42   :  { %v4019_v23 = vpop.f32.mrf.mxu2 }
 0xc43   :  { %v6093_v23 = vld [vmem:[%s7363_s14 + $0xc0] sm:$0xff] }
 0xc4a   :  { %v4077_v26 = vpop.f32.mrf.mxu2 }
 0xc4b   :  { %v4081_v15 = vadd.f32 %v4077_v26, %v4051_v20  ;;  %v6098_v20 = vld [vmem:[%s7363_s14 + $0xe8] sm:$0xff]  ;;  %v6097_v26 = vld [vmem:[%s7363_s14 + $0xe0] sm:$0xff] }
 0xc4d   :  { %v4111_v53 = vadd.f32 %v4107_v48, %v4081_v15  ;;  %v6085_v48 = vld [vmem:[%s7363_s14 + $0x80] sm:$0xff] }
 0xc52   :  { %v4079_v37 = vpop.f32.mrf.mxu2 }
 0xc5a   :  { %v4137_v35 = vpop.f32.mrf.mxu2 }
 0xc5b   :  { %v4141_v6 = vadd.f32 %v4137_v35, %v4111_v53  ;;  %v6104_v53 = vld [vmem:[%s7363_s14 + $0x118] sm:$0xff]  ;;  %v6103_v35 = vld [vmem:[%s7363_s14 + $0x110] sm:$0xff] }
 0xc5d   :  { %v4145_v46 = vadd.f32 %v6168_v27, %v4141_v6 }
 0xc5f   :  { %v4146_v16 = vmax.f32 %v4145_v46, 0.0  ;;  %v6102_v46 = vld [vmem:[%s7363_s14 + $0x108] sm:$0xff] }
 0xc61   :  { %v4283_v0 = vpack.c.bf16 %v4146_v16, %v4146_v16  ;;  %v6101_v16 = vld [vmem:[%s7363_s14 + $0x100] sm:$0xff] }
 0xc62   :  { %v4139_v54 = vpop.f32.mrf.mxu2 }
 0xc63   :  { %v4324_v22 = vsel %vm235_vm0, %v4283_v0, 0 }
 0xc64   :  { %4333 = vmatpush.bf16.msrb.mxu2 %v4324_v22 }
 0xc67   :  { %5725 = vmatmul.msk.bf16.vlgmr.msrb.gmra.mxu2 %vm4307_vm5, %v6065_v55 }
 0xc68   :  { %4789 = vmatpush.msra.mxu2 %v4773_v19 }
 0xc6a   :  { %4790 = vmatpush.msra.mxu2 %v4772_v45 }
 0xc6c   :  { %4791 = vmatpush.msra.mxu2 %v4771_v5 }
 0xc6e   :  { %4792 = vmatpush.msra.mxu2 %v4770_v39 }
 0xc70   :  { %4793 = vmatpush.msra.mxu2 %v4769_v14 }
 0xc72   :  { %4794 = vmatpush.msra.mxu2 %v4768_v40 }
 0xc77   :  { %5726 = vmatmul.msk.bf16.gmra.mxu2 %vm4307_vm5, %v6066_v11 }
 0xc87   :  { %5727 = vmatmul.msk.bf16.gmra.mxu2 %vm4307_vm5, %v6067_v24 }
 0xc97   :  { %5728 = vmatmul.msk.bf16.gmra.mxu2 %vm4307_vm5, %v6068_v17  ;;  %v4199_v17 = vpop.f32.mrf.mxu0 }
 0xca7   :  { %5729 = vmatmul.msk.bf16.gmra.mxu2 %vm4307_vm5, %v4306_v41 }
 0xcea   :  { %v4335_v1 = vpop.f32.mrf.mxu2 }
 0xceb   :  { %v4359_v4 = vpack.c.bf16 %v4335_v1, %v4335_v1 }
 0xced   :  { %5763 = vmatmul.msk.bf16.vlgmr.msra.gmra.mxu0 %vm4385_vm6, %v4359_v4 }
 0xcee   :  { %4600 = vmatpush.bf16.msra.mxu0 %v6092_v52  ;;  %v4767_v52 = vld [vmem:[%s6381_s27 + $0x8] sm:$0xff] }
 0xcef   :  { %4795 = vmatpush.msra.mxu2 %v4767_v52 }
 0xcf2   :  { %v4337_v33 = vpop.f32.mrf.mxu2  ;;  %4601 = vmatpush.bf16.msra.mxu0 %v6091_v32  ;;  %v4766_v32 = vld [vmem:[%s6381_s27] sm:$0xff] }
 0xcf3   :  { %v4360_v9 = vpack.c.bf16 %v4337_v33, %v4337_v33  ;;  %4796 = vmatpush.msra.mxu2 %v4766_v32 }
 0xcf5   :  { %5746 = vmatmul.msk.bf16.vlgmr.msrb.gmra.mxu3 %vm4385_vm6, %v4360_v9  ;;  %v6169_v9 = vld [vmem:[%s7365_s24] ss:$0 sm:$0xff] }
 0xcf6   :  { %4558 = vmatpush.bf16.msrb.mxu3 %v6088_v36  ;;  %4602 = vmatpush.bf16.msra.mxu0 %v6090_v51 }
 0xcfa   :  { %v4340_v10 = vpop.f32.mrf.mxu2  ;;  %4559 = vmatpush.bf16.msrb.mxu3 %v6087_v63  ;;  %4603 = vmatpush.bf16.msra.mxu0 %v6089_v38  ;;  %v6170_v38 = vld [vmem:[%s7366_s30] ss:$0 sm:$0xff] }
 0xcfb   :  { %v4442_v43 = vpack.c.bf16 %v4340_v10, %v4340_v10 }
 0xcfe   :  { %4560 = vmatpush.bf16.msrb.mxu3 %v6086_v50 }
 0xd02   :  { %v4342_v8 = vpop.f32.mrf.mxu2  ;;  %4561 = vmatpush.bf16.msrb.mxu3 %v6085_v48  ;;  %v4198_v48 = vadd.f32 %v6169_v9, %v4197_v2 }
 0xd03   :  { %v4484_v34 = vpack.c.bf16 %v4342_v8, %v4342_v8 }
 0xd05   :  { %5780 = vmatmul.msk.bf16.vlgmr.msra.gmra.mxu3 %vm4385_vm6, %v4442_v43  ;;  %5797 = vmatmul.msk.bf16.vlgmr.msrb.gmra.mxu0 %vm4385_vm6, %v4484_v34 }
 0xd06   :  { %4642 = vmatpush.bf16.msra.mxu3 %v6096_v47  ;;  %4684 = vmatpush.bf16.msrb.mxu0 %v6100_v61  ;;  %v4742_v61 = vld [vmem:[%s6376_s6] sm:$0xff] }
 0xd0a   :  { %v4345_v58 = vpop.f32.mrf.mxu2  ;;  %4643 = vmatpush.bf16.msra.mxu3 %v6095_v30  ;;  %4685 = vmatpush.bf16.msrb.mxu0 %v6099_v49  ;;  %v6171_v49 = vld [vmem:[%s6386_s4] ss:$0 sm:$0xff] }
 0xd0b   :  { %v4526_v37 = vpack.c.bf16 %v4345_v58, %v4345_v58 }
 0xd0e   :  { %4644 = vmatpush.bf16.msra.mxu3 %v6094_v29  ;;  %4686 = vmatpush.bf16.msrb.mxu0 %v6098_v20 }
 0xd12   :  { %v4347_v15 = vpop.f32.mrf.mxu2  ;;  %4645 = vmatpush.bf16.msra.mxu3 %v6093_v23  ;;  %4687 = vmatpush.bf16.msrb.mxu0 %v6097_v26 }
 0xd13   :  { %v4568_v27 = vpack.c.bf16 %v4347_v15, %v4347_v15 }
 0xd15   :  { %5814 = vmatmul.msk.bf16.vlgmr.msrb.gmra.mxu3 %vm4385_vm6, %v4526_v37  ;;  %5831 = vmatmul.msk.bf16.vlgmr.msra.gmra.mxu0 %vm4385_vm6, %v4568_v27 }
 0xd16   :  { %4726 = vmatpush.bf16.msrb.mxu3 %v6104_v53 }
 0xd1a   :  { %v4350_v6 = vpop.f32.mrf.mxu2  ;;  %4727 = vmatpush.bf16.msrb.mxu3 %v6103_v35 }
 0xd1b   :  { %v4610_v0 = vpack.c.bf16 %v4350_v6, %v4350_v6 }
 0xd1e   :  { %4728 = vmatpush.bf16.msrb.mxu3 %v6102_v46 }
 0xd22   :  { %v4352_v54 = vpop.f32.mrf.mxu2  ;;  %4729 = vmatpush.bf16.msrb.mxu3 %v6101_v16 }
 0xd23   :  { %v4652_v22 = vpack.c.bf16 %v4352_v54, %v4352_v54 }
 0xd25   :  { %5848 = vmatmul.msk.bf16.vlgmr.msra.gmra.mxu3 %vm4385_vm6, %v4610_v0  ;;  %5865 = vmatmul.msk.bf16.vlgmr.msrb.gmra.mxu0 %vm4385_vm6, %v4652_v22 }
 0xd2a   :  { %v4355_v55 = vpop.f32.mrf.mxu2 }
 0xd2b   :  { %v4694_v11 = vpack.c.bf16 %v4355_v55, %v4355_v55 }
 0xd32   :  { %v4357_v24 = vpop.f32.mrf.mxu2 }
 0xd35   :  { %5882 = vmatmul.msk.bf16.vlgmr.msrb.gmra.mxu3 %vm4385_vm6, %v4694_v11 }
 0xd6a   :  { %v4438_v42 = vpop.f32.mrf.mxu0 }
 0xd72   :  { %v4440_v21 = vpop.f32.mrf.mxu0 }
 0xd78   :  { %v4398_v41 = vpop.f32.mrf.mxu3 }
 0xd79   :  { %v4439_v18 = vadd.f32 %v4438_v42, %v4398_v41 }
 0xd80   :  { %v4400_v59 = vpop.f32.mrf.mxu3 }
 0xd82   :  { %v4521_v3 = vpop.f32.mrf.mxu0 }
 0xd88   :  { %v4479_v12 = vpop.f32.mrf.mxu3 }
 0xd89   :  { %v4483_v13 = vadd.f32 %v4479_v12, %v4439_v18 }
 0xd8a   :  { %v4523_v57 = vpop.f32.mrf.mxu0 }
 0xd8b   :  { %v4525_v1 = vadd.f32 %v4521_v3, %v4483_v13 }
 0xd90   :  { %v4481_v28 = vpop.f32.mrf.mxu3 }
 0xd92   :  { %v4605_v56 = vpop.f32.mrf.mxu0 }
 0xd98   :  { %v4563_v7 = vpop.f32.mrf.mxu3 }
 0xd99   :  { %v4567_v4 = vadd.f32 %v4563_v7, %v4525_v1 }
 0xd9a   :  { %v4607_v60 = vpop.f32.mrf.mxu0 }
 0xd9b   :  { %v4609_v36 = vadd.f32 %v4605_v56, %v4567_v4 }
 0xda0   :  { %v4565_v25 = vpop.f32.mrf.mxu3 }
 0xda2   :  { %v4689_v44 = vpop.f32.mrf.mxu0 }
 0xda8   :  { %v4647_v31 = vpop.f32.mrf.mxu3 }
 0xda9   :  { %v4651_v51 = vadd.f32 %v4647_v31, %v4609_v36 }
 0xdaa   :  { %v4691_v62 = vpop.f32.mrf.mxu0 }
 0xdab   :  { %v4693_v63 = vadd.f32 %v4689_v44, %v4651_v51 }
 0xdb0   :  { %v4649_v33 = vpop.f32.mrf.mxu3 }
 0xdb8   :  { %v4731_v10 = vpop.f32.mrf.mxu3 }
 0xdb9   :  { %v4735_v50 = vadd.f32 %v4731_v10, %v4693_v63 }
 0xdbb   :  { %v4739_v43 = vadd.f32 %v6170_v38, %v4735_v50 }
 0xdbd   :  { %v4740_v8 = vadd.f32 %v4739_v43, %v4198_v48 }
 0xdbf   :  { %v4741_v47 = vmax.f32 %v4740_v8, 0.0 }
 0xdc0   :  { %v4733_v34 = vpop.f32.mrf.mxu3 }
 0xdc1   :  { %4761 = vmatpush.msra.mxu0 %v4741_v47 }
 0xdc2   :  { %5883 = vmatmul.msk.f32.vlgmr.msra.gmra.mxu0 %vm4307_vm5, %v4742_v61 }
 0xe3f   :  { %v4763_v30 = vpop.f32.mrf.mxu0 }
 0xe40   :  { %5884 = vmatmul.msk.f32.vlgmr.msra.gmra.mxu2 %vm4385_vm6, %v4763_v30 }
 0xec3   :  { %v4798_v58 = vpop.f32.mrf.mxu2 }
 0xec4   :  { %v4799_v29 = vadd.f32 %v6171_v49, %v4798_v58 }
 0xec6   :  { %4801 = vst [vmem:[%s6391_s12] sm:$0xff] %v4799_v29 }
 0xec7   :  { %4806 = vsyncpa [#allocation3], 1 }

</bundles_post_ra>
